<compile_context>
chip_gen: v6e
topology: v6e:2x2x1
jax: 0.10.0
libtpu: 0.0.40
codegen_flags: <defaults>
</compile_context>

<pallas_src>
import jax
import jax.numpy as jnp
import numpy as np
from jax.experimental import pallas as pl
from jax.experimental.pallas import tpu as pltpu

LANE = 128
KH = KW = 3
N_TAPS = KH * KW
CFG = [(3, 16, 2), (16, 32, 2), (32, 64, 1)]     # (cin, cout, stride)
C0, C1, _ = CFG[0]
_, C2, _ = CFG[1]
_, C3, _ = CFG[2]
FEAT_DIM = C3

# fixed small problem size (all spatial dims stay multiples of 8 -> trivial
# in-kernel reshapes / tile-aligned layouts)
B = 2
H = W = 32
H1, W1 = H // 2, W // 2          # 16x16 after stem (stride 2)
H2, W2 = H1 // 2, W1 // 2        # 8x8 after block 2 (stride 2)
H3, W3 = H2, W2                  # 8x8 after block 3 (stride 1)

K1 = N_TAPS * C0                 # 27
K1P = 32                         # padded to a multiple of 8
K2 = N_TAPS * C1                 # 144
K3 = N_TAPS * C2                 # 288
M1 = B * H1 * W1                 # 512
M2 = B * H2 * W2                 # 128
M3 = B * H3 * W3                 # 128
GROUP = M1 // 4                  # 128 rows per phase group


# ----------------------------------------------------------------------------
# Fused Pallas kernel: conv1 -> conv2 -> conv3 (each +folded-BN bias +ReLU)
#                      -> global average pool
# ----------------------------------------------------------------------------
def _fused_backbone_kernel(
        x1_ref,                  # (M1, K1P)  bf16, layer-1 im2col, phase-grouped rows
        w1_ref, b1_ref,          # (K1P, 128) bf16 / (1, 128) f32
        w2_ref, b2_ref,          # (K2, 128)  bf16 / (1, 128) f32
        w3_ref, b3_ref,          # (K3, 128)  bf16 / (1, 128) f32
        o_ref,                   # (B, 128)   f32 pooled features (lane-dense)
        p00, p01, p10, p11,      # (B, H2+1, W2+1, C1) f32 phase planes (layer-2 input)
        l3pad,                   # (B, H3+2, W3+2, C2) f32 padded layer-3 input
        im2_l2,                  # (M2, K2) f32 im2col staging
        im2_l3):                 # (M3, K3) f32 im2col staging
    planes = ((p00, p01), (p10, p11))

    def gemm_bias_relu(x_bf16, w_ref, b_ref):
        # one K-stacked MXU GEMM per layer, f32 accumulate,
        # folded-BN bias + ReLU epilogue in f32
        acc = jnp.dot(x_bf16, w_ref[...], preferred_element_type=jnp.float32)
        return jnp.maximum(acc + b_ref[...], 0.0)

    # zero-padded scratch borders must read as exact zeros
    for p in range(2):
        for q in range(2):
            planes[p][q][...] = jnp.zeros_like(planes[p][q])
    l3pad[...] = jnp.zeros_like(l3pad)

    # ---- layer 1 (stride 2, done as 4 phase-group GEMMs of M=128) ----------
    # phase group (p, q) holds output pixels with (ho1, wo1) parity (1-p, 1-q);
    # its rows land exactly in the interior of phase plane (p, q).
    for p in range(2):
        for q in range(2):
            g = 2 * p + q
            xg = x1_ref[g * GROUP:(g + 1) * GROUP, :]
            yg = gemm_bias_relu(xg, w1_ref, b1_ref)[:, :C1]       # (128, C1) f32
            planes[p][q][:, 1 - p:1 - p + H2, 1 - q:1 - q + W2, :] = (
                yg.reshape(B, H2, W2, C1))

    # ---- layer 2 (stride 2): unit-stride shifted reads of the phase planes -
    # tap (ki, kj) of the stride-2 conv == shift (ki//2, kj//2) of plane
    # (ki%2, kj%2); assemble the K-stacked im2col in VMEM scratch.
    for ki in range(KH):
        for kj in range(KW):
            t = ki * KW + kj
            pc = planes[ki % 2][kj % 2][:, ki // 2:ki // 2 + H2,
                                        kj // 2:kj // 2 + W2, :]
            im2_l2[:, t * C1:(t + 1) * C1] = pc.reshape(M2, C1)
    y2 = gemm_bias_relu(im2_l2[...].astype(jnp.bfloat16), w2_ref, b2_ref)
    y2 = y2[:, :C2]                                               # (M2, C2) f32

    # ---- layer 3 (stride 1): zero-padded scratch + 9 unit-stride shifts ----
    l3pad[:, 1:1 + H3, 1:1 + W3, :] = y2.reshape(B, H3, W3, C2)
    for ki in range(KH):
        for kj in range(KW):
            t = ki * KW + kj
            pc = l3pad[:, ki:ki + H3, kj:kj + W3, :]
            im2_l3[:, t * C2:(t + 1) * C2] = pc.reshape(M3, C2)
    y3 = gemm_bias_relu(im2_l3[...].astype(jnp.bfloat16), w3_ref, b3_ref)

    # ---- global average pool: exact f32 mean on the VPU/XLU ----------------
    o_ref[...] = jnp.mean(y3.reshape(B, H3 * W3, LANE), axis=1).astype(o_ref.dtype)


def fused_backbone(consts, x1_bf16):
    vmem = pl.BlockSpec(memory_space=pltpu.MemorySpace.VMEM)
    return pl.pallas_call(
        _fused_backbone_kernel,
        out_shape=jax.ShapeDtypeStruct((B, LANE), jnp.float32),
        in_specs=[vmem] * 7,
        out_specs=vmem,
        scratch_shapes=[
            pltpu.VMEM((B, H2 + 1, W2 + 1, C1), jnp.float32),   # phase plane (0,0)
            pltpu.VMEM((B, H2 + 1, W2 + 1, C1), jnp.float32),   # phase plane (0,1)
            pltpu.VMEM((B, H2 + 1, W2 + 1, C1), jnp.float32),   # phase plane (1,0)
            pltpu.VMEM((B, H2 + 1, W2 + 1, C1), jnp.float32),   # phase plane (1,1)
            pltpu.VMEM((B, H3 + 2, W3 + 2, C2), jnp.float32),   # padded layer-3 input
            pltpu.VMEM((M2, K2), jnp.float32),                  # im2col layer 2
            pltpu.VMEM((M3, K3), jnp.float32),                  # im2col layer 3
        ],
        compiler_params=pltpu.CompilerParams(vmem_limit_bytes=32 * 1024 * 1024),
    )(x1_bf16, consts["w1"], consts["b1"], consts["w2"], consts["b2"],
      consts["w3"], consts["b3"])


# ----------------------------------------------------------------------------
# Wrapper-side data prep (plain JAX): layer-1 im2col with phase-grouped rows
# ----------------------------------------------------------------------------
def build_layer1_patches(x_nchw):
    x = jnp.transpose(x_nchw, (0, 2, 3, 1)).astype(jnp.float32)   # NCHW -> NHWC
    xp = jnp.pad(x, ((0, 0), (1, 1), (1, 1), (0, 0)))
    taps = []
    for ki in range(KH):
        for kj in range(KW):
            taps.append(xp[:, ki:ki + 2 * H1 - 1:2, kj:kj + 2 * W1 - 1:2, :])
    p = jnp.concatenate(taps, axis=-1)                            # (B, H1, W1, 27)
    p = jnp.pad(p, ((0, 0), (0, 0), (0, 0), (0, K1P - K1)))       # K pad to 32
    groups = []
    for pp in range(2):        # rows grouped by output-pixel parity (phase)
        for qq in range(2):
            g = p[:, 1 - pp::2, 1 - qq::2, :]                     # (B, H2, W2, K1P)
            groups.append(g.reshape(GROUP, K1P))
    return jnp.concatenate(groups, axis=0).astype(jnp.bfloat16)   # (M1, K1P)


# ----------------------------------------------------------------------------
# Parameter / constant construction (done once at setup)
# ----------------------------------------------------------------------------
def init_backbone_params(key):
    """Deterministic synthetic conv + BatchNorm (eval-mode) parameters."""
    eps = 1e-5
    layers = []
    keys = jax.random.split(key, 4 * len(CFG))
    for li, (cin, cout, stride) in enumerate(CFG):
        kw_, kg, kb, km = keys[4 * li:4 * li + 4]
        fan_in = cin * KH * KW
        w = jax.random.normal(kw_, (cout, cin, KH, KW), jnp.float32) / np.sqrt(fan_in)
        gamma = 1.0 + 0.1 * jax.random.normal(kg, (cout,), jnp.float32)
        beta = 0.1 * jax.random.normal(kb, (cout,), jnp.float32)
        running_mean = 0.1 * jax.random.normal(km, (cout,), jnp.float32)
        running_var = jnp.ones((cout,), jnp.float32)
        scale = gamma / jnp.sqrt(running_var + eps)
        bias = beta - running_mean * scale
        layers.append(dict(w=w, scale=scale, bias=bias,
                           cin=cin, cout=cout, stride=stride))
    return layers


def build_kernel_constants(layers):
    """K-stacked, BN-scale-folded, lane-padded bf16 weights + f32 biases."""
    consts = {}
    kpads = [K1P, K2, K3]
    for li, layer in enumerate(layers, start=1):
        cin, cout = layer["cin"], layer["cout"]
        # [cout, cin, kh, kw] -> [kh, kw, cin, cout] -> [9*cin, cout]
        wt = jnp.transpose(layer["w"], (2, 3, 1, 0)).reshape(N_TAPS * cin, cout)
        wt = wt * layer["scale"][None, :]                  # fold BN scale
        wpad = jnp.zeros((kpads[li - 1], LANE), jnp.float32)
        wpad = wpad.at[:N_TAPS * cin, :cout].set(wt)
        bpad = jnp.zeros((1, LANE), jnp.float32).at[0, :cout].set(layer["bias"])
        consts[f"w{li}"] = wpad.astype(jnp.bfloat16)
        consts[f"b{li}"] = bpad
    return consts


@jax.jit
def image_model_forward(consts, x_nchw):
    """Equivalent of ImageModel.forward: pooled backbone features, no classifier."""
    x1 = build_layer1_patches(x_nchw)
    feats_padded = fused_backbone(consts, x1)              # (B, 128)
    return feats_padded[:, :FEAT_DIM]                      # (B, 64)


def reference_forward(layers, x_nchw):
    """Pure-JAX f32 reference (conv + BN + ReLU + GAP) for correctness checking."""
    x = jnp.transpose(x_nchw, (0, 2, 3, 1)).astype(jnp.float32)
    for layer in layers:
        w_hwio = jnp.transpose(layer["w"], (2, 3, 1, 0))
        y = jax.lax.conv_general_dilated(
            x, w_hwio, window_strides=(layer["stride"], layer["stride"]),
            padding=((1, 1), (1, 1)),
            dimension_numbers=("NHWC", "HWIO", "NHWC"))
        x = jnp.maximum(y * layer["scale"] + layer["bias"], 0.0)
    return jnp.mean(x, axis=(1, 2))


if __name__ == "__main__":
    key = jax.random.PRNGKey(0)
    kx, kp = jax.random.split(key)
    x = jax.random.normal(kx, (B, C0, H, W), jnp.float32)   # NCHW, like PyTorch

    layers = init_backbone_params(kp)
    consts = build_kernel_constants(layers)

    feats = jax.block_until_ready(image_model_forward(consts, x))

    assert feats.shape == (B, FEAT_DIM), feats.shape
    assert bool(jnp.all(jnp.isfinite(feats)))

    # loose tolerance: kernel uses bf16 MXU operands, reference is pure f32
    ref = reference_forward(layers, x)
    max_err = float(jnp.max(jnp.abs(feats - ref)))
    assert bool(jnp.all(jnp.abs(feats - ref) <= 0.1 + 0.1 * jnp.abs(ref))), max_err

    print("KERNEL_OK")
</pallas_src>

<mosaic_0001>
module attributes {stable_mosaic.version = 11 : i64} {
  func.func @_fused_backbone_kernel(%arg0: memref<512x32xbf16, #tpu.memory_space<vmem>>, %arg1: memref<32x128xbf16, #tpu.memory_space<vmem>>, %arg2: memref<1x128xf32, #tpu.memory_space<vmem>>, %arg3: memref<144x128xbf16, #tpu.memory_space<vmem>>, %arg4: memref<1x128xf32, #tpu.memory_space<vmem>>, %arg5: memref<288x128xbf16, #tpu.memory_space<vmem>>, %arg6: memref<1x128xf32, #tpu.memory_space<vmem>>, %arg7: memref<2x128xf32, #tpu.memory_space<vmem>>, %arg8: memref<2x9x9x16xf32, #tpu.memory_space<vmem>>, %arg9: memref<2x9x9x16xf32, #tpu.memory_space<vmem>>, %arg10: memref<2x9x9x16xf32, #tpu.memory_space<vmem>>, %arg11: memref<2x9x9x16xf32, #tpu.memory_space<vmem>>, %arg12: memref<2x10x10x32xf32, #tpu.memory_space<vmem>>, %arg13: memref<128x144xf32, #tpu.memory_space<vmem>>, %arg14: memref<128x288xf32, #tpu.memory_space<vmem>>) attributes {dimension_semantics = [], scalar_prefetch = 0 : i64, scratch_operands = 7 : i64, tpu.core_type = #tpu.core_type<tc>} {
    %cst = arith.constant 0.000000e+00 : f32
    %0 = vector.broadcast %cst : f32 to vector<2x9x9x16xf32>
    %c0 = arith.constant 0 : index
    %c0_0 = arith.constant 0 : index
    %c0_1 = arith.constant 0 : index
    %c0_2 = arith.constant 0 : index
    %1 = vector.load %arg8[%c0, %c0_0, %c0_1, %c0_2] : memref<2x9x9x16xf32, #tpu.memory_space<vmem>>, vector<2x9x9x16xf32>
    tpu.vector_store %arg8[%c0, %c0_0, %c0_1, %c0_2], %0 {strides = array<i32>} : memref<2x9x9x16xf32, #tpu.memory_space<vmem>>, vector<2x9x9x16xf32>,
    %cst_3 = arith.constant 0.000000e+00 : f32
    %2 = vector.broadcast %cst_3 : f32 to vector<2x9x9x16xf32>
    %c0_4 = arith.constant 0 : index
    %c0_5 = arith.constant 0 : index
    %c0_6 = arith.constant 0 : index
    %c0_7 = arith.constant 0 : index
    %3 = vector.load %arg9[%c0_4, %c0_5, %c0_6, %c0_7] : memref<2x9x9x16xf32, #tpu.memory_space<vmem>>, vector<2x9x9x16xf32>
    tpu.vector_store %arg9[%c0_4, %c0_5, %c0_6, %c0_7], %2 {strides = array<i32>} : memref<2x9x9x16xf32, #tpu.memory_space<vmem>>, vector<2x9x9x16xf32>,
    %cst_8 = arith.constant 0.000000e+00 : f32
    %4 = vector.broadcast %cst_8 : f32 to vector<2x9x9x16xf32>
    %c0_9 = arith.constant 0 : index
    %c0_10 = arith.constant 0 : index
    %c0_11 = arith.constant 0 : index
    %c0_12 = arith.constant 0 : index
    %5 = vector.load %arg10[%c0_9, %c0_10, %c0_11, %c0_12] : memref<2x9x9x16xf32, #tpu.memory_space<vmem>>, vector<2x9x9x16xf32>
    tpu.vector_store %arg10[%c0_9, %c0_10, %c0_11, %c0_12], %4 {strides = array<i32>} : memref<2x9x9x16xf32, #tpu.memory_space<vmem>>, vector<2x9x9x16xf32>,
    %cst_13 = arith.constant 0.000000e+00 : f32
    %6 = vector.broadcast %cst_13 : f32 to vector<2x9x9x16xf32>
    %c0_14 = arith.constant 0 : index
    %c0_15 = arith.constant 0 : index
    %c0_16 = arith.constant 0 : index
    %c0_17 = arith.constant 0 : index
    %7 = vector.load %arg11[%c0_14, %c0_15, %c0_16, %c0_17] : memref<2x9x9x16xf32, #tpu.memory_space<vmem>>, vector<2x9x9x16xf32>
    tpu.vector_store %arg11[%c0_14, %c0_15, %c0_16, %c0_17], %6 {strides = array<i32>} : memref<2x9x9x16xf32, #tpu.memory_space<vmem>>, vector<2x9x9x16xf32>,
    %cst_18 = arith.constant 0.000000e+00 : f32
    %8 = vector.broadcast %cst_18 : f32 to vector<2x10x10x32xf32>
    %c0_19 = arith.constant 0 : index
    %c0_20 = arith.constant 0 : index
    %c0_21 = arith.constant 0 : index
    %c0_22 = arith.constant 0 : index
    %9 = vector.load %arg12[%c0_19, %c0_20, %c0_21, %c0_22] : memref<2x10x10x32xf32, #tpu.memory_space<vmem>>, vector<2x10x10x32xf32>
    tpu.vector_store %arg12[%c0_19, %c0_20, %c0_21, %c0_22], %8 {strides = array<i32>} : memref<2x10x10x32xf32, #tpu.memory_space<vmem>>, vector<2x10x10x32xf32>,
    %c0_23 = arith.constant 0 : index
    %c0_24 = arith.constant 0 : index
    %10 = vector.load %arg0[%c0_23, %c0_24] : memref<512x32xbf16, #tpu.memory_space<vmem>>, vector<128x32xbf16>
    %c0_25 = arith.constant 0 : index
    %c0_26 = arith.constant 0 : index
    %11 = vector.load %arg1[%c0_25, %c0_26] : memref<32x128xbf16, #tpu.memory_space<vmem>>, vector<32x128xbf16>
    %cst_27 = arith.constant dense<0.000000e+00> : vector<128x128xf32>
    %12 = tpu.matmul %10, %11, %cst_27 {dimension_numbers = #tpu.dot_dimension_numbers<[1], [0], [0], [1], [0, 0, 1, 1], [], []>} : vector<128x32xbf16>, vector<32x128xbf16>, vector<128x128xf32> -> vector<128x128xf32>
    %c0_28 = arith.constant 0 : index
    %c0_29 = arith.constant 0 : index
    %13 = vector.load %arg2[%c0_28, %c0_29] : memref<1x128xf32, #tpu.memory_space<vmem>>, vector<1x128xf32>
    %14 = vector.broadcast %13 : vector<1x128xf32> to vector<128x128xf32>
    %15 = arith.addf %12, %14 : vector<128x128xf32>
    %cst_30 = arith.constant 0.000000e+00 : f32
    %16 = vector.broadcast %cst_30 : f32 to vector<128x128xf32>
    %17 = arith.maximumf %15, %16 : vector<128x128xf32>
    %18 = vector.extract_strided_slice %17 {offsets = [0, 0], sizes = [128, 16], strides = [1, 1]} : vector<128x128xf32> to vector<128x16xf32>
    %19 = vector.shape_cast %18 : vector<128x16xf32> to vector<2x8x8x16xf32>
    %c0_31 = arith.constant 0 : index
    %c1 = arith.constant 1 : index
    %c1_32 = arith.constant 1 : index
    %c0_33 = arith.constant 0 : index
    %20 = vector.load %arg8[%c0_31, %c1, %c1_32, %c0_33] : memref<2x9x9x16xf32, #tpu.memory_space<vmem>>, vector<2x8x8x16xf32>
    tpu.vector_store %arg8[%c0_31, %c1, %c1_32, %c0_33], %19 {strides = array<i32>} : memref<2x9x9x16xf32, #tpu.memory_space<vmem>>, vector<2x8x8x16xf32>,
    %c128 = arith.constant 128 : index
    %c0_34 = arith.constant 0 : index
    %21 = vector.load %arg0[%c128, %c0_34] : memref<512x32xbf16, #tpu.memory_space<vmem>>, vector<128x32xbf16>
    %c0_35 = arith.constant 0 : index
    %c0_36 = arith.constant 0 : index
    %22 = vector.load %arg1[%c0_35, %c0_36] : memref<32x128xbf16, #tpu.memory_space<vmem>>, vector<32x128xbf16>
    %cst_37 = arith.constant dense<0.000000e+00> : vector<128x128xf32>
    %23 = tpu.matmul %21, %22, %cst_37 {dimension_numbers = #tpu.dot_dimension_numbers<[1], [0], [0], [1], [0, 0, 1, 1], [], []>} : vector<128x32xbf16>, vector<32x128xbf16>, vector<128x128xf32> -> vector<128x128xf32>
    %c0_38 = arith.constant 0 : index
    %c0_39 = arith.constant 0 : index
    %24 = vector.load %arg2[%c0_38, %c0_39] : memref<1x128xf32, #tpu.memory_space<vmem>>, vector<1x128xf32>
    %25 = vector.broadcast %24 : vector<1x128xf32> to vector<128x128xf32>
    %26 = arith.addf %23, %25 : vector<128x128xf32>
    %cst_40 = arith.constant 0.000000e+00 : f32
    %27 = vector.broadcast %cst_40 : f32 to vector<128x128xf32>
    %28 = arith.maximumf %26, %27 : vector<128x128xf32>
    %29 = vector.extract_strided_slice %28 {offsets = [0, 0], sizes = [128, 16], strides = [1, 1]} : vector<128x128xf32> to vector<128x16xf32>
    %30 = vector.shape_cast %29 : vector<128x16xf32> to vector<2x8x8x16xf32>
    %c0_41 = arith.constant 0 : index
    %c1_42 = arith.constant 1 : index
    %c0_43 = arith.constant 0 : index
    %c0_44 = arith.constant 0 : index
    %31 = vector.load %arg9[%c0_41, %c1_42, %c0_43, %c0_44] : memref<2x9x9x16xf32, #tpu.memory_space<vmem>>, vector<2x8x8x16xf32>
    tpu.vector_store %arg9[%c0_41, %c1_42, %c0_43, %c0_44], %30 {strides = array<i32>} : memref<2x9x9x16xf32, #tpu.memory_space<vmem>>, vector<2x8x8x16xf32>,
    %c256 = arith.constant 256 : index
    %c0_45 = arith.constant 0 : index
    %32 = vector.load %arg0[%c256, %c0_45] : memref<512x32xbf16, #tpu.memory_space<vmem>>, vector<128x32xbf16>
    %c0_46 = arith.constant 0 : index
    %c0_47 = arith.constant 0 : index
    %33 = vector.load %arg1[%c0_46, %c0_47] : memref<32x128xbf16, #tpu.memory_space<vmem>>, vector<32x128xbf16>
    %cst_48 = arith.constant dense<0.000000e+00> : vector<128x128xf32>
    %34 = tpu.matmul %32, %33, %cst_48 {dimension_numbers = #tpu.dot_dimension_numbers<[1], [0], [0], [1], [0, 0, 1, 1], [], []>} : vector<128x32xbf16>, vector<32x128xbf16>, vector<128x128xf32> -> vector<128x128xf32>
    %c0_49 = arith.constant 0 : index
    %c0_50 = arith.constant 0 : index
    %35 = vector.load %arg2[%c0_49, %c0_50] : memref<1x128xf32, #tpu.memory_space<vmem>>, vector<1x128xf32>
    %36 = vector.broadcast %35 : vector<1x128xf32> to vector<128x128xf32>
    %37 = arith.addf %34, %36 : vector<128x128xf32>
    %cst_51 = arith.constant 0.000000e+00 : f32
    %38 = vector.broadcast %cst_51 : f32 to vector<128x128xf32>
    %39 = arith.maximumf %37, %38 : vector<128x128xf32>
    %40 = vector.extract_strided_slice %39 {offsets = [0, 0], sizes = [128, 16], strides = [1, 1]} : vector<128x128xf32> to vector<128x16xf32>
    %41 = vector.shape_cast %40 : vector<128x16xf32> to vector<2x8x8x16xf32>
    %c0_52 = arith.constant 0 : index
    %c0_53 = arith.constant 0 : index
    %c1_54 = arith.constant 1 : index
    %c0_55 = arith.constant 0 : index
    %42 = vector.load %arg10[%c0_52, %c0_53, %c1_54, %c0_55] : memref<2x9x9x16xf32, #tpu.memory_space<vmem>>, vector<2x8x8x16xf32>
    tpu.vector_store %arg10[%c0_52, %c0_53, %c1_54, %c0_55], %41 {strides = array<i32>} : memref<2x9x9x16xf32, #tpu.memory_space<vmem>>, vector<2x8x8x16xf32>,
    %c384 = arith.constant 384 : index
    %c0_56 = arith.constant 0 : index
    %43 = vector.load %arg0[%c384, %c0_56] : memref<512x32xbf16, #tpu.memory_space<vmem>>, vector<128x32xbf16>
    %c0_57 = arith.constant 0 : index
    %c0_58 = arith.constant 0 : index
    %44 = vector.load %arg1[%c0_57, %c0_58] : memref<32x128xbf16, #tpu.memory_space<vmem>>, vector<32x128xbf16>
    %cst_59 = arith.constant dense<0.000000e+00> : vector<128x128xf32>
    %45 = tpu.matmul %43, %44, %cst_59 {dimension_numbers = #tpu.dot_dimension_numbers<[1], [0], [0], [1], [0, 0, 1, 1], [], []>} : vector<128x32xbf16>, vector<32x128xbf16>, vector<128x128xf32> -> vector<128x128xf32>
    %c0_60 = arith.constant 0 : index
    %c0_61 = arith.constant 0 : index
    %46 = vector.load %arg2[%c0_60, %c0_61] : memref<1x128xf32, #tpu.memory_space<vmem>>, vector<1x128xf32>
    %47 = vector.broadcast %46 : vector<1x128xf32> to vector<128x128xf32>
    %48 = arith.addf %45, %47 : vector<128x128xf32>
    %cst_62 = arith.constant 0.000000e+00 : f32
    %49 = vector.broadcast %cst_62 : f32 to vector<128x128xf32>
    %50 = arith.maximumf %48, %49 : vector<128x128xf32>
    %51 = vector.extract_strided_slice %50 {offsets = [0, 0], sizes = [128, 16], strides = [1, 1]} : vector<128x128xf32> to vector<128x16xf32>
    %52 = vector.shape_cast %51 : vector<128x16xf32> to vector<2x8x8x16xf32>
    %c0_63 = arith.constant 0 : index
    %c0_64 = arith.constant 0 : index
    %c0_65 = arith.constant 0 : index
    %c0_66 = arith.constant 0 : index
    %53 = vector.load %arg11[%c0_63, %c0_64, %c0_65, %c0_66] : memref<2x9x9x16xf32, #tpu.memory_space<vmem>>, vector<2x8x8x16xf32>
    tpu.vector_store %arg11[%c0_63, %c0_64, %c0_65, %c0_66], %52 {strides = array<i32>} : memref<2x9x9x16xf32, #tpu.memory_space<vmem>>, vector<2x8x8x16xf32>,
    %c0_67 = arith.constant 0 : index
    %c0_68 = arith.constant 0 : index
    %c0_69 = arith.constant 0 : index
    %c0_70 = arith.constant 0 : index
    %54 = vector.load %arg8[%c0_67, %c0_68, %c0_69, %c0_70] : memref<2x9x9x16xf32, #tpu.memory_space<vmem>>, vector<2x8x8x16xf32>
    %55 = vector.shape_cast %54 : vector<2x8x8x16xf32> to vector<128x16xf32>
    %c0_71 = arith.constant 0 : index
    %c0_72 = arith.constant 0 : index
    %56 = vector.load %arg13[%c0_71, %c0_72] : memref<128x144xf32, #tpu.memory_space<vmem>>, vector<128x16xf32>
    tpu.vector_store %arg13[%c0_71, %c0_72], %55 {strides = array<i32>} : memref<128x144xf32, #tpu.memory_space<vmem>>, vector<128x16xf32>,
    %c0_73 = arith.constant 0 : index
    %c0_74 = arith.constant 0 : index
    %c0_75 = arith.constant 0 : index
    %c0_76 = arith.constant 0 : index
    %57 = vector.load %arg9[%c0_73, %c0_74, %c0_75, %c0_76] : memref<2x9x9x16xf32, #tpu.memory_space<vmem>>, vector<2x8x8x16xf32>
    %58 = vector.shape_cast %57 : vector<2x8x8x16xf32> to vector<128x16xf32>
    %c0_77 = arith.constant 0 : index
    %c16 = arith.constant 16 : index
    %59 = vector.load %arg13[%c0_77, %c16] : memref<128x144xf32, #tpu.memory_space<vmem>>, vector<128x16xf32>
    tpu.vector_store %arg13[%c0_77, %c16], %58 {strides = array<i32>} : memref<128x144xf32, #tpu.memory_space<vmem>>, vector<128x16xf32>,
    %c0_78 = arith.constant 0 : index
    %c0_79 = arith.constant 0 : index
    %c1_80 = arith.constant 1 : index
    %c0_81 = arith.constant 0 : index
    %60 = vector.load %arg8[%c0_78, %c0_79, %c1_80, %c0_81] : memref<2x9x9x16xf32, #tpu.memory_space<vmem>>, vector<2x8x8x16xf32>
    %61 = vector.shape_cast %60 : vector<2x8x8x16xf32> to vector<128x16xf32>
    %c0_82 = arith.constant 0 : index
    %c32 = arith.constant 32 : index
    %62 = vector.load %arg13[%c0_82, %c32] : memref<128x144xf32, #tpu.memory_space<vmem>>, vector<128x16xf32>
    tpu.vector_store %arg13[%c0_82, %c32], %61 {strides = array<i32>} : memref<128x144xf32, #tpu.memory_space<vmem>>, vector<128x16xf32>,
    %c0_83 = arith.constant 0 : index
    %c0_84 = arith.constant 0 : index
    %c0_85 = arith.constant 0 : index
    %c0_86 = arith.constant 0 : index
    %63 = vector.load %arg10[%c0_83, %c0_84, %c0_85, %c0_86] : memref<2x9x9x16xf32, #tpu.memory_space<vmem>>, vector<2x8x8x16xf32>
    %64 = vector.shape_cast %63 : vector<2x8x8x16xf32> to vector<128x16xf32>
    %c0_87 = arith.constant 0 : index
    %c48 = arith.constant 48 : index
    %65 = vector.load %arg13[%c0_87, %c48] : memref<128x144xf32, #tpu.memory_space<vmem>>, vector<128x16xf32>
    tpu.vector_store %arg13[%c0_87, %c48], %64 {strides = array<i32>} : memref<128x144xf32, #tpu.memory_space<vmem>>, vector<128x16xf32>,
    %c0_88 = arith.constant 0 : index
    %c0_89 = arith.constant 0 : index
    %c0_90 = arith.constant 0 : index
    %c0_91 = arith.constant 0 : index
    %66 = vector.load %arg11[%c0_88, %c0_89, %c0_90, %c0_91] : memref<2x9x9x16xf32, #tpu.memory_space<vmem>>, vector<2x8x8x16xf32>
    %67 = vector.shape_cast %66 : vector<2x8x8x16xf32> to vector<128x16xf32>
    %c0_92 = arith.constant 0 : index
    %c64 = arith.constant 64 : index
    %68 = vector.load %arg13[%c0_92, %c64] : memref<128x144xf32, #tpu.memory_space<vmem>>, vector<128x16xf32>
    tpu.vector_store %arg13[%c0_92, %c64], %67 {strides = array<i32>} : memref<128x144xf32, #tpu.memory_space<vmem>>, vector<128x16xf32>,
    %c0_93 = arith.constant 0 : index
    %c0_94 = arith.constant 0 : index
    %c1_95 = arith.constant 1 : index
    %c0_96 = arith.constant 0 : index
    %69 = vector.load %arg10[%c0_93, %c0_94, %c1_95, %c0_96] : memref<2x9x9x16xf32, #tpu.memory_space<vmem>>, vector<2x8x8x16xf32>
    %70 = vector.shape_cast %69 : vector<2x8x8x16xf32> to vector<128x16xf32>
    %c0_97 = arith.constant 0 : index
    %c80 = arith.constant 80 : index
    %71 = vector.load %arg13[%c0_97, %c80] : memref<128x144xf32, #tpu.memory_space<vmem>>, vector<128x16xf32>
    tpu.vector_store %arg13[%c0_97, %c80], %70 {strides = array<i32>} : memref<128x144xf32, #tpu.memory_space<vmem>>, vector<128x16xf32>,
    %c0_98 = arith.constant 0 : index
    %c1_99 = arith.constant 1 : index
    %c0_100 = arith.constant 0 : index
    %c0_101 = arith.constant 0 : index
    %72 = vector.load %arg8[%c0_98, %c1_99, %c0_100, %c0_101] : memref<2x9x9x16xf32, #tpu.memory_space<vmem>>, vector<2x8x8x16xf32>
    %73 = vector.shape_cast %72 : vector<2x8x8x16xf32> to vector<128x16xf32>
    %c0_102 = arith.constant 0 : index
    %c96 = arith.constant 96 : index
    %74 = vector.load %arg13[%c0_102, %c96] : memref<128x144xf32, #tpu.memory_space<vmem>>, vector<128x16xf32>
    tpu.vector_store %arg13[%c0_102, %c96], %73 {strides = array<i32>} : memref<128x144xf32, #tpu.memory_space<vmem>>, vector<128x16xf32>,
    %c0_103 = arith.constant 0 : index
    %c1_104 = arith.constant 1 : index
    %c0_105 = arith.constant 0 : index
    %c0_106 = arith.constant 0 : index
    %75 = vector.load %arg9[%c0_103, %c1_104, %c0_105, %c0_106] : memref<2x9x9x16xf32, #tpu.memory_space<vmem>>, vector<2x8x8x16xf32>
    %76 = vector.shape_cast %75 : vector<2x8x8x16xf32> to vector<128x16xf32>
    %c0_107 = arith.constant 0 : index
    %c112 = arith.constant 112 : index
    %77 = vector.load %arg13[%c0_107, %c112] : memref<128x144xf32, #tpu.memory_space<vmem>>, vector<128x16xf32>
    tpu.vector_store %arg13[%c0_107, %c112], %76 {strides = array<i32>} : memref<128x144xf32, #tpu.memory_space<vmem>>, vector<128x16xf32>,
    %c0_108 = arith.constant 0 : index
    %c1_109 = arith.constant 1 : index
    %c1_110 = arith.constant 1 : index
    %c0_111 = arith.constant 0 : index
    %78 = vector.load %arg8[%c0_108, %c1_109, %c1_110, %c0_111] : memref<2x9x9x16xf32, #tpu.memory_space<vmem>>, vector<2x8x8x16xf32>
    %79 = vector.shape_cast %78 : vector<2x8x8x16xf32> to vector<128x16xf32>
    %c0_112 = arith.constant 0 : index
    %c128_113 = arith.constant 128 : index
    %80 = vector.load %arg13[%c0_112, %c128_113] : memref<128x144xf32, #tpu.memory_space<vmem>>, vector<128x16xf32>
    tpu.vector_store %arg13[%c0_112, %c128_113], %79 {strides = array<i32>} : memref<128x144xf32, #tpu.memory_space<vmem>>, vector<128x16xf32>,
    %c0_114 = arith.constant 0 : index
    %c0_115 = arith.constant 0 : index
    %81 = vector.load %arg13[%c0_114, %c0_115] : memref<128x144xf32, #tpu.memory_space<vmem>>, vector<128x144xf32>
    %82 = arith.truncf %81 : vector<128x144xf32> to vector<128x144xbf16>
    %c0_116 = arith.constant 0 : index
    %c0_117 = arith.constant 0 : index
    %83 = vector.load %arg3[%c0_116, %c0_117] : memref<144x128xbf16, #tpu.memory_space<vmem>>, vector<144x128xbf16>
    %cst_118 = arith.constant dense<0.000000e+00> : vector<128x128xf32>
    %84 = tpu.matmul %82, %83, %cst_118 {dimension_numbers = #tpu.dot_dimension_numbers<[1], [0], [0], [1], [0, 0, 1, 1], [], []>} : vector<128x144xbf16>, vector<144x128xbf16>, vector<128x128xf32> -> vector<128x128xf32>
    %c0_119 = arith.constant 0 : index
    %c0_120 = arith.constant 0 : index
    %85 = vector.load %arg4[%c0_119, %c0_120] : memref<1x128xf32, #tpu.memory_space<vmem>>, vector<1x128xf32>
    %86 = vector.broadcast %85 : vector<1x128xf32> to vector<128x128xf32>
    %87 = arith.addf %84, %86 : vector<128x128xf32>
    %cst_121 = arith.constant 0.000000e+00 : f32
    %88 = vector.broadcast %cst_121 : f32 to vector<128x128xf32>
    %89 = arith.maximumf %87, %88 : vector<128x128xf32>
    %90 = vector.extract_strided_slice %89 {offsets = [0, 0], sizes = [128, 32], strides = [1, 1]} : vector<128x128xf32> to vector<128x32xf32>
    %91 = vector.shape_cast %90 : vector<128x32xf32> to vector<2x8x8x32xf32>
    %c0_122 = arith.constant 0 : index
    %c1_123 = arith.constant 1 : index
    %c1_124 = arith.constant 1 : index
    %c0_125 = arith.constant 0 : index
    %92 = vector.load %arg12[%c0_122, %c1_123, %c1_124, %c0_125] : memref<2x10x10x32xf32, #tpu.memory_space<vmem>>, vector<2x8x8x32xf32>
    tpu.vector_store %arg12[%c0_122, %c1_123, %c1_124, %c0_125], %91 {strides = array<i32>} : memref<2x10x10x32xf32, #tpu.memory_space<vmem>>, vector<2x8x8x32xf32>,
    %c0_126 = arith.constant 0 : index
    %c0_127 = arith.constant 0 : index
    %c0_128 = arith.constant 0 : index
    %c0_129 = arith.constant 0 : index
    %93 = vector.load %arg12[%c0_126, %c0_127, %c0_128, %c0_129] : memref<2x10x10x32xf32, #tpu.memory_space<vmem>>, vector<2x8x8x32xf32>
    %94 = vector.shape_cast %93 : vector<2x8x8x32xf32> to vector<128x32xf32>
    %c0_130 = arith.constant 0 : index
    %c0_131 = arith.constant 0 : index
    %95 = vector.load %arg14[%c0_130, %c0_131] : memref<128x288xf32, #tpu.memory_space<vmem>>, vector<128x32xf32>
    tpu.vector_store %arg14[%c0_130, %c0_131], %94 {strides = array<i32>} : memref<128x288xf32, #tpu.memory_space<vmem>>, vector<128x32xf32>,
    %c0_132 = arith.constant 0 : index
    %c0_133 = arith.constant 0 : index
    %c1_134 = arith.constant 1 : index
    %c0_135 = arith.constant 0 : index
    %96 = vector.load %arg12[%c0_132, %c0_133, %c1_134, %c0_135] : memref<2x10x10x32xf32, #tpu.memory_space<vmem>>, vector<2x8x8x32xf32>
    %97 = vector.shape_cast %96 : vector<2x8x8x32xf32> to vector<128x32xf32>
    %c0_136 = arith.constant 0 : index
    %c32_137 = arith.constant 32 : index
    %98 = vector.load %arg14[%c0_136, %c32_137] : memref<128x288xf32, #tpu.memory_space<vmem>>, vector<128x32xf32>
    tpu.vector_store %arg14[%c0_136, %c32_137], %97 {strides = array<i32>} : memref<128x288xf32, #tpu.memory_space<vmem>>, vector<128x32xf32>,
    %c0_138 = arith.constant 0 : index
    %c0_139 = arith.constant 0 : index
    %c2 = arith.constant 2 : index
    %c0_140 = arith.constant 0 : index
    %99 = vector.load %arg12[%c0_138, %c0_139, %c2, %c0_140] : memref<2x10x10x32xf32, #tpu.memory_space<vmem>>, vector<2x8x8x32xf32>
    %100 = vector.shape_cast %99 : vector<2x8x8x32xf32> to vector<128x32xf32>
    %c0_141 = arith.constant 0 : index
    %c64_142 = arith.constant 64 : index
    %101 = vector.load %arg14[%c0_141, %c64_142] : memref<128x288xf32, #tpu.memory_space<vmem>>, vector<128x32xf32>
    tpu.vector_store %arg14[%c0_141, %c64_142], %100 {strides = array<i32>} : memref<128x288xf32, #tpu.memory_space<vmem>>, vector<128x32xf32>,
    %c0_143 = arith.constant 0 : index
    %c1_144 = arith.constant 1 : index
    %c0_145 = arith.constant 0 : index
    %c0_146 = arith.constant 0 : index
    %102 = vector.load %arg12[%c0_143, %c1_144, %c0_145, %c0_146] : memref<2x10x10x32xf32, #tpu.memory_space<vmem>>, vector<2x8x8x32xf32>
    %103 = vector.shape_cast %102 : vector<2x8x8x32xf32> to vector<128x32xf32>
    %c0_147 = arith.constant 0 : index
    %c96_148 = arith.constant 96 : index
    %104 = vector.load %arg14[%c0_147, %c96_148] : memref<128x288xf32, #tpu.memory_space<vmem>>, vector<128x32xf32>
    tpu.vector_store %arg14[%c0_147, %c96_148], %103 {strides = array<i32>} : memref<128x288xf32, #tpu.memory_space<vmem>>, vector<128x32xf32>,
    %c0_149 = arith.constant 0 : index
    %c1_150 = arith.constant 1 : index
    %c1_151 = arith.constant 1 : index
    %c0_152 = arith.constant 0 : index
    %105 = vector.load %arg12[%c0_149, %c1_150, %c1_151, %c0_152] : memref<2x10x10x32xf32, #tpu.memory_space<vmem>>, vector<2x8x8x32xf32>
    %106 = vector.shape_cast %105 : vector<2x8x8x32xf32> to vector<128x32xf32>
    %c0_153 = arith.constant 0 : index
    %c128_154 = arith.constant 128 : index
    %107 = vector.load %arg14[%c0_153, %c128_154] : memref<128x288xf32, #tpu.memory_space<vmem>>, vector<128x32xf32>
    tpu.vector_store %arg14[%c0_153, %c128_154], %106 {strides = array<i32>} : memref<128x288xf32, #tpu.memory_space<vmem>>, vector<128x32xf32>,
    %c0_155 = arith.constant 0 : index
    %c1_156 = arith.constant 1 : index
    %c2_157 = arith.constant 2 : index
    %c0_158 = arith.constant 0 : index
    %108 = vector.load %arg12[%c0_155, %c1_156, %c2_157, %c0_158] : memref<2x10x10x32xf32, #tpu.memory_space<vmem>>, vector<2x8x8x32xf32>
    %109 = vector.shape_cast %108 : vector<2x8x8x32xf32> to vector<128x32xf32>
    %c0_159 = arith.constant 0 : index
    %c160 = arith.constant 160 : index
    %110 = vector.load %arg14[%c0_159, %c160] : memref<128x288xf32, #tpu.memory_space<vmem>>, vector<128x32xf32>
    tpu.vector_store %arg14[%c0_159, %c160], %109 {strides = array<i32>} : memref<128x288xf32, #tpu.memory_space<vmem>>, vector<128x32xf32>,
    %c0_160 = arith.constant 0 : index
    %c2_161 = arith.constant 2 : index
    %c0_162 = arith.constant 0 : index
    %c0_163 = arith.constant 0 : index
    %111 = vector.load %arg12[%c0_160, %c2_161, %c0_162, %c0_163] : memref<2x10x10x32xf32, #tpu.memory_space<vmem>>, vector<2x8x8x32xf32>
    %112 = vector.shape_cast %111 : vector<2x8x8x32xf32> to vector<128x32xf32>
    %c0_164 = arith.constant 0 : index
    %c192 = arith.constant 192 : index
    %113 = vector.load %arg14[%c0_164, %c192] : memref<128x288xf32, #tpu.memory_space<vmem>>, vector<128x32xf32>
    tpu.vector_store %arg14[%c0_164, %c192], %112 {strides = array<i32>} : memref<128x288xf32, #tpu.memory_space<vmem>>, vector<128x32xf32>,
    %c0_165 = arith.constant 0 : index
    %c2_166 = arith.constant 2 : index
    %c1_167 = arith.constant 1 : index
    %c0_168 = arith.constant 0 : index
    %114 = vector.load %arg12[%c0_165, %c2_166, %c1_167, %c0_168] : memref<2x10x10x32xf32, #tpu.memory_space<vmem>>, vector<2x8x8x32xf32>
    %115 = vector.shape_cast %114 : vector<2x8x8x32xf32> to vector<128x32xf32>
    %c0_169 = arith.constant 0 : index
    %c224 = arith.constant 224 : index
    %116 = vector.load %arg14[%c0_169, %c224] : memref<128x288xf32, #tpu.memory_space<vmem>>, vector<128x32xf32>
    tpu.vector_store %arg14[%c0_169, %c224], %115 {strides = array<i32>} : memref<128x288xf32, #tpu.memory_space<vmem>>, vector<128x32xf32>,
    %c0_170 = arith.constant 0 : index
    %c2_171 = arith.constant 2 : index
    %c2_172 = arith.constant 2 : index
    %c0_173 = arith.constant 0 : index
    %117 = vector.load %arg12[%c0_170, %c2_171, %c2_172, %c0_173] : memref<2x10x10x32xf32, #tpu.memory_space<vmem>>, vector<2x8x8x32xf32>
    %118 = vector.shape_cast %117 : vector<2x8x8x32xf32> to vector<128x32xf32>
    %c0_174 = arith.constant 0 : index
    %c256_175 = arith.constant 256 : index
    %119 = vector.load %arg14[%c0_174, %c256_175] : memref<128x288xf32, #tpu.memory_space<vmem>>, vector<128x32xf32>
    tpu.vector_store %arg14[%c0_174, %c256_175], %118 {strides = array<i32>} : memref<128x288xf32, #tpu.memory_space<vmem>>, vector<128x32xf32>,
    %c0_176 = arith.constant 0 : index
    %c0_177 = arith.constant 0 : index
    %120 = vector.load %arg14[%c0_176, %c0_177] : memref<128x288xf32, #tpu.memory_space<vmem>>, vector<128x288xf32>
    %121 = arith.truncf %120 : vector<128x288xf32> to vector<128x288xbf16>
    %c0_178 = arith.constant 0 : index
    %c0_179 = arith.constant 0 : index
    %122 = vector.load %arg5[%c0_178, %c0_179] : memref<288x128xbf16, #tpu.memory_space<vmem>>, vector<288x128xbf16>
    %cst_180 = arith.constant dense<0.000000e+00> : vector<128x128xf32>
    %123 = tpu.matmul %121, %122, %cst_180 {dimension_numbers = #tpu.dot_dimension_numbers<[1], [0], [0], [1], [0, 0, 1, 1], [], []>} : vector<128x288xbf16>, vector<288x128xbf16>, vector<128x128xf32> -> vector<128x128xf32>
    %c0_181 = arith.constant 0 : index
    %c0_182 = arith.constant 0 : index
    %124 = vector.load %arg6[%c0_181, %c0_182] : memref<1x128xf32, #tpu.memory_space<vmem>>, vector<1x128xf32>
    %125 = vector.broadcast %124 : vector<1x128xf32> to vector<128x128xf32>
    %126 = arith.addf %123, %125 : vector<128x128xf32>
    %cst_183 = arith.constant 0.000000e+00 : f32
    %127 = vector.broadcast %cst_183 : f32 to vector<128x128xf32>
    %128 = arith.maximumf %126, %127 : vector<128x128xf32>
    %129 = vector.shape_cast %128 : vector<128x128xf32> to vector<2x64x128xf32>
    %cst_184 = arith.constant dense<0.000000e+00> : vector<2x128xf32>
    %130 = vector.multi_reduction <add>, %129, %cst_184 [1] : vector<2x64x128xf32> to vector<2x128xf32>
    %cst_185 = arith.constant 6.400000e+01 : f32
    %131 = vector.broadcast %cst_185 : f32 to vector<2x128xf32>
    %132 = arith.divf %130, %131 : vector<2x128xf32>
    %c0_186 = arith.constant 0 : index
    %c0_187 = arith.constant 0 : index
    %133 = vector.load %arg7[%c0_186, %c0_187] : memref<2x128xf32, #tpu.memory_space<vmem>>, vector<2x128xf32>
    tpu.vector_store %arg7[%c0_186, %c0_187], %132 {strides = array<i32>} : memref<2x128xf32, #tpu.memory_space<vmem>>, vector<2x128xf32>,
    return
  }
}

</mosaic_0001>

<bundles_post_ra>
// kernel: image_model_forward.1
= control target key start
LH: loop header
LB: loop body
LE: loop exit
PB: predicated region body
PF: predicated region fallthrough
CT: control target
= control target key end

     0   :  { %vm174_vm0 = vcmask 261120   ;;  %vm28_vm1 = vcmask 130048   ;;  %vm30_vm2 = vcmask 122880   ;;  %v3790_v4 = vmov 0.0   ;;  %s5506_s0 = inlined_call_operand.vmem [shape: bf16[512,32], index: 0, kind: input, shape index: {}]   ;;  %s5507_s1 = inlined_call_operand.vmem [shape: bf16[32,128], index: 1, kind: input, shape index: {}]   ;;  %s5508_s2 = inlined_call_operand.vmem [shape: f32[1,128], index: 2, kind: input, shape index: {}]   ;;  %s5509_s3 = inlined_call_operand.vmem [shape: bf16[144,128], index: 3, kind: input, shape index: {}]   ;;  %s5510_s4 = inlined_call_operand.vmem [shape: f32[1,128], index: 4, kind: input, shape index: {}]   ;;  %s5511_s5 = inlined_call_operand.vmem [shape: bf16[288,128], index: 5, kind: input, shape index: {}]   ;;  %s5512_s6 = inlined_call_operand.vmem [shape: f32[1,128], index: 6, kind: input, shape index: {}]   ;;  %s5513_s7 = inlined_call_operand.hbm [shape: f32[2,128], index: 7, kind: output, shape index: {}]  }
   0x1   :  { %v3701_v0 = vld [vmem:[%s5507_s1 + $0x8] sm:$0xff]   ;;  %v3851_v2 = vld [vmem:[%s5507_s1] sm:$0xff]   ;;  %36 = vst.msk [vmem:[#allocation2 + $0x30] sm:$0xff] %vm28_vm1, %v3790_v4  ;;  %29 = vst.msk [vmem:[#allocation2] sm:$0xff] %vm28_vm1, %v3790_v4 }
   0x2   :  { %v3846_v1 = vld [vmem:[%s5507_s1 + $0x8] sm:$0xff]   ;;  %3587 = vmatprep.subr.bf16.mxu0 %v3701_v0  ;;  %v3857_v3 = vld [vmem:[%s5507_s1] sm:$0xff]   ;;  %32 = vst.msk [vmem:[#allocation2 + $0x10] sm:$0xff] %vm28_vm1, %v3790_v4  ;;  %34 = vst.msk [vmem:[#allocation2 + $0x20] sm:$0xff] %vm28_vm1, %v3790_v4 }
   0x3   :  { %3687 = vmatprep.subr.bf16.mxu1 %v3846_v1  ;;  %3588 = vmatpush3.bf16.msra.mxu0 %v3701_v0  ;;  %38 = vst.msk [vmem:[#allocation2 + $0x40] sm:$0xff] %vm28_vm1, %v3790_v4  ;;  %40 = vst.msk [vmem:[#allocation2 + $0x50] sm:$0xff] %vm28_vm1, %v3790_v4  ;;  %v3705_v5 = vld [vmem:[%s5506_s0] sm:$0xff]   ;;  %v3706_v6 = vld [vmem:[%s5506_s0 + $0x50] sm:$0xff]  }
   0x4   :  { %42 = vst.msk [vmem:[#allocation2 + $0x60] sm:$0xff] %vm28_vm1, %v3790_v4  ;;  %44 = vst.msk [vmem:[#allocation2 + $0x70] sm:$0xff] %vm28_vm1, %v3790_v4  ;;  %3689 = vmatpush3.bf16.msra.mxu1 %v3846_v1  ;;  %3589 = vmatprep.subr.bf16.mxu0 %v3851_v2  ;;  %v3707_v7 = vld [vmem:[%s5506_s0 + $0x8] sm:$0xff]   ;;  %v3708_v8 = vld [vmem:[%s5506_s0 + $0x58] sm:$0xff]  }
   0x5   :  { %46 = vst.msk [vmem:[#allocation2 + $0x80] sm:$0xff] %vm28_vm1, %v3790_v4  ;;  %48 = vst.msk [vmem:[#allocation2 + $0x90] sm:$0xff] %vm28_vm1, %v3790_v4  ;;  %3688 = vmatprep.subr.bf16.mxu1 %v3857_v3  ;;  %3591 = vmatprep.mubr.msk.bf16.mxu0 %vm174_vm0, %v3705_v5  ;;  %v3709_v9 = vld [vmem:[%s5506_s0 + $0x10] sm:$0xff]   ;;  %v3711_v10 = vld [vmem:[%s5506_s0 + $0x60] sm:$0xff]  }
   0x6   :  { %50 = vst.msk [vmem:[#allocation2 + $0xa0] sm:$0xff] %vm28_vm1, %v3790_v4  ;;  %52 = vst.msk [vmem:[#allocation2 + $0xb0] sm:$0xff] %vm28_vm1, %v3790_v4  ;;  %3615 = vmatprep.mubr.msk.bf16.mxu1 %vm174_vm0, %v3706_v6  ;;  %v3710_v11 = vld [vmem:[%s5506_s0 + $0x18] sm:$0xff]   ;;  %v3712_v12 = vld [vmem:[%s5506_s0 + $0x68] sm:$0xff]  }
   0x7   :  { %54 = vst.msk [vmem:[#allocation2 + $0xc0] sm:$0xff] %vm28_vm1, %v3790_v4  ;;  %56 = vst.msk [vmem:[#allocation2 + $0xd0] sm:$0xff] %vm28_vm1, %v3790_v4  ;;  %3590 = vmatpush3.bf16.msra.mxu0 %v3851_v2  ;;  %v3713_v13 = vld [vmem:[%s5506_s0 + $0x20] sm:$0xff]   ;;  %v3715_v14 = vld [vmem:[%s5506_s0 + $0x70] sm:$0xff]  }
   0x8   :  { %58 = vst.msk [vmem:[#allocation2 + $0xe0] sm:$0xff] %vm28_vm1, %v3790_v4  ;;  %60 = vst.msk [vmem:[#allocation2 + $0xf0] sm:$0xff] %vm28_vm1, %v3790_v4  ;;  %3690 = vmatpush3.bf16.msra.mxu1 %v3857_v3  ;;  %3607 = vmatprep.subr.bf16.mxu0 %v3846_v1  ;;  %v3717_v15 = vld [vmem:[%s5507_s1 + $0x8] sm:$0xff]   ;;  %v3718_v16 = vld [vmem:[%s5507_s1] sm:$0xff]  }
   0x9   :  { %62 = vst.msk [vmem:[#allocation2 + $0x100] sm:$0xff] %vm28_vm1, %v3790_v4  ;;  %64 = vst.msk [vmem:[#allocation2 + $0x110] sm:$0xff] %vm28_vm1, %v3790_v4  ;;  %3647 = vmatprep.subr.bf16.mxu1 %v3717_v15  ;;  %v3714_v17 = vld [vmem:[%s5506_s0 + $0x28] sm:$0xff]   ;;  %v3716_v18 = vld [vmem:[%s5506_s0 + $0x78] sm:$0xff]  }
   0xa   :  { %66 = vst.msk [vmem:[#allocation3] sm:$0xff] %vm28_vm1, %v3790_v4  ;;  %68 = vst.msk [vmem:[#allocation3 + $0x10] sm:$0xff] %vm28_vm1, %v3790_v4  ;;  %3592 = vmatmul.mubr.msk.bf16.vlgmr.msra.gmra.mxu0 %vm174_vm0, %v3707_v7  ;;  %v3721_v19 = vld [vmem:[%s5506_s0 + $0x30] sm:$0xff]   ;;  %v3719_v20 = vld [vmem:[%s5506_s0 + $0xc0] sm:$0xff]  }
   0xb   :  { %70 = vst.msk [vmem:[#allocation3 + $0x20] sm:$0xff] %vm28_vm1, %v3790_v4  ;;  %72 = vst.msk [vmem:[#allocation3 + $0x30] sm:$0xff] %vm28_vm1, %v3790_v4  ;;  %3616 = vmatmul.mubr.msk.bf16.vlgmr.msra.gmra.mxu1 %vm174_vm0, %v3708_v8  ;;  %3595 = vmatprep.mubr.msk.bf16.mxu0 %vm174_vm0, %v3709_v9  ;;  %v3727_v21 = vld [vmem:[%s5507_s1 + $0x8] sm:$0xff]   ;;  %v3722_v23 = vld [vmem:[%s5506_s0 + $0x38] sm:$0xff]  }
   0xc   :  { %74 = vst.msk [vmem:[#allocation3 + $0x40] sm:$0xff] %vm28_vm1, %v3790_v4  ;;  %76 = vst.msk [vmem:[#allocation3 + $0x50] sm:$0xff] %vm28_vm1, %v3790_v4  ;;  %3619 = vmatprep.mubr.msk.bf16.mxu1 %vm174_vm0, %v3711_v10  ;;  %3608 = vmatpush3.bf16.msra.mxu0 %v3846_v1  ;;  %v3720_v22 = vld [vmem:[%s5506_s0 + $0xc8] sm:$0xff]   ;;  %v3723_v24 = vld [vmem:[%s5506_s0 + $0x40] sm:$0xff]  }
   0xd   :  { %78 = vst.msk [vmem:[#allocation3 + $0x60] sm:$0xff] %vm28_vm1, %v3790_v4  ;;  %80 = vst.msk [vmem:[#allocation3 + $0x70] sm:$0xff] %vm28_vm1, %v3790_v4  ;;  %3609 = vmatprep.subr.bf16.mxu0 %v3857_v3  ;;  %3648 = vmatpush3.bf16.msra.mxu1 %v3717_v15  ;;  %v3725_v25 = vld [vmem:[%s5506_s0 + $0xd0] sm:$0xff]   ;;  %v3724_v26 = vld [vmem:[%s5506_s0 + $0x48] sm:$0xff]  }
   0xe   :  { %82 = vst.msk [vmem:[#allocation3 + $0x80] sm:$0xff] %vm28_vm1, %v3790_v4  ;;  %84 = vst.msk [vmem:[#allocation3 + $0x90] sm:$0xff] %vm28_vm1, %v3790_v4  ;;  %3649 = vmatprep.subr.bf16.mxu1 %v3718_v16  ;;  %v3726_v27 = vld [vmem:[%s5506_s0 + $0xd8] sm:$0xff]   ;;  %v3728_v28 = vld [vmem:[%s5507_s1] sm:$0xff]  }
   0xf   :  { %86 = vst.msk [vmem:[#allocation3 + $0xa0] sm:$0xff] %vm28_vm1, %v3790_v4  ;;  %88 = vst.msk [vmem:[#allocation3 + $0xb0] sm:$0xff] %vm28_vm1, %v3790_v4  ;;  %v3729_v29 = vld [vmem:[%s5506_s0 + $0x80] sm:$0xff]   ;;  %v3730_v31 = vld [vmem:[%s5506_s0 + $0x88] sm:$0xff]  }
  0x10   :  { %90 = vst.msk [vmem:[#allocation3 + $0xc0] sm:$0xff] %vm28_vm1, %v3790_v4  ;;  %92 = vst.msk [vmem:[#allocation3 + $0xd0] sm:$0xff] %vm28_vm1, %v3790_v4  ;;  %3610 = vmatpush3.bf16.msra.mxu0 %v3857_v3  ;;  %v3731_v30 = vld [vmem:[%s5506_s0 + $0xe0] sm:$0xff]   ;;  %v3732_v32 = vld [vmem:[%s5506_s0 + $0xe8] sm:$0xff]  }
  0x11   :  { %94 = vst.msk [vmem:[#allocation3 + $0xe0] sm:$0xff] %vm28_vm1, %v3790_v4  ;;  %96 = vst.msk [vmem:[#allocation3 + $0xf0] sm:$0xff] %vm28_vm1, %v3790_v4  ;;  %3650 = vmatpush3.bf16.msra.mxu1 %v3718_v16  ;;  %3627 = vmatprep.subr.bf16.mxu0 %v3727_v21  ;;  %v3733_v33 = vld [vmem:[%s5506_s0 + $0x90] sm:$0xff]   ;;  %v3734_v35 = vld [vmem:[%s5506_s0 + $0x98] sm:$0xff]  }
  0x12   :  { %98 = vst.msk [vmem:[#allocation3 + $0x100] sm:$0xff] %vm28_vm1, %v3790_v4  ;;  %100 = vst.msk [vmem:[#allocation3 + $0x110] sm:$0xff] %vm28_vm1, %v3790_v4  ;;  %3596 = vmatmul.mubr.msk.bf16.gmra.mxu0 %vm174_vm0, %v3710_v11  ;;  %v3735_v34 = vld [vmem:[%s5506_s0 + $0xf0] sm:$0xff]   ;;  %v3736_v36 = vld [vmem:[%s5506_s0 + $0xf8] sm:$0xff]  }
  0x13   :  { %102 = vst.msk [vmem:[#allocation4] sm:$0xff] %vm28_vm1, %v3790_v4  ;;  %104 = vst.msk [vmem:[#allocation4 + $0x10] sm:$0xff] %vm28_vm1, %v3790_v4  ;;  %3620 = vmatmul.mubr.msk.bf16.gmra.mxu1 %vm174_vm0, %v3712_v12  ;;  %3599 = vmatprep.mubr.msk.bf16.mxu0 %vm174_vm0, %v3713_v13  ;;  %v3737_v37 = vld [vmem:[%s5506_s0 + $0xa0] sm:$0xff]  }
  0x14   :  { %106 = vst.msk [vmem:[#allocation4 + $0x20] sm:$0xff] %vm28_vm1, %v3790_v4  ;;  %108 = vst.msk [vmem:[#allocation4 + $0x30] sm:$0xff] %vm28_vm1, %v3790_v4  ;;  %3623 = vmatprep.mubr.msk.bf16.mxu1 %vm174_vm0, %v3715_v14 }
  0x15   :  { %110 = vst.msk [vmem:[#allocation4 + $0x40] sm:$0xff] %vm28_vm1, %v3790_v4  ;;  %112 = vst.msk [vmem:[#allocation4 + $0x50] sm:$0xff] %vm28_vm1, %v3790_v4 }
  0x16   :  { %114 = vst.msk [vmem:[#allocation4 + $0x60] sm:$0xff] %vm28_vm1, %v3790_v4  ;;  %116 = vst.msk [vmem:[#allocation4 + $0x70] sm:$0xff] %vm28_vm1, %v3790_v4 }
  0x17   :  { %120 = vst.msk [vmem:[#allocation4 + $0x90] sm:$0xff] %vm28_vm1, %v3790_v4  ;;  %122 = vst.msk [vmem:[#allocation4 + $0xa0] sm:$0xff] %vm28_vm1, %v3790_v4 }
  0x18   :  { %124 = vst.msk [vmem:[#allocation4 + $0xb0] sm:$0xff] %vm28_vm1, %v3790_v4  ;;  %126 = vst.msk [vmem:[#allocation4 + $0xc0] sm:$0xff] %vm28_vm1, %v3790_v4 }
  0x19   :  { %128 = vst.msk [vmem:[#allocation4 + $0xd0] sm:$0xff] %vm28_vm1, %v3790_v4  ;;  %130 = vst.msk [vmem:[#allocation4 + $0xe0] sm:$0xff] %vm28_vm1, %v3790_v4 }
  0x1a   :  { %132 = vst.msk [vmem:[#allocation4 + $0xf0] sm:$0xff] %vm28_vm1, %v3790_v4  ;;  %134 = vst.msk [vmem:[#allocation4 + $0x100] sm:$0xff] %vm28_vm1, %v3790_v4  ;;  %3600 = vmatmul.mubr.msk.bf16.gmra.mxu0 %vm174_vm0, %v3714_v17 }
  0x1b   :  { %138 = vst.msk [vmem:[#allocation5] sm:$0xff] %vm28_vm1, %v3790_v4  ;;  %140 = vst.msk [vmem:[#allocation5 + $0x10] sm:$0xff] %vm28_vm1, %v3790_v4  ;;  %3624 = vmatmul.mubr.msk.bf16.gmra.mxu1 %vm174_vm0, %v3716_v18  ;;  %3603 = vmatprep.mubr.msk.bf16.mxu0 %vm174_vm0, %v3721_v19 }
  0x1c   :  { %142 = vst.msk [vmem:[#allocation5 + $0x20] sm:$0xff] %vm28_vm1, %v3790_v4  ;;  %144 = vst.msk [vmem:[#allocation5 + $0x30] sm:$0xff] %vm28_vm1, %v3790_v4  ;;  %3651 = vmatprep.mubr.msk.bf16.mxu1 %vm174_vm0, %v3719_v20 }
  0x1d   :  { %146 = vst.msk [vmem:[#allocation5 + $0x40] sm:$0xff] %vm28_vm1, %v3790_v4  ;;  %148 = vst.msk [vmem:[#allocation5 + $0x50] sm:$0xff] %vm28_vm1, %v3790_v4 }
  0x1e   :  { %150 = vst.msk [vmem:[#allocation5 + $0x60] sm:$0xff] %vm28_vm1, %v3790_v4  ;;  %152 = vst.msk [vmem:[#allocation5 + $0x70] sm:$0xff] %vm28_vm1, %v3790_v4 }
  0x1f   :  { %156 = vst.msk [vmem:[#allocation5 + $0x90] sm:$0xff] %vm28_vm1, %v3790_v4  ;;  %158 = vst.msk [vmem:[#allocation5 + $0xa0] sm:$0xff] %vm28_vm1, %v3790_v4 }
  0x20   :  { %160 = vst.msk [vmem:[#allocation5 + $0xb0] sm:$0xff] %vm28_vm1, %v3790_v4  ;;  %162 = vst.msk [vmem:[#allocation5 + $0xc0] sm:$0xff] %vm28_vm1, %v3790_v4 }
  0x21   :  { %164 = vst.msk [vmem:[#allocation5 + $0xd0] sm:$0xff] %vm28_vm1, %v3790_v4  ;;  %166 = vst.msk [vmem:[#allocation5 + $0xe0] sm:$0xff] %vm28_vm1, %v3790_v4 }
  0x22   :  { %168 = vst.msk [vmem:[#allocation5 + $0xf0] sm:$0xff] %vm28_vm1, %v3790_v4  ;;  %170 = vst.msk [vmem:[#allocation5 + $0x100] sm:$0xff] %vm28_vm1, %v3790_v4  ;;  %3604 = vmatmul.mubr.msk.bf16.gmra.mxu0 %vm174_vm0, %v3722_v23 }
  0x23   :  { %175 = vst.msk [vmem:[#allocation6] sm:$0xff] %vm174_vm0, %v3790_v4  ;;  %178 = vst.msk [vmem:[#allocation6 + $0x10] sm:$0xff] %vm174_vm0, %v3790_v4  ;;  %3652 = vmatmul.mubr.msk.bf16.vlgmr.msra.gmra.mxu1 %vm174_vm0, %v3720_v22  ;;  %3611 = vmatprep.mubr.msk.bf16.mxu0 %vm174_vm0, %v3723_v24 }
  0x24   :  { %180 = vst.msk [vmem:[#allocation6 + $0x20] sm:$0xff] %vm174_vm0, %v3790_v4  ;;  %182 = vst.msk [vmem:[#allocation6 + $0x30] sm:$0xff] %vm174_vm0, %v3790_v4  ;;  %3655 = vmatprep.mubr.msk.bf16.mxu1 %vm174_vm0, %v3725_v25 }
  0x25   :  { %184 = vst.msk [vmem:[#allocation6 + $0x40] sm:$0xff] %vm174_vm0, %v3790_v4  ;;  %186 = vst.msk [vmem:[#allocation6 + $0x50] sm:$0xff] %vm174_vm0, %v3790_v4 }
  0x26   :  { %188 = vst.msk [vmem:[#allocation6 + $0x60] sm:$0xff] %vm174_vm0, %v3790_v4  ;;  %190 = vst.msk [vmem:[#allocation6 + $0x70] sm:$0xff] %vm174_vm0, %v3790_v4 }
  0x27   :  { %192 = vst.msk [vmem:[#allocation6 + $0x80] sm:$0xff] %vm174_vm0, %v3790_v4  ;;  %194 = vst.msk [vmem:[#allocation6 + $0x90] sm:$0xff] %vm174_vm0, %v3790_v4 }
  0x28   :  { %196 = vst.msk [vmem:[#allocation6 + $0xa0] sm:$0xff] %vm174_vm0, %v3790_v4  ;;  %198 = vst.msk [vmem:[#allocation6 + $0xb0] sm:$0xff] %vm174_vm0, %v3790_v4 }
  0x29   :  { %200 = vst.msk [vmem:[#allocation6 + $0xc0] sm:$0xff] %vm174_vm0, %v3790_v4  ;;  %202 = vst.msk [vmem:[#allocation6 + $0xd0] sm:$0xff] %vm174_vm0, %v3790_v4 }
  0x2a   :  { %204 = vst.msk [vmem:[#allocation6 + $0xe0] sm:$0xff] %vm174_vm0, %v3790_v4  ;;  %206 = vst.msk [vmem:[#allocation6 + $0xf0] sm:$0xff] %vm174_vm0, %v3790_v4  ;;  %3612 = vmatmul.mubr.msk.bf16.vlgmr.msra.gmra.mxu0 %vm174_vm0, %v3724_v26 }
  0x2b   :  { %208 = vst.msk [vmem:[#allocation6 + $0x100] sm:$0xff] %vm174_vm0, %v3790_v4  ;;  %210 = vst.msk [vmem:[#allocation6 + $0x110] sm:$0xff] %vm174_vm0, %v3790_v4  ;;  %3656 = vmatmul.mubr.msk.bf16.gmra.mxu1 %vm174_vm0, %v3726_v27  ;;  %3628 = vmatpush3.bf16.msra.mxu0 %v3727_v21 }
  0x2c   :  { %212 = vst.msk [vmem:[#allocation6 + $0x120] sm:$0xff] %vm174_vm0, %v3790_v4  ;;  %214 = vst.msk [vmem:[#allocation6 + $0x130] sm:$0xff] %vm174_vm0, %v3790_v4  ;;  %3629 = vmatprep.subr.bf16.mxu0 %v3728_v28  ;;  %3631 = vmatprep.mubr.msk.bf16.mxu0 %vm174_vm0, %v3729_v29 }
  0x2d   :  { %37 = vst.msk [vmem:[#allocation2 + $0x38] sm:$0x1] %vm30_vm2, %v3790_v4  ;;  %31 = vst.msk [vmem:[#allocation2 + $0x8] sm:$0x1] %vm30_vm2, %v3790_v4  ;;  %3659 = vmatprep.mubr.msk.bf16.mxu1 %vm174_vm0, %v3731_v30 }
  0x2e   :  { %33 = vst.msk [vmem:[#allocation2 + $0x18] sm:$0x1] %vm30_vm2, %v3790_v4  ;;  %35 = vst.msk [vmem:[#allocation2 + $0x28] sm:$0x1] %vm30_vm2, %v3790_v4 }
  0x2f   :  { %39 = vst.msk [vmem:[#allocation2 + $0x48] sm:$0x1] %vm30_vm2, %v3790_v4  ;;  %41 = vst.msk [vmem:[#allocation2 + $0x58] sm:$0x1] %vm30_vm2, %v3790_v4  ;;  %3630 = vmatpush3.bf16.msra.mxu0 %v3728_v28 }
  0x30   :  { %43 = vst.msk [vmem:[#allocation2 + $0x68] sm:$0x1] %vm30_vm2, %v3790_v4  ;;  %45 = vst.msk [vmem:[#allocation2 + $0x78] sm:$0x1] %vm30_vm2, %v3790_v4 }
  0x31   :  { %47 = vst.msk [vmem:[#allocation2 + $0x88] sm:$0x1] %vm30_vm2, %v3790_v4  ;;  %49 = vst.msk [vmem:[#allocation2 + $0x98] sm:$0x1] %vm30_vm2, %v3790_v4 }
  0x32   :  { %51 = vst.msk [vmem:[#allocation2 + $0xa8] sm:$0x1] %vm30_vm2, %v3790_v4  ;;  %53 = vst.msk [vmem:[#allocation2 + $0xb8] sm:$0x1] %vm30_vm2, %v3790_v4  ;;  %3632 = vmatmul.mubr.msk.bf16.vlgmr.msra.gmra.mxu0 %vm174_vm0, %v3730_v31 }
  0x33   :  { %55 = vst.msk [vmem:[#allocation2 + $0xc8] sm:$0x1] %vm30_vm2, %v3790_v4  ;;  %57 = vst.msk [vmem:[#allocation2 + $0xd8] sm:$0x1] %vm30_vm2, %v3790_v4  ;;  %3660 = vmatmul.mubr.msk.bf16.gmra.mxu1 %vm174_vm0, %v3732_v32  ;;  %3635 = vmatprep.mubr.msk.bf16.mxu0 %vm174_vm0, %v3733_v33 }
  0x34   :  { %59 = vst.msk [vmem:[#allocation2 + $0xe8] sm:$0x1] %vm30_vm2, %v3790_v4  ;;  %61 = vst.msk [vmem:[#allocation2 + $0xf8] sm:$0x1] %vm30_vm2, %v3790_v4  ;;  %3663 = vmatprep.mubr.msk.bf16.mxu1 %vm174_vm0, %v3735_v34 }
  0x35   :  { %63 = vst.msk [vmem:[#allocation2 + $0x108] sm:$0x1] %vm30_vm2, %v3790_v4  ;;  %65 = vst.msk [vmem:[#allocation2 + $0x118] sm:$0x1] %vm30_vm2, %v3790_v4 }
  0x36   :  { %103 = vst.msk [vmem:[#allocation4 + $0x8] sm:$0x1] %vm30_vm2, %v3790_v4  ;;  %105 = vst.msk [vmem:[#allocation4 + $0x18] sm:$0x1] %vm30_vm2, %v3790_v4 }
  0x37   :  { %107 = vst.msk [vmem:[#allocation4 + $0x28] sm:$0x1] %vm30_vm2, %v3790_v4  ;;  %109 = vst.msk [vmem:[#allocation4 + $0x38] sm:$0x1] %vm30_vm2, %v3790_v4 }
  0x38   :  { %111 = vst.msk [vmem:[#allocation4 + $0x48] sm:$0x1] %vm30_vm2, %v3790_v4  ;;  %113 = vst.msk [vmem:[#allocation4 + $0x58] sm:$0x1] %vm30_vm2, %v3790_v4 }
  0x39   :  { %115 = vst.msk [vmem:[#allocation4 + $0x68] sm:$0x1] %vm30_vm2, %v3790_v4  ;;  %117 = vst.msk [vmem:[#allocation4 + $0x78] sm:$0x1] %vm30_vm2, %v3790_v4 }
  0x3a   :  { %121 = vst.msk [vmem:[#allocation4 + $0x98] sm:$0x1] %vm30_vm2, %v3790_v4  ;;  %123 = vst.msk [vmem:[#allocation4 + $0xa8] sm:$0x1] %vm30_vm2, %v3790_v4  ;;  %3636 = vmatmul.mubr.msk.bf16.gmra.mxu0 %vm174_vm0, %v3734_v35 }
  0x3b   :  { %125 = vst.msk [vmem:[#allocation4 + $0xb8] sm:$0x1] %vm30_vm2, %v3790_v4  ;;  %127 = vst.msk [vmem:[#allocation4 + $0xc8] sm:$0x1] %vm30_vm2, %v3790_v4 }
  0x3c   :  { %129 = vst.msk [vmem:[#allocation4 + $0xd8] sm:$0x1] %vm30_vm2, %v3790_v4  ;;  %131 = vst.msk [vmem:[#allocation4 + $0xe8] sm:$0x1] %vm30_vm2, %v3790_v4 }
  0x3d   :  { %133 = vst.msk [vmem:[#allocation4 + $0xf8] sm:$0x1] %vm30_vm2, %v3790_v4  ;;  %135 = vst.msk [vmem:[#allocation4 + $0x108] sm:$0x1] %vm30_vm2, %v3790_v4 }
  0x3e   :  { %12 = vsyncpa [#allocation10], 0  ;;  %3664 = vmatmul.mubr.msk.bf16.gmra.mxu1 %vm174_vm0, %v3736_v36  ;;  %3639 = vmatprep.mubr.msk.bf16.mxu0 %vm174_vm0, %v3737_v37  ;;  %v3738_v38 = vld [vmem:[%s5506_s0 + $0xa8] sm:$0xff]   ;;  %v3739_v39 = vld [vmem:[%s5506_s0 + $0xb0] sm:$0xff]   ;;  %s3791_s11 = smov 16   ;;  %s3792_s12 = smov 32  }
  0x3f   :  { %v3740_v40 = vld [vmem:[%s5506_s0 + $0xb8] sm:$0xff]   ;;  %v1178_v41 = vld [vmem:[#allocation3] sm:$0xff]  ;;  %v1186_v42 = vld [vmem:[#allocation3 + $0x90] sm:$0xff]  ;;  %vm1258_vm3 = vcmask 261248   ;;  %vm1355_vm4 = vcmask 392448   ;;  %s3794_s14 = smov 112  }
  0x40   :  { %1210 = vrot.lane.b32.xlu0 %v1178_v41, %s3791_s11  ;;  %v1283_v43 = vld [vmem:[#allocation2 + $0x91] sm:$0xff]  ;;  %v1275_v44 = vld [vmem:[#allocation2 + $0x1] sm:$0xff]  ;;  %v4265_v51 = vld [vmem:[%s5508_s2] ss:$0 sm:$0xff]  ;;  %s3793_s2 = smov 96   ;;  %s3795_s15 = smov 64  }
  0x41   :  { %1307 = vrot.lane.b32.xlu1 %v1275_v44, %s3792_s12  ;;  %v1146_v45 = vld [vmem:[#allocation2] sm:$0xff]  ;;  %v1154_v47 = vld [vmem:[#allocation2 + $0x90] sm:$0xff]  ;;  %s3797_s23 = smov 48   ;;  %s3798_s26 = smov 80   ;;  %vm176_vm5 = vcmask 254976   ;;  %vm1452_vm6 = vcmask 523648  }
  0x42   :  { %3640 = vmatmul.mubr.msk.bf16.gmra.mxu0 %vm174_vm0, %v3738_v38  ;;  %1162 = vst.msk [vmem:[#allocation7] sm:$0xff] %vm28_vm1, %v1146_v45  ;;  %1170 = vst.msk [vmem:[#allocation7 + $0x80] sm:$0xff] %vm28_vm1, %v1154_v47  ;;  %vm1549_vm7 = vcmask 654848   ;;  %vm1646_vm8 = vcmask 786048   ;;  %vm1743_vm9 = vcmask 917248   ;;  %vm1840_vm10 = vcmask 1048448  }
  0x43   :  { %3643 = vmatprep.mubr.msk.bf16.mxu0 %vm174_vm0, %v3739_v39  ;;  %177 = vst.msk [vmem:[#allocation6 + $0x8] sm:$0x3] %vm176_vm5, %v3790_v4  ;;  %179 = vst.msk [vmem:[#allocation6 + $0x18] sm:$0x3] %vm176_vm5, %v3790_v4  ;;  %vm2282_vm11 = vcmask 523520   ;;  %vm2379_vm12 = vcmask 785920  }
  0x44   :  { %1226 = vrot.lane.b32.xlu0 %v1186_v42, %s3791_s11  ;;  %181 = vst.msk [vmem:[#allocation6 + $0x28] sm:$0x3] %vm176_vm5, %v3790_v4  ;;  %183 = vst.msk [vmem:[#allocation6 + $0x38] sm:$0x3] %vm176_vm5, %v3790_v4  ;;  %vm2476_vm13 = vcmask 1048320   ;;  %vm3334_vm14 = vcmask 1041409  }
  0x45   :  { %185 = vst.msk [vmem:[#allocation6 + $0x48] sm:$0x3] %vm176_vm5, %v3790_v4  ;;  %187 = vst.msk [vmem:[#allocation6 + $0x58] sm:$0x3] %vm176_vm5, %v3790_v4 }
  0x46   :  { %189 = vst.msk [vmem:[#allocation6 + $0x68] sm:$0x3] %vm176_vm5, %v3790_v4  ;;  %191 = vst.msk [vmem:[#allocation6 + $0x78] sm:$0x3] %vm176_vm5, %v3790_v4 }
  0x47   :  { %193 = vst.msk [vmem:[#allocation6 + $0x88] sm:$0x3] %vm176_vm5, %v3790_v4  ;;  %195 = vst.msk [vmem:[#allocation6 + $0x98] sm:$0x3] %vm176_vm5, %v3790_v4 }
  0x48   :  { %1323 = vrot.lane.b32.xlu0 %v1283_v43, %s3792_s12  ;;  %197 = vst.msk [vmem:[#allocation6 + $0xa8] sm:$0x3] %vm176_vm5, %v3790_v4  ;;  %199 = vst.msk [vmem:[#allocation6 + $0xb8] sm:$0x3] %vm176_vm5, %v3790_v4 }
  0x49   :  { %201 = vst.msk [vmem:[#allocation6 + $0xc8] sm:$0x3] %vm176_vm5, %v3790_v4  ;;  %203 = vst.msk [vmem:[#allocation6 + $0xd8] sm:$0x3] %vm176_vm5, %v3790_v4 }
  0x4a   :  { %3644 = vmatmul.mubr.msk.bf16.gmra.mxu0 %vm174_vm0, %v3740_v40  ;;  %205 = vst.msk [vmem:[#allocation6 + $0xe8] sm:$0x3] %vm176_vm5, %v3790_v4  ;;  %207 = vst.msk [vmem:[#allocation6 + $0xf8] sm:$0x3] %vm176_vm5, %v3790_v4 }
  0x4b   :  { %209 = vst.msk [vmem:[#allocation6 + $0x108] sm:$0x3] %vm176_vm5, %v3790_v4  ;;  %211 = vst.msk [vmem:[#allocation6 + $0x118] sm:$0x3] %vm176_vm5, %v3790_v4 }
  0x4c   :  { %213 = vst.msk [vmem:[#allocation6 + $0x128] sm:$0x3] %vm176_vm5, %v3790_v4  ;;  %215 = vst.msk [vmem:[#allocation6 + $0x138] sm:$0x3] %vm176_vm5, %v3790_v4 }
  0xb2   :  { %v1211_v46 = vpop.permute.xlu0 %1210 }
  0xb3   :  { %1259 = vst.msk [vmem:[#allocation7] sm:$0xff] %vm1258_vm3, %v1211_v46  ;;  %v1308_v50 = vpop.permute.xlu1 %1307 }
  0xb4   :  { %1356 = vst.msk [vmem:[#allocation7] sm:$0xff] %vm1355_vm4, %v1308_v50 }
  0xb6   :  { %v1227_v48 = vpop.permute.xlu0 %1226 }
  0xb7   :  { %1267 = vst.msk [vmem:[#allocation7 + $0x80] sm:$0xff] %vm1258_vm3, %v1227_v48 }
  0xba   :  { %v1324_v49 = vpop.permute.xlu0 %1323 }
  0xbb   :  { %1364 = vst.msk [vmem:[#allocation7 + $0x80] sm:$0xff] %vm1355_vm4, %v1324_v49 }
  0xca   :  { %v3593_v52 = vpop.f32.mrf.mxu0 }
  0xcb   :  { %v362_v53 = vadd.f32 %v3593_v52, %v4265_v51  ;;  %v3617_v54 = vpop.f32.mrf.mxu1 }
  0xcc   :  { %v611_v55 = vadd.f32 %v3617_v54, %v4265_v51  ;;  %v353_v56 = vpop.f32.mrf.mxu0 }
  0xcd   :  { %v418_v57 = vmax.f32 %v362_v53, 0.0  ;;  %v354_v58 = vadd.f32 %v4265_v51, %v353_v56  ;;  %v602_v59 = vpop.f32.mrf.mxu1 }
  0xce   :  { %v655_v60 = vmax.f32 %v611_v55, 0.0  ;;  %v603_v61 = vadd.f32 %v4265_v51, %v602_v59  ;;  %v3594_v62 = vpop.f32.mrf.mxu0 }
  0xcf   :  { %435 = vst.msk [vmem:[#allocation2 + $0x31] sm:$0xff] %vm28_vm1, %v418_v57  ;;  %v416_v63 = vmax.f32 %v354_v58, 0.0  ;;  %v365_v0 = vadd.f32 %v3594_v62, %v4265_v51  ;;  %v3618_v1 = vpop.f32.mrf.mxu1 }
  0xd0   :  { %672 = vst.msk [vmem:[#allocation3 + $0x70] sm:$0xff] %vm28_vm1, %v655_v60  ;;  %v653_v2 = vmax.f32 %v603_v61, 0.0  ;;  %v614_v3 = vadd.f32 %v3618_v1, %v4265_v51  ;;  %v356_v5 = vpop.f32.mrf.mxu0 }
  0xd1   :  { %433 = vst.msk [vmem:[#allocation2 + $0x11] sm:$0xff] %vm28_vm1, %v416_v63  ;;  %v419_v6 = vmax.f32 %v365_v0, 0.0  ;;  %v357_v7 = vadd.f32 %v4265_v51, %v356_v5  ;;  %v605_v8 = vpop.f32.mrf.mxu1 }
  0xd2   :  { %670 = vst.msk [vmem:[#allocation3 + $0x50] sm:$0xff] %vm28_vm1, %v653_v2  ;;  %v656_v9 = vmax.f32 %v614_v3, 0.0  ;;  %v606_v10 = vadd.f32 %v4265_v51, %v605_v8  ;;  %v3597_v11 = vpop.f32.mrf.mxu0 }
  0xd3   :  { %436 = vst.msk [vmem:[#allocation2 + $0x41] sm:$0xff] %vm28_vm1, %v419_v6  ;;  %v417_v12 = vmax.f32 %v357_v7, 0.0  ;;  %v378_v13 = vadd.f32 %v3597_v11, %v4265_v51  ;;  %v3621_v14 = vpop.f32.mrf.mxu1 }
  0xd4   :  { %673 = vst.msk [vmem:[#allocation3 + $0x80] sm:$0xff] %vm28_vm1, %v656_v9  ;;  %v654_v15 = vmax.f32 %v606_v10, 0.0  ;;  %v369_v16 = vpop.f32.mrf.mxu0  ;;  %v627_v17 = vadd.f32 %v3621_v14, %v4265_v51 }
  0xd5   :  { %434 = vst.msk [vmem:[#allocation2 + $0x21] sm:$0xff] %vm28_vm1, %v417_v12  ;;  %v422_v18 = vmax.f32 %v378_v13, 0.0  ;;  %v370_v19 = vadd.f32 %v4265_v51, %v369_v16  ;;  %v618_v20 = vpop.f32.mrf.mxu1 }
  0xd6   :  { %v1859_v21 = vld [vmem:[#allocation2 + $0x31] sm:$0xff]  ;;  %671 = vst.msk [vmem:[#allocation3 + $0x60] sm:$0xff] %vm28_vm1, %v654_v15  ;;  %v3598_v23 = vpop.f32.mrf.mxu0  ;;  %v659_v24 = vmax.f32 %v627_v17, 0.0  ;;  %v619_v25 = vadd.f32 %v4265_v51, %v618_v20 }
  0xd7   :  { %v1665_v22 = vld [vmem:[#allocation2 + $0x30] sm:$0xff]  ;;  %1875 = vst.msk [vmem:[#allocation7 + $0x28] sm:$0xff] %vm28_vm1, %v1859_v21  ;;  %1313 = vrot.lane.b32.xlu1 %v1859_v21, %s3792_s12  ;;  %439 = vst.msk [vmem:[#allocation2 + $0x71] sm:$0xff] %vm28_vm1, %v422_v18  ;;  %v420_v27 = vmax.f32 %v370_v19, 0.0  ;;  %v381_v28 = vadd.f32 %v3598_v23, %v4265_v51  ;;  %v3622_v29 = vpop.f32.mrf.mxu1 }
  0xd8   :  { %v1149_v26 = vld [vmem:[#allocation2 + $0x30] sm:$0xff]  ;;  %1699 = vrot.lane.b32.xlu0 %v1665_v22, %s3793_s2  ;;  %676 = vst.msk [vmem:[#allocation3 + $0xc0] sm:$0xff] %vm28_vm1, %v659_v24  ;;  %v372_v32 = vpop.f32.mrf.mxu0  ;;  %v657_v33 = vmax.f32 %v619_v25, 0.0  ;;  %v630_v34 = vadd.f32 %v3622_v29, %v4265_v51 }
  0xd9   :  { %1165 = vst.msk [vmem:[#allocation7 + $0x30] sm:$0xff] %vm28_vm1, %v1149_v26  ;;  %v1857_v30 = vld [vmem:[#allocation2 + $0x11] sm:$0xff]  ;;  %437 = vst.msk [vmem:[#allocation2 + $0x51] sm:$0xff] %vm28_vm1, %v420_v27  ;;  %v423_v36 = vmax.f32 %v381_v28, 0.0  ;;  %v373_v37 = vadd.f32 %v4265_v51, %v372_v32  ;;  %v621_v38 = vpop.f32.mrf.mxu1 }
  0xda   :  { %v1766_v31 = vld [vmem:[#allocation3 + $0x70] sm:$0xff]  ;;  %1873 = vst.msk [vmem:[#allocation7 + $0x8] sm:$0xff] %vm28_vm1, %v1857_v30  ;;  %v4299_v39 = vld [vmem:[#allocation2 + $0x41] sm:$0xff]  ;;  %674 = vst.msk [vmem:[#allocation3 + $0xa0] sm:$0xff] %vm28_vm1, %v657_v33  ;;  %v660_v40 = vmax.f32 %v630_v34, 0.0  ;;  %v622_v41 = vadd.f32 %v4265_v51, %v621_v38  ;;  %v3601_v42 = vpop.f32.mrf.mxu0 }
  0xdb   :  { %v1147_v35 = vld [vmem:[#allocation2 + $0x10] sm:$0xff]  ;;  %v1150_v43 = vld [vmem:[#allocation2 + $0x40] sm:$0xff]  ;;  %1876 = vst.msk [vmem:[#allocation7 + $0x38] sm:$0xff] %vm28_vm1, %v4299_v39  ;;  %1224 = vrot.lane.b32.xlu1 %v1766_v31, %s3791_s11  ;;  %440 = vst.msk [vmem:[#allocation2 + $0x81] sm:$0xff] %vm28_vm1, %v423_v36  ;;  %v421_v44 = vmax.f32 %v373_v37, 0.0  ;;  %v394_v45 = vadd.f32 %v3601_v42, %v4265_v51  ;;  %v3625_v46 = vpop.f32.mrf.mxu1 }
  0xdc   :  { %1163 = vst.msk [vmem:[#allocation7 + $0x10] sm:$0xff] %vm28_vm1, %v1147_v35  ;;  %1804 = vrot.lane.b32.xlu0 %v1766_v31, %s3794_s14  ;;  %1166 = vst.msk [vmem:[#allocation7 + $0x40] sm:$0xff] %vm28_vm1, %v1150_v43  ;;  %v4310_v47 = vld [vmem:[#allocation2 + $0x21] sm:$0xff]  ;;  %v658_v48 = vmax.f32 %v622_v41, 0.0  ;;  %v385_v49 = vpop.f32.mrf.mxu0  ;;  %v643_v50 = vadd.f32 %v3625_v46, %v4265_v51  ;;  %v1663_v56 = vld [vmem:[#allocation2 + $0x10] sm:$0xff] }
  0xdd   :  { %677 = vst.msk [vmem:[#allocation3 + $0xd0] sm:$0xff] %vm28_vm1, %v660_v40  ;;  %v1148_v52 = vld [vmem:[#allocation2 + $0x20] sm:$0xff]  ;;  %1874 = vst.msk [vmem:[#allocation7 + $0x18] sm:$0xff] %vm28_vm1, %v4310_v47  ;;  %v426_v53 = vmax.f32 %v394_v45, 0.0  ;;  %v386_v54 = vadd.f32 %v4265_v51, %v385_v49  ;;  %v634_v55 = vpop.f32.mrf.mxu1  ;;  %v1764_v10 = vld [vmem:[#allocation3 + $0x50] sm:$0xff] }
  0xde   :  { %438 = vst.msk [vmem:[#allocation2 + $0x61] sm:$0xff] %vm28_vm1, %v421_v44  ;;  %1164 = vst.msk [vmem:[#allocation7 + $0x20] sm:$0xff] %vm28_vm1, %v1148_v52  ;;  %v4319_v57 = vld [vmem:[#allocation2 + $0x71] sm:$0xff]  ;;  %v3602_v59 = vpop.f32.mrf.mxu0  ;;  %v663_v60 = vmax.f32 %v643_v50, 0.0  ;;  %v635_v61 = vadd.f32 %v4265_v51, %v634_v55  ;;  %v1666_v34 = vld [vmem:[#allocation2 + $0x40] sm:$0xff] }
  0xdf   :  { %675 = vst.msk [vmem:[#allocation3 + $0xb0] sm:$0xff] %vm28_vm1, %v658_v48  ;;  %v4322_v58 = vld [vmem:[#allocation2 + $0x70] sm:$0xff]  ;;  %1309 = vrot.lane.b32.xlu1 %v1857_v30, %s3792_s12  ;;  %1879 = vst.msk [vmem:[#allocation7 + $0x68] sm:$0xff] %vm28_vm1, %v4319_v57  ;;  %v424_v62 = vmax.f32 %v386_v54, 0.0  ;;  %v397_v63 = vadd.f32 %v3602_v59, %v4265_v51  ;;  %v3626_v0 = vpop.f32.mrf.mxu1 }
  0xe0   :  { %1695 = vrot.lane.b32.xlu0 %v1663_v56, %s3793_s2  ;;  %443 = vst.msk [vmem:[#allocation2 + $0xc1] sm:$0xff] %vm28_vm1, %v426_v53  ;;  %1169 = vst.msk [vmem:[#allocation7 + $0x70] sm:$0xff] %vm28_vm1, %v4322_v58  ;;  %v4333_v1 = vld [vmem:[#allocation2 + $0x51] sm:$0xff]  ;;  %v388_v3 = vpop.f32.mrf.mxu0  ;;  %v661_v5 = vmax.f32 %v635_v61, 0.0  ;;  %v646_v6 = vadd.f32 %v3626_v0, %v4265_v51  ;;  %v1767_v53 = vld [vmem:[#allocation3 + $0x80] sm:$0xff] }
  0xe1   :  { %v4335_v2 = vld [vmem:[#allocation2 + $0x50] sm:$0xff]  ;;  %680 = vst.msk [vmem:[#allocation3 + $0x100] sm:$0xff] %vm28_vm1, %v663_v60  ;;  %1877 = vst.msk [vmem:[#allocation7 + $0x48] sm:$0xff] %vm28_vm1, %v4333_v1  ;;  %v427_v7 = vmax.f32 %v397_v63, 0.0  ;;  %v389_v8 = vadd.f32 %v4265_v51, %v388_v3  ;;  %v637_v9 = vpop.f32.mrf.mxu1  ;;  %v1890_v15 = vld [vmem:[#allocation7 + $0x8] sm:$0xff] }
  0xe2   :  { %441 = vst.msk [vmem:[#allocation2 + $0xa1] sm:$0xff] %vm28_vm1, %v424_v62  ;;  %1167 = vst.msk [vmem:[#allocation7 + $0x50] sm:$0xff] %vm28_vm1, %v4335_v2  ;;  %v1864_v11 = vld [vmem:[#allocation2 + $0x81] sm:$0xff]  ;;  %v664_v12 = vmax.f32 %v646_v6, 0.0  ;;  %v638_v13 = vadd.f32 %v4265_v51, %v637_v9  ;;  %v3605_v14 = vpop.f32.mrf.mxu0 }
  0xe3   :  { %678 = vst.msk [vmem:[#allocation3 + $0xe0] sm:$0xff] %vm28_vm1, %v661_v5  ;;  %1220 = vrot.lane.b32.xlu1 %v1764_v10, %s3791_s11  ;;  %1880 = vst.msk [vmem:[#allocation7 + $0x78] sm:$0xff] %vm28_vm1, %v1864_v11  ;;  %v425_v16 = vmax.f32 %v389_v8, 0.0  ;;  %v3653_v17 = vpop.f32.mrf.mxu1  ;;  %v410_v18 = vadd.f32 %v3605_v14, %v4265_v51  ;;  %v1184_v5 = vld [vmem:[#allocation3 + $0x60] sm:$0xff] }
  0xe4   :  { %1800 = vrot.lane.b32.xlu0 %v1764_v10, %s3794_s14  ;;  %444 = vst.msk [vmem:[#allocation2 + $0xd1] sm:$0xff] %vm28_vm1, %v427_v7  ;;  %v1892_v19 = vld [vmem:[#allocation7 + $0x18] sm:$0xff]  ;;  %681 = vst.msk [vmem:[#allocation3 + $0x110] sm:$0xff] %vm28_vm1, %v664_v12  ;;  %v662_v21 = vmax.f32 %v638_v13, 0.0  ;;  %v1060_v23 = vadd.f32 %v3653_v17, %v4265_v51  ;;  %v401_v24 = vpop.f32.mrf.mxu0  ;;  %v1664_v11 = vld [vmem:[#allocation2 + $0x20] sm:$0xff] }
  0xe5   :  { %v4352_v20 = vld [vmem:[#allocation2 + $0x61] sm:$0xff]  ;;  %v1922_v25 = vpack.c.bf16 %v1892_v19, %v1890_v15  ;;  %442 = vst.msk [vmem:[#allocation2 + $0xb1] sm:$0xff] %vm28_vm1, %v425_v16  ;;  %v1051_v26 = vpop.f32.mrf.mxu1  ;;  %v430_v27 = vmax.f32 %v410_v18, 0.0  ;;  %v402_v28 = vadd.f32 %v4265_v51, %v401_v24 }
  0xe6   :  { %v4355_v22 = vld [vmem:[#allocation2 + $0x60] sm:$0xff]  ;;  %1878 = vst.msk [vmem:[#allocation7 + $0x58] sm:$0xff] %vm28_vm1, %v4352_v20  ;;  %679 = vst.msk [vmem:[#allocation3 + $0xf0] sm:$0xff] %vm28_vm1, %v662_v21  ;;  %v1116_v31 = vmax.f32 %v1060_v23, 0.0  ;;  %v1052_v32 = vadd.f32 %v4265_v51, %v1051_v26  ;;  %v3606_v33 = vpop.f32.mrf.mxu0 }
  0xe7   :  { %1168 = vst.msk [vmem:[#allocation7 + $0x60] sm:$0xff] %vm28_vm1, %v4355_v22  ;;  %v4364_v29 = vld [vmem:[#allocation2 + $0xc1] sm:$0xff]  ;;  %3438 = vmatprep.mubr.msk.bf16.mxu0 %vm28_vm1, %v1922_v25  ;;  %447 = vst.msk [vmem:[#allocation2 + $0x101] sm:$0xff] %vm28_vm1, %v430_v27  ;;  %v3654_v35 = vpop.f32.mrf.mxu1  ;;  %v428_v36 = vmax.f32 %v402_v28, 0.0  ;;  %v413_v37 = vadd.f32 %v3606_v33, %v4265_v51  ;;  %1701 = vrot.lane.b32.xlu1 %v1666_v34, %s3793_s2 }
  0xe8   :  { %v4367_v30 = vld [vmem:[#allocation2 + $0xc0] sm:$0xff]  ;;  %1315 = vrot.lane.b32.xlu0 %v4299_v39, %s3792_s12  ;;  %1883 = vst.msk [vmem:[#allocation7 + $0xa8] sm:$0xff] %vm28_vm1, %v4364_v29  ;;  %1132 = vst.msk [vmem:[#allocation5 + $0x20] sm:$0xff] %vm28_vm1, %v1116_v31  ;;  %v1114_v39 = vmax.f32 %v1052_v32, 0.0  ;;  %v1063_v41 = vadd.f32 %v3654_v35, %v4265_v51  ;;  %v404_v42 = vpop.f32.mrf.mxu0 }
  0xe9   :  { %1173 = vst.msk [vmem:[#allocation7 + $0xb0] sm:$0xff] %vm28_vm1, %v4367_v30  ;;  %v4380_v38 = vld [vmem:[#allocation2 + $0xa1] sm:$0xff]  ;;  %445 = vst.msk [vmem:[#allocation2 + $0xe1] sm:$0xff] %vm28_vm1, %v428_v36  ;;  %v1054_v43 = vpop.f32.mrf.mxu1  ;;  %v431_v44 = vmax.f32 %v413_v37, 0.0  ;;  %v405_v45 = vadd.f32 %v4265_v51, %v404_v42 }
  0xea   :  { %v4382_v40 = vld [vmem:[#allocation2 + $0xa0] sm:$0xff]  ;;  %1881 = vst.msk [vmem:[#allocation7 + $0x88] sm:$0xff] %vm28_vm1, %v4380_v38  ;;  %1130 = vst.msk [vmem:[#allocation5] sm:$0xff] %vm28_vm1, %v1114_v39  ;;  %v1117_v48 = vmax.f32 %v1063_v41, 0.0  ;;  %v1055_v49 = vadd.f32 %v4265_v51, %v1054_v43  ;;  %v3613_v52 = vpop.f32.mrf.mxu0 }
  0xeb   :  { %1171 = vst.msk [vmem:[#allocation7 + $0x90] sm:$0xff] %vm28_vm1, %v4382_v40  ;;  %v4392_v46 = vld [vmem:[#allocation2 + $0xd1] sm:$0xff]  ;;  %448 = vst.msk [vmem:[#allocation2 + $0x111] sm:$0xff] %vm28_vm1, %v431_v44  ;;  %v429_v54 = vmax.f32 %v405_v45, 0.0  ;;  %v595_v55 = vadd.f32 %v3613_v52, %v4265_v51  ;;  %v3657_v56 = vpop.f32.mrf.mxu1  ;;  %1806 = vrot.lane.b32.xlu1 %v1767_v53, %s3794_s14  ;;  %v1770_v34 = vld [vmem:[#allocation3 + $0xc0] sm:$0xff] }
  0xec   :  { %v4396_v50 = vld [vmem:[#allocation2 + $0xd0] sm:$0xff]  ;;  %1311 = vrot.lane.b32.xlu0 %v4310_v47, %s3792_s12  ;;  %1884 = vst.msk [vmem:[#allocation7 + $0xb8] sm:$0xff] %vm28_vm1, %v4392_v46  ;;  %1133 = vst.msk [vmem:[#allocation5 + $0x30] sm:$0xff] %vm28_vm1, %v1117_v48  ;;  %v1115_v47 = vmax.f32 %v1055_v49, 0.0  ;;  %v586_v61 = vpop.f32.mrf.mxu0  ;;  %v1076_v62 = vadd.f32 %v3657_v56, %v4265_v51 }
  0xed   :  { %1174 = vst.msk [vmem:[#allocation7 + $0xc0] sm:$0xff] %vm28_vm1, %v4396_v50  ;;  %v4407_v59 = vld [vmem:[#allocation2 + $0xb1] sm:$0xff]  ;;  %446 = vst.msk [vmem:[#allocation2 + $0xf1] sm:$0xff] %vm28_vm1, %v429_v54  ;;  %v651_v63 = vmax.f32 %v595_v55, 0.0  ;;  %v587_v0 = vadd.f32 %v4265_v51, %v586_v61  ;;  %v1067_v3 = vpop.f32.mrf.mxu1 }
  0xee   :  { %v4410_v60 = vld [vmem:[#allocation2 + $0xb0] sm:$0xff]  ;;  %1882 = vst.msk [vmem:[#allocation7 + $0x98] sm:$0xff] %vm28_vm1, %v4407_v59  ;;  %v4419_v6 = vld [vmem:[#allocation2 + $0x101] sm:$0xff]  ;;  %1131 = vst.msk [vmem:[#allocation5 + $0x10] sm:$0xff] %vm28_vm1, %v1115_v47  ;;  %v1120_v7 = vmax.f32 %v1076_v62, 0.0  ;;  %v3614_v8 = vpop.f32.mrf.mxu0  ;;  %v1068_v9 = vadd.f32 %v4265_v51, %v1067_v3 }
  0xef   :  { %1172 = vst.msk [vmem:[#allocation7 + $0xa0] sm:$0xff] %vm28_vm1, %v4410_v60  ;;  %v4423_v10 = vld [vmem:[#allocation2 + $0x100] sm:$0xff]  ;;  %1887 = vst.msk [vmem:[#allocation7 + $0xe8] sm:$0xff] %vm28_vm1, %v4419_v6  ;;  %v649_v12 = vmax.f32 %v587_v0, 0.0  ;;  %v598_v13 = vadd.f32 %v3614_v8, %v4265_v51  ;;  %v3658_v14 = vpop.f32.mrf.mxu1  ;;  %1697 = vrot.lane.b32.xlu1 %v1664_v11, %s3793_s2 }
  0xf0   :  { %1222 = vrot.lane.b32.xlu0 %v1184_v5, %s3791_s11  ;;  %668 = vst.msk [vmem:[#allocation3 + $0x30] sm:$0xff] %vm28_vm1, %v651_v63  ;;  %1177 = vst.msk [vmem:[#allocation7 + $0xf0] sm:$0xff] %vm28_vm1, %v4423_v10  ;;  %v4433_v15 = vld [vmem:[#allocation2 + $0xe1] sm:$0xff]  ;;  %v589_v17 = vpop.f32.mrf.mxu0  ;;  %v1118_v18 = vmax.f32 %v1068_v9, 0.0  ;;  %v1079_v19 = vadd.f32 %v3658_v14, %v4265_v51 }
  0xf1   :  { %1136 = vst.msk [vmem:[#allocation5 + $0x60] sm:$0xff] %vm28_vm1, %v1120_v7  ;;  %v4436_v16 = vld [vmem:[#allocation2 + $0xe0] sm:$0xff]  ;;  %1885 = vst.msk [vmem:[#allocation7 + $0xc8] sm:$0xff] %vm28_vm1, %v4433_v15  ;;  %v652_v21 = vmax.f32 %v598_v13, 0.0  ;;  %v590_v23 = vadd.f32 %v4265_v51, %v589_v17  ;;  %v1070_v24 = vpop.f32.mrf.mxu1 }
  0xf2   :  { %666 = vst.msk [vmem:[#allocation3 + $0x10] sm:$0xff] %vm28_vm1, %v649_v12  ;;  %1175 = vst.msk [vmem:[#allocation7 + $0xd0] sm:$0xff] %vm28_vm1, %v4436_v16  ;;  %v1872_v25 = vld [vmem:[#allocation2 + $0x111] sm:$0xff]  ;;  %v1121_v26 = vmax.f32 %v1079_v19, 0.0  ;;  %v1071_v27 = vadd.f32 %v4265_v51, %v1070_v24  ;;  %v3633_v28 = vpop.f32.mrf.mxu0  ;;  %v1768_v14 = vld [vmem:[#allocation3 + $0xa0] sm:$0xff] }
  0xf3   :  { %1134 = vst.msk [vmem:[#allocation5 + $0x40] sm:$0xff] %vm28_vm1, %v1118_v18  ;;  %1888 = vst.msk [vmem:[#allocation7 + $0xf8] sm:$0xff] %vm28_vm1, %v1872_v25  ;;  %v650_v31 = vmax.f32 %v590_v23, 0.0  ;;  %v828_v32 = vadd.f32 %v3633_v28, %v4265_v51  ;;  %v3661_v33 = vpop.f32.mrf.mxu1  ;;  %1802 = vrot.lane.b32.xlu1 %v1184_v5, %s3794_s14 }
  0xf4   :  { %1707 = vrot.lane.b32.xlu0 %v4322_v58, %s3793_s2  ;;  %669 = vst.msk [vmem:[#allocation3 + $0x40] sm:$0xff] %vm28_vm1, %v652_v21  ;;  %v4453_v35 = vld [vmem:[#allocation2 + $0xf1] sm:$0xff]  ;;  %1137 = vst.msk [vmem:[#allocation5 + $0x70] sm:$0xff] %vm28_vm1, %v1121_v26  ;;  %v1119_v36 = vmax.f32 %v1071_v27, 0.0  ;;  %v819_v39 = vpop.f32.mrf.mxu0  ;;  %v1092_v58 = vadd.f32 %v3661_v33, %v4265_v51 }
  0xf5   :  { %v4456_v37 = vld [vmem:[#allocation2 + $0xf0] sm:$0xff]  ;;  %1886 = vst.msk [vmem:[#allocation7 + $0xd8] sm:$0xff] %vm28_vm1, %v4453_v35  ;;  %667 = vst.msk [vmem:[#allocation3 + $0x20] sm:$0xff] %vm28_vm1, %v650_v31  ;;  %v884_v41 = vmax.f32 %v828_v32, 0.0  ;;  %v820_v42 = vadd.f32 %v4265_v51, %v819_v39  ;;  %v1083_v43 = vpop.f32.mrf.mxu1 }
  0xf6   :  { %1176 = vst.msk [vmem:[#allocation7 + $0xe0] sm:$0xff] %vm28_vm1, %v4456_v37  ;;  %1135 = vst.msk [vmem:[#allocation5 + $0x50] sm:$0xff] %vm28_vm1, %v1119_v36  ;;  %v3634_v44 = vpop.f32.mrf.mxu0  ;;  %v1124_v45 = vmax.f32 %v1092_v58, 0.0  ;;  %v1084_v48 = vadd.f32 %v4265_v51, %v1083_v43  ;;  %v1190_v33 = vld [vmem:[#allocation3 + $0xd0] sm:$0xff] }
  0xf7   :  { %900 = vst.msk [vmem:[#allocation4 + $0x21] sm:$0xff] %vm28_vm1, %v884_v41  ;;  %v882_v49 = vmax.f32 %v820_v42, 0.0  ;;  %v831_v52 = vadd.f32 %v3634_v44, %v4265_v51  ;;  %v3662_v53 = vpop.f32.mrf.mxu1  ;;  %1321 = vrot.lane.b32.xlu1 %v4319_v57, %s3792_s12 }
  0xf8   :  { %1812 = vrot.lane.b32.xlu0 %v1770_v34, %s3794_s14  ;;  %v822_v54 = vpop.f32.mrf.mxu0  ;;  %1140 = vst.msk [vmem:[#allocation5 + $0xb0] sm:$0xff] %vm28_vm1, %v1124_v45  ;;  %v1122_v55 = vmax.f32 %v1084_v48, 0.0  ;;  %v1095_v56 = vadd.f32 %v3662_v53, %v4265_v51  ;;  %v1670_v48 = vld [vmem:[#allocation2 + $0x80] sm:$0xff] }
  0xf9   :  { %898 = vst.msk [vmem:[#allocation4 + $0x1] sm:$0xff] %vm28_vm1, %v882_v49  ;;  %v885_v47 = vmax.f32 %v831_v52, 0.0  ;;  %v823_v61 = vadd.f32 %v4265_v51, %v822_v54  ;;  %v1086_v62 = vpop.f32.mrf.mxu1 }
  0xfa   :  { %1138 = vst.msk [vmem:[#allocation5 + $0x90] sm:$0xff] %vm28_vm1, %v1122_v55  ;;  %v1125_v63 = vmax.f32 %v1095_v56, 0.0  ;;  %v1087_v0 = vadd.f32 %v4265_v51, %v1086_v62  ;;  %v3637_v3 = vpop.f32.mrf.mxu0  ;;  %v1188_v56 = vld [vmem:[#allocation3 + $0xb0] sm:$0xff] }
  0xfb   :  { %901 = vst.msk [vmem:[#allocation4 + $0x31] sm:$0xff] %vm28_vm1, %v885_v47  ;;  %v883_v57 = vmax.f32 %v823_v61, 0.0  ;;  %v844_v5 = vadd.f32 %v3637_v3, %v4265_v51  ;;  %1232 = vrot.lane.b32.xlu1 %v1770_v34, %s3791_s11 }
  0xfc   :  { %1703 = vrot.lane.b32.xlu0 %v4335_v2, %s3793_s2  ;;  %1141 = vst.msk [vmem:[#allocation5 + $0xc0] sm:$0xff] %vm28_vm1, %v1125_v63  ;;  %v1123_v8 = vmax.f32 %v1087_v0, 0.0  ;;  %v835_v9 = vpop.f32.mrf.mxu0 }
  0xfd   :  { %899 = vst.msk [vmem:[#allocation4 + $0x11] sm:$0xff] %vm28_vm1, %v883_v57  ;;  %v888_v12 = vmax.f32 %v844_v5, 0.0  ;;  %v836_v13 = vadd.f32 %v4265_v51, %v835_v9  ;;  %v1772_v9 = vld [vmem:[#allocation3 + $0xe0] sm:$0xff] }
  0xfe   :  { %v3665_v7 = vpop.f32.mrf.mxu1  ;;  %1139 = vst.msk [vmem:[#allocation5 + $0xa0] sm:$0xff] %vm28_vm1, %v1123_v8  ;;  %v3638_v17 = vpop.f32.mrf.mxu0 }
  0xff   :  { %v1108_v11 = vadd.f32 %v3665_v7, %v4265_v51  ;;  %904 = vst.msk [vmem:[#allocation4 + $0x61] sm:$0xff] %vm28_vm1, %v888_v12  ;;  %v886_v21 = vmax.f32 %v836_v13, 0.0  ;;  %v847_v23 = vadd.f32 %v3638_v17, %v4265_v51  ;;  %1317 = vrot.lane.b32.xlu1 %v4333_v1, %s3792_s12  ;;  %v3742_v13 = vld [vmem:[%s5509_s3 + $0x30] sm:$0xff]   ;;  %v1180_v17 = vld [vmem:[#allocation3 + $0x20] sm:$0xff] }
 0x100   :  { %v1099_v2 = vpop.f32.mrf.mxu1  ;;  %1808 = vrot.lane.b32.xlu0 %v1768_v14, %s3794_s14  ;;  %v838_v25 = vpop.f32.mrf.mxu0 }
 0x101   :  { %v1128_v18 = vmax.f32 %v1108_v11, 0.0  ;;  %v1100_v19 = vadd.f32 %v4265_v51, %v1099_v2  ;;  %902 = vst.msk [vmem:[#allocation4 + $0x41] sm:$0xff] %vm28_vm1, %v886_v21  ;;  %v889_v28 = vmax.f32 %v847_v23, 0.0  ;;  %v839_v31 = vadd.f32 %v4265_v51, %v838_v25  ;;  %v1374_v21 = vld [vmem:[#allocation4 + $0x20] sm:$0xff] }
 0x102   :  { %v3666_v24 = vpop.f32.mrf.mxu1  ;;  %v3641_v34 = vpop.f32.mrf.mxu0  ;;  %v3744_v25 = vld [vmem:[%s5509_s3 + $0x20] sm:$0xff]  }
 0x103   :  { %1144 = vst.msk [vmem:[#allocation5 + $0xf0] sm:$0xff] %vm28_vm1, %v1128_v18  ;;  %v1126_v26 = vmax.f32 %v1100_v19, 0.0  ;;  %v1111_v27 = vadd.f32 %v3666_v24, %v4265_v51  ;;  %905 = vst.msk [vmem:[#allocation4 + $0x71] sm:$0xff] %vm28_vm1, %v889_v28  ;;  %v887_v1 = vmax.f32 %v839_v31, 0.0  ;;  %v860_v58 = vadd.f32 %v3641_v34, %v4265_v51  ;;  %1228 = vrot.lane.b32.xlu1 %v1768_v14, %s3791_s11  ;;  %v3743_v18 = vld [vmem:[%s5509_s3 + $0x28] sm:$0xff]   ;;  %v1476_v19 = vld [vmem:[#allocation5 + $0x70] sm:$0xff] }
 0x104   :  { %v1102_v32 = vpop.f32.mrf.mxu1  ;;  %1234 = vrot.lane.b32.xlu0 %v1190_v33, %s3791_s11  ;;  %v851_v42 = vpop.f32.mrf.mxu0  ;;  %v3745_v31 = vld [vmem:[%s5509_s3 + $0x18] sm:$0xff]  }
 0x105   :  { %1142 = vst.msk [vmem:[#allocation5 + $0xd0] sm:$0xff] %vm28_vm1, %v1126_v26  ;;  %v1129_v36 = vmax.f32 %v1111_v27, 0.0  ;;  %v1103_v39 = vadd.f32 %v4265_v51, %v1102_v32  ;;  %903 = vst.msk [vmem:[#allocation4 + $0x51] sm:$0xff] %vm28_vm1, %v887_v1  ;;  %v892_v43 = vmax.f32 %v860_v58, 0.0  ;;  %v852_v44 = vadd.f32 %v4265_v51, %v851_v42  ;;  %v1568_v26 = vld [vmem:[#allocation4 + $0x21] sm:$0xff]  ;;  %v1474_v32 = vld [vmem:[#allocation5 + $0x50] sm:$0xff] }
 0x106   :  { %v3642_v45 = vpop.f32.mrf.mxu0  ;;  %v1375_v1 = vld [vmem:[#allocation4 + $0x30] sm:$0xff]  ;;  %v1372_v42 = vld [vmem:[#allocation4] sm:$0xff] }
 0x107   :  { %1145 = vst.msk [vmem:[#allocation5 + $0x100] sm:$0xff] %vm28_vm1, %v1129_v36  ;;  %v1127_v41 = vmax.f32 %v1103_v39, 0.0  ;;  %908 = vst.msk [vmem:[#allocation4 + $0xb1] sm:$0xff] %vm28_vm1, %v892_v43  ;;  %v890_v49 = vmax.f32 %v852_v44, 0.0  ;;  %v863_v52 = vadd.f32 %v3642_v45, %v4265_v51  ;;  %1709 = vrot.lane.b32.xlu1 %v1670_v48, %s3793_s2  ;;  %v3746_v39 = vld [vmem:[%s5509_s3 + $0x10] sm:$0xff]   ;;  %v3747_v43 = vld [vmem:[%s5509_s3 + $0x8] sm:$0xff]  }
 0x108   :  { %1319 = vrot.lane.b32.xlu0 %v4352_v20, %s3792_s12  ;;  %v854_v53 = vpop.f32.mrf.mxu0  ;;  %v1569_v44 = vld [vmem:[#allocation4 + $0x31] sm:$0xff] }
 0x109   :  { %1143 = vst.msk [vmem:[#allocation5 + $0xe0] sm:$0xff] %vm28_vm1, %v1127_v41  ;;  %906 = vst.msk [vmem:[#allocation4 + $0x91] sm:$0xff] %vm28_vm1, %v890_v49  ;;  %v893_v54 = vmax.f32 %v863_v52, 0.0  ;;  %v855_v55 = vadd.f32 %v4265_v51, %v854_v53  ;;  %v1566_v49 = vld [vmem:[#allocation4 + $0x1] sm:$0xff] }
 0x10a   :  { %v3645_v47 = vpop.f32.mrf.mxu0  ;;  %v3748_v52 = vld [vmem:[%s5509_s3] sm:$0xff]  }
 0x10b   :  { %909 = vst.msk [vmem:[#allocation4 + $0xc1] sm:$0xff] %vm28_vm1, %v893_v54  ;;  %v891_v20 = vmax.f32 %v855_v55, 0.0  ;;  %v876_v61 = vadd.f32 %v3645_v47, %v4265_v51  ;;  %1814 = vrot.lane.b32.xlu1 %v1190_v33, %s3794_s14  ;;  %v1479_v33 = vld [vmem:[#allocation5 + $0xb0] sm:$0xff]  ;;  %v1480_v53 = vld [vmem:[#allocation5 + $0xc0] sm:$0xff] }
 0x10c   :  { %1230 = vrot.lane.b32.xlu0 %v1188_v56, %s3791_s11  ;;  %v867_v62 = vpop.f32.mrf.mxu0  ;;  %v3749_v47 = vld [vmem:[%s5509_s3 + $0x40] sm:$0xff]  }
 0x10d   :  { %907 = vst.msk [vmem:[#allocation4 + $0xa1] sm:$0xff] %vm28_vm1, %v891_v20  ;;  %v896_v63 = vmax.f32 %v876_v61, 0.0  ;;  %v868_v0 = vadd.f32 %v4265_v51, %v867_v62  ;;  %v1373_v20 = vld [vmem:[#allocation4 + $0x10] sm:$0xff]  ;;  %v1378_v61 = vld [vmem:[#allocation4 + $0x60] sm:$0xff] }
 0x10e   :  { %v3646_v57 = vpop.f32.mrf.mxu0 }
 0x10f   :  { %912 = vst.msk [vmem:[#allocation4 + $0xf1] sm:$0xff] %vm28_vm1, %v896_v63  ;;  %v894_v3 = vmax.f32 %v868_v0, 0.0  ;;  %1705 = vrot.lane.b32.xlu1 %v4355_v22, %s3793_s2  ;;  %v879_v5 = vadd.f32 %v3646_v57, %v4265_v51  ;;  %v4537_v22 = vld [vmem:[#allocation3 + $0x100] sm:$0xff]  ;;  %v1567_v0 = vld [vmem:[#allocation4 + $0x11] sm:$0xff] }
 0x110   :  { %1715 = vrot.lane.b32.xlu0 %v4367_v30, %s3793_s2  ;;  %v870_v8 = vpop.f32.mrf.mxu0 }
 0x111   :  { %910 = vst.msk [vmem:[#allocation4 + $0xd1] sm:$0xff] %vm28_vm1, %v894_v3  ;;  %v897_v7 = vmax.f32 %v879_v5, 0.0  ;;  %v871_v30 = vadd.f32 %v4265_v51, %v870_v8  ;;  %v1192_v51 = vld [vmem:[#allocation3 + $0xf0] sm:$0xff]  ;;  %v1572_v3 = vld [vmem:[#allocation4 + $0x61] sm:$0xff] }
 0x112   :  { %v1376_v8 = vld [vmem:[#allocation4 + $0x40] sm:$0xff] }
 0x113   :  { %1810 = vrot.lane.b32.xlu1 %v1188_v56, %s3794_s14  ;;  %913 = vst.msk [vmem:[#allocation4 + $0x101] sm:$0xff] %vm28_vm1, %v897_v7  ;;  %v895_v11 = vmax.f32 %v871_v30, 0.0  ;;  %v1477_v56 = vld [vmem:[#allocation5 + $0x90] sm:$0xff]  ;;  %v1478_v7 = vld [vmem:[#allocation5 + $0xa0] sm:$0xff] }
 0x114   :  { %1711 = vrot.lane.b32.xlu0 %v4382_v40, %s3793_s2  ;;  %v1469_v40 = vld [vmem:[#allocation5] sm:$0xff]  ;;  %v1379_v30 = vld [vmem:[#allocation4 + $0x70] sm:$0xff] }
 0x115   :  { %911 = vst.msk [vmem:[#allocation4 + $0xe1] sm:$0xff] %vm28_vm1, %v895_v11 }
 0x117   :  { %1329 = vrot.lane.b32.xlu1 %v4364_v29, %s3792_s12  ;;  %v1471_v29 = vld [vmem:[#allocation5 + $0x20] sm:$0xff] }
 0x118   :  { %1816 = vrot.lane.b32.xlu0 %v1772_v9, %s3794_s14 }
 0x11b   :  { %1240 = vrot.lane.b32.xlu1 %v4537_v22, %s3791_s11 }
 0x11c   :  { %1331 = vrot.lane.b32.xlu0 %v4392_v46, %s3792_s12  ;;  %v1475_v46 = vld [vmem:[#allocation5 + $0x60] sm:$0xff] }
 0x11f   :  { %1325 = vrot.lane.b32.xlu1 %v4380_v38, %s3792_s12  ;;  %v1762_v38 = vld [vmem:[#allocation3 + $0x30] sm:$0xff] }
 0x120   :  { %1327 = vrot.lane.b32.xlu0 %v4407_v59, %s3792_s12  ;;  %v1179_v59 = vld [vmem:[#allocation3 + $0x10] sm:$0xff] }
 0x123   :  { %1236 = vrot.lane.b32.xlu1 %v1772_v9, %s3791_s11 }
 0x124   :  { %1238 = vrot.lane.b32.xlu0 %v1192_v51, %s3791_s11 }
 0x127   :  { %1717 = vrot.lane.b32.xlu1 %v4396_v50, %s3793_s2  ;;  %v1472_v50 = vld [vmem:[#allocation5 + $0x30] sm:$0xff] }
 0x128   :  { %1505 = vrot.lane.b32.xlu0 %v1471_v29, %s3795_s15 }
 0x12b   :  { %1713 = vrot.lane.b32.xlu1 %v4410_v60, %s3793_s2  ;;  %v1470_v60 = vld [vmem:[#allocation5 + $0x10] sm:$0xff] }
 0x12c   :  { %1501 = vrot.lane.b32.xlu0 %v1469_v40, %s3795_s15  ;;  %v1573_v40 = vld [vmem:[#allocation4 + $0x71] sm:$0xff] }
 0x12f   :  { %1818 = vrot.lane.b32.xlu1 %v1192_v51, %s3794_s14  ;;  %v1570_v51 = vld [vmem:[#allocation4 + $0x41] sm:$0xff] }
 0x130   :  { %1719 = vrot.lane.b32.xlu0 %v4436_v16, %s3793_s2  ;;  %v3796_v16 = vmov 0  }
 0x131   :  { %2040 = vmatprep.subr.bf16.mxu0 %v3796_v16 }
 0x133   :  { %1337 = vrot.lane.b32.xlu1 %v4419_v6, %s3792_s12  ;;  %v1473_v6 = vld [vmem:[#allocation5 + $0x40] sm:$0xff] }
 0x134   :  { %1335 = vrot.lane.b32.xlu0 %v4453_v35, %s3792_s12 }
 0x137   :  { %1333 = vrot.lane.b32.xlu1 %v4433_v15, %s3792_s12  ;;  %v3741_v15 = vld [vmem:[%s5509_s3 + $0x38] sm:$0xff]  }
 0x138   :  { %1796 = vrot.lane.b32.xlu0 %v1762_v38, %s3794_s14  ;;  %2041 = vmatpush1.bf16.msra.mxu0 %v3741_v15 }
 0x139   :  { %2042 = vmatprep.subr.bf16.mxu0 %v3796_v16 }
 0x13b   :  { %1507 = vrot.lane.b32.xlu1 %v1472_v50, %s3795_s15 }
 0x13c   :  { %1513 = vrot.lane.b32.xlu0 %v1475_v46, %s3795_s15  ;;  %2043 = vmatpush1.bf16.msra.mxu0 %v3742_v13  ;;  %v1481_v46 = vld [vmem:[#allocation5 + $0xd0] sm:$0xff] }
 0x13d   :  { %2044 = vmatprep.subr.bf16.mxu0 %v3796_v16  ;;  %v1576_v13 = vld [vmem:[#allocation4 + $0xb1] sm:$0xff] }
 0x13f   :  { %1503 = vrot.lane.b32.xlu1 %v1470_v60, %s3795_s15 }
 0x140   :  { %1212 = vrot.lane.b32.xlu0 %v1179_v59, %s3791_s11  ;;  %2045 = vmatpush1.bf16.msra.mxu0 %v3743_v18 }
 0x141   :  { %2046 = vmatprep.subr.bf16.mxu0 %v3796_v16 }
 0x143   :  { %1721 = vrot.lane.b32.xlu1 %v4456_v37, %s3793_s2  ;;  %v1182_v37 = vld [vmem:[#allocation3 + $0x40] sm:$0xff] }
 0x144   :  { %1792 = vrot.lane.b32.xlu0 %v1179_v59, %s3794_s14  ;;  %2047 = vmatpush1.bf16.msra.mxu0 %v3744_v25  ;;  %v1377_v59 = vld [vmem:[#allocation4 + $0x50] sm:$0xff]  ;;  %v1383_v25 = vld [vmem:[#allocation4 + $0xc0] sm:$0xff] }
 0x145   :  { %2048 = vmatprep.subr.bf16.mxu0 %v3796_v16 }
 0x147   :  { %1216 = vrot.lane.b32.xlu1 %v1762_v38, %s3791_s11 }
 0x148   :  { %1509 = vrot.lane.b32.xlu0 %v1473_v6, %s3795_s15  ;;  %2049 = vmatpush1.bf16.msra.mxu0 %v3745_v31  ;;  %v1382_v6 = vld [vmem:[#allocation4 + $0xb0] sm:$0xff] }
 0x149   :  { %v4580_v12 = vpop.permute.xlu1 %1313  ;;  %2050 = vmatprep.subr.bf16.mxu0 %v3796_v16 }
 0x14a   :  { %v4578_v35 = vpop.permute.xlu0 %1699 }
 0x14b   :  { %1798 = vrot.lane.b32.xlu1 %v1182_v37, %s3794_s14 }
 0x14c   :  { %1218 = vrot.lane.b32.xlu0 %v1182_v37, %s3791_s11  ;;  %2051 = vmatpush1.bf16.msra.mxu0 %v3746_v39  ;;  %v1483_v39 = vld [vmem:[#allocation5 + $0xf0] sm:$0xff] }
 0x14d   :  { %v1225_v14 = vpop.permute.xlu1 %1224  ;;  %2052 = vmatprep.subr.bf16.mxu0 %v3796_v16 }
 0x14e   :  { %v4588_v2 = vpop.permute.xlu0 %1804  ;;  %1266 = vst.msk [vmem:[#allocation7 + $0x70] sm:$0xff] %vm1258_vm3, %v1225_v14 }
 0x14f   :  { %1515 = vrot.lane.b32.xlu1 %v1476_v19, %s3795_s15  ;;  %v1380_v19 = vld [vmem:[#allocation4 + $0x90] sm:$0xff] }
 0x150   :  { %1214 = vrot.lane.b32.xlu0 %v1180_v17, %s3791_s11  ;;  %2053 = vmatpush1.bf16.msra.mxu0 %v3747_v43 }
 0x151   :  { %v4599_v24 = vpop.permute.xlu1 %1309  ;;  %2054 = vmatprep.subr.bf16.mxu0 %v3796_v16 }
 0x152   :  { %v4597_v23 = vpop.permute.xlu0 %1695 }
 0x153   :  { %1794 = vrot.lane.b32.xlu1 %v1180_v17, %s3794_s14  ;;  %v1482_v17 = vld [vmem:[#allocation5 + $0xe0] sm:$0xff] }
 0x154   :  { %1408 = vrot.lane.b32.xlu0 %v1374_v21, %s3797_s23  ;;  %2055 = vmatpush1.bf16.msra.mxu0 %v3748_v52 }
 0x155   :  { %v1221_v28 = vpop.permute.xlu1 %1220  ;;  %2070 = vmatprep.subr.bf16.mxu0 %v3796_v16  ;;  %v1571_v16 = vld [vmem:[#allocation4 + $0x51] sm:$0xff] }
 0x156   :  { %v4607_v27 = vpop.permute.xlu0 %1800  ;;  %1264 = vst.msk [vmem:[#allocation7 + $0x50] sm:$0xff] %vm1258_vm3, %v1221_v28  ;;  %v1574_v28 = vld [vmem:[#allocation4 + $0x91] sm:$0xff] }
 0x157   :  { %1511 = vrot.lane.b32.xlu1 %v1474_v32, %s3795_s15  ;;  %v1577_v32 = vld [vmem:[#allocation4 + $0xc1] sm:$0xff] }
 0x158   :  { %1602 = vrot.lane.b32.xlu0 %v1568_v26, %s3798_s26  ;;  %2071 = vmatpush2.bf16.msra.mxu0 %v3749_v47  ;;  %v1484_v47 = vld [vmem:[#allocation5 + $0x100] sm:$0xff] }
 0x159   :  { %v4619_v36 = vpop.permute.xlu1 %1701 }
 0x15a   :  { %v4616_v34 = vpop.permute.xlu0 %1315 }
 0x15b   :  { %1410 = vrot.lane.b32.xlu1 %v1375_v1, %s3797_s23 }
 0x15c   :  { %1521 = vrot.lane.b32.xlu0 %v1479_v33, %s3795_s15 }
 0x15d   :  { %v4629_v41 = vpop.permute.xlu1 %1806 }
 0x15e   :  { %v4626_v58 = vpop.permute.xlu0 %1311 }
 0x15f   :  { %1604 = vrot.lane.b32.xlu1 %v1569_v44, %s3798_s26  ;;  %v1386_v44 = vld [vmem:[#allocation4 + $0xf0] sm:$0xff] }
 0x160   :  { %1404 = vrot.lane.b32.xlu0 %v1372_v42, %s3797_s23  ;;  %v1381_v42 = vld [vmem:[#allocation4 + $0xa0] sm:$0xff] }
 0x161   :  { %v4638_v48 = vpop.permute.xlu1 %1697 }
 0x162   :  { %v1223_v45 = vpop.permute.xlu0 %1222 }
 0x163   :  { %1265 = vst.msk [vmem:[#allocation7 + $0x60] sm:$0xff] %vm1258_vm3, %v1223_v45  ;;  %1523 = vrot.lane.b32.xlu1 %v1480_v53, %s3795_s15  ;;  %v1384_v53 = vld [vmem:[#allocation4 + $0xd0] sm:$0xff] }
 0x164   :  { %1598 = vrot.lane.b32.xlu0 %v1566_v49, %s3798_s26  ;;  %v1575_v49 = vld [vmem:[#allocation4 + $0xa1] sm:$0xff] }
 0x165   :  { %v4648_v55 = vpop.permute.xlu1 %1802 }
 0x166   :  { %v4645_v54 = vpop.permute.xlu0 %1707 }
 0x167   :  { %1406 = vrot.lane.b32.xlu1 %v1373_v20, %s3797_s23 }
 0x168   :  { %1517 = vrot.lane.b32.xlu0 %v1477_v56, %s3795_s15 }
 0x169   :  { %v1322_v63 = vpop.permute.xlu1 %1321 }
 0x16a   :  { %v4655_v62 = vpop.permute.xlu0 %1812  ;;  %1363 = vst.msk [vmem:[#allocation7 + $0x70] sm:$0xff] %vm1355_vm4, %v1322_v63 }
 0x16b   :  { %1600 = vrot.lane.b32.xlu1 %v1567_v0, %s3798_s26  ;;  %v1387_v0 = vld [vmem:[#allocation4 + $0x100] sm:$0xff] }
 0x16c   :  { %1416 = vrot.lane.b32.xlu0 %v1378_v61, %s3797_s23  ;;  %v1578_v61 = vld [vmem:[#allocation4 + $0xd1] sm:$0xff] }
 0x16d   :  { %v1233_v5 = vpop.permute.xlu1 %1232 }
 0x16e   :  { %v4660_v57 = vpop.permute.xlu0 %1703  ;;  %1270 = vst.msk [vmem:[#allocation7 + $0xb0] sm:$0xff] %vm1258_vm3, %v1233_v5  ;;  %v1580_v5 = vld [vmem:[#allocation4 + $0xf1] sm:$0xff] }
 0x16f   :  { %1519 = vrot.lane.b32.xlu1 %v1478_v7, %s3795_s15 }
 0x170   :  { %1610 = vrot.lane.b32.xlu0 %v1572_v3, %s3798_s26 }
 0x171   :  { %v1318_v11 = vpop.permute.xlu1 %1317 }
 0x172   :  { %v4665_v9 = vpop.permute.xlu0 %1808  ;;  %1361 = vst.msk [vmem:[#allocation7 + $0x50] sm:$0xff] %vm1355_vm4, %v1318_v11 }
 0x173   :  { %1418 = vrot.lane.b32.xlu1 %v1379_v30, %s3797_s23 }
 0x174   :  { %1412 = vrot.lane.b32.xlu0 %v1376_v8, %s3797_s23  ;;  %v1385_v8 = vld [vmem:[#allocation4 + $0xe0] sm:$0xff] }
 0x175   :  { %v1229_v38 = vpop.permute.xlu1 %1228 }
 0x176   :  { %v1235_v29 = vpop.permute.xlu0 %1234  ;;  %1268 = vst.msk [vmem:[#allocation7 + $0x90] sm:$0xff] %vm1258_vm3, %v1229_v38  ;;  %v1581_v38 = vld [vmem:[#allocation4 + $0x101] sm:$0xff] }
 0x177   :  { %1271 = vst.msk [vmem:[#allocation7 + $0xc0] sm:$0xff] %vm1258_vm3, %v1235_v29  ;;  %1612 = vrot.lane.b32.xlu1 %v1573_v40, %s3798_s26 }
 0x178   :  { %1606 = vrot.lane.b32.xlu0 %v1570_v51, %s3798_s26  ;;  %v1579_v51 = vld [vmem:[#allocation4 + $0xe1] sm:$0xff] }
 0x179   :  { %v4675_v60 = vpop.permute.xlu1 %1709 }
 0x17a   :  { %v1320_v50 = vpop.permute.xlu0 %1319 }
 0x17b   :  { %1362 = vst.msk [vmem:[#allocation7 + $0x60] sm:$0xff] %vm1355_vm4, %v1320_v50  ;;  %1414 = vrot.lane.b32.xlu1 %v1377_v59, %s3797_s23 }
 0x17c   :  { %1525 = vrot.lane.b32.xlu0 %v1481_v46, %s3795_s15 }
 0x17d   :  { %v4680_v37 = vpop.permute.xlu1 %1814 }
 0x17e   :  { %v1231_v15 = vpop.permute.xlu0 %1230 }
 0x17f   :  { %1269 = vst.msk [vmem:[#allocation7 + $0xa0] sm:$0xff] %vm1258_vm3, %v1231_v15  ;;  %1608 = vrot.lane.b32.xlu1 %v1571_v16, %s3798_s26 }
 0x180   :  { %1424 = vrot.lane.b32.xlu0 %v1382_v6, %s3797_s23 }
 0x181   :  { %v4686_v18 = vpop.permute.xlu1 %1705 }
 0x182   :  { %v4684_v14 = vpop.permute.xlu0 %1715 }
 0x183   :  { %1527 = vrot.lane.b32.xlu1 %v1482_v17, %s3795_s15 }
 0x184   :  { %1618 = vrot.lane.b32.xlu0 %v1576_v13, %s3798_s26  ;;  %v2629_v13 = vld [vmem:[#allocation6 + $0x90] sm:$0xff] }
 0x185   :  { %v4692_v26 = vpop.permute.xlu1 %1810 }
 0x186   :  { %v4690_v21 = vpop.permute.xlu0 %1711 }
 0x187   :  { %1426 = vrot.lane.b32.xlu1 %v1383_v25, %s3797_s23  ;;  %v2202_v25 = vld [vmem:[#allocation6 + $0x1] sm:$0xff] }
 0x188   :  { %1420 = vrot.lane.b32.xlu0 %v1380_v19, %s3797_s23 }
 0x189   :  { %v1330_v33 = vpop.permute.xlu1 %1329 }
 0x18a   :  { %v4696_v31 = vpop.permute.xlu0 %1816  ;;  %1367 = vst.msk [vmem:[#allocation7 + $0xb0] sm:$0xff] %vm1355_vm4, %v1330_v33 }
 0x18b   :  { %1620 = vrot.lane.b32.xlu1 %v1577_v32, %s3798_s26 }
 0x18c   :  { %1614 = vrot.lane.b32.xlu0 %v1574_v28, %s3798_s26 }
 0x18d   :  { %v1241_v43 = vpop.permute.xlu1 %1240 }
 0x18e   :  { %v1332_v1 = vpop.permute.xlu0 %1331  ;;  %1274 = vst.msk [vmem:[#allocation7 + $0xf0] sm:$0xff] %vm1258_vm3, %v1241_v43 }
 0x18f   :  { %1368 = vst.msk [vmem:[#allocation7 + $0xc0] sm:$0xff] %vm1355_vm4, %v1332_v1  ;;  %1422 = vrot.lane.b32.xlu1 %v1381_v42, %s3797_s23 }
 0x190   :  { %1529 = vrot.lane.b32.xlu0 %v1483_v39, %s3795_s15 }
 0x191   :  { %v1326_v52 = vpop.permute.xlu1 %1325 }
 0x192   :  { %v1328_v45 = vpop.permute.xlu0 %1327  ;;  %1365 = vst.msk [vmem:[#allocation7 + $0x90] sm:$0xff] %vm1355_vm4, %v1326_v52 }
 0x193   :  { %1366 = vst.msk [vmem:[#allocation7 + $0xa0] sm:$0xff] %vm1355_vm4, %v1328_v45  ;;  %1616 = vrot.lane.b32.xlu1 %v1575_v49, %s3798_s26 }
 0x194   :  { %1432 = vrot.lane.b32.xlu0 %v1386_v44, %s3797_s23 }
 0x195   :  { %v1237_v20 = vpop.permute.xlu1 %1236 }
 0x196   :  { %v1239_v56 = vpop.permute.xlu0 %1238  ;;  %1272 = vst.msk [vmem:[#allocation7 + $0xd0] sm:$0xff] %vm1258_vm3, %v1237_v20 }
 0x197   :  { %1273 = vst.msk [vmem:[#allocation7 + $0xe0] sm:$0xff] %vm1258_vm3, %v1239_v56  ;;  %1531 = vrot.lane.b32.xlu1 %v1484_v47, %s3795_s15 }
 0x198   :  { %1428 = vrot.lane.b32.xlu0 %v1384_v53, %s3797_s23 }
 0x199   :  { %v4715_v3 = vpop.permute.xlu1 %1717 }
 0x19a   :  { %v4713_v63 = vpop.permute.xlu0 %1505 }
 0x19b   :  { %1434 = vrot.lane.b32.xlu1 %v1387_v0, %s3797_s23 }
 0x19c   :  { %1622 = vrot.lane.b32.xlu0 %v1578_v61, %s3798_s26 }
 0x19d   :  { %v4721_v30 = vpop.permute.xlu1 %1713 }
 0x19e   :  { %v4719_v7 = vpop.permute.xlu0 %1501 }
 0x19f   :  { %1430 = vrot.lane.b32.xlu1 %v1385_v8, %s3797_s23 }
 0x1a0   :  { %1626 = vrot.lane.b32.xlu0 %v1580_v5, %s3798_s26 }
 0x1a1   :  { %v4727_v29 = vpop.permute.xlu1 %1818 }
 0x1a2   :  { %v4725_v11 = vpop.permute.xlu0 %1719 }
 0x1a3   :  { %1624 = vrot.lane.b32.xlu1 %v1579_v51, %s3798_s26  ;;  %v1894_v51 = vld [vmem:[#allocation7 + $0x28] sm:$0xff] }
 0x1a4   :  { %1723 = vrot.lane.b32.xlu0 %v4423_v10, %s3793_s2  ;;  %v1678_v10 = vld [vmem:[#allocation2 + $0x110] sm:$0xff] }
 0x1a5   :  { %v1338_v46 = vpop.permute.xlu1 %1337 }
 0x1a6   :  { %v1336_v40 = vpop.permute.xlu0 %1335  ;;  %1371 = vst.msk [vmem:[#allocation7 + $0xf0] sm:$0xff] %vm1355_vm4, %v1338_v46 }
 0x1a7   :  { %1370 = vst.msk [vmem:[#allocation7 + $0xe0] sm:$0xff] %vm1355_vm4, %v1336_v40  ;;  %1628 = vrot.lane.b32.xlu1 %v1581_v38, %s3798_s26 }
 0x1a8   :  { %1820 = vrot.lane.b32.xlu0 %v4537_v22, %s3794_s14  ;;  %v1775_v22 = vld [vmem:[#allocation3 + $0x110] sm:$0xff] }
 0x1a9   :  { %v1334_v59 = vpop.permute.xlu1 %1333 }
 0x1aa   :  { %v4737_v50 = vpop.permute.xlu0 %1796  ;;  %1369 = vst.msk [vmem:[#allocation7 + $0xd0] sm:$0xff] %vm1355_vm4, %v1334_v59 }
 0x1ab   :  { %1725 = vrot.lane.b32.xlu1 %v1678_v10, %s3793_s2 }
 0x1ac   :  { %2234 = vrot.lane.b32.xlu0 %v2202_v25, %s3792_s12 }
 0x1ad   :  { %v1508_v15 = vpop.permute.xlu1 %1507 }
 0x1ae   :  { %v4741_v6 = vpop.permute.xlu0 %1513 }
 0x1af   :  { %1822 = vrot.lane.b32.xlu1 %v1775_v22, %s3794_s14 }
 0x1b1   :  { %v1504_v17 = vpop.permute.xlu1 %1503 }
 0x1b2   :  { %v1213_v16 = vpop.permute.xlu0 %1212 }
 0x1b3   :  { %1260 = vst.msk [vmem:[#allocation7 + $0x10] sm:$0xff] %vm1258_vm3, %v1213_v16  ;;  %2668 = vrot.lane.b32.xlu1 %v2629_v13, %s3795_s15  ;;  %v1904_v16 = vld [vmem:[#allocation7 + $0x78] sm:$0xff] }
 0x1b4   :  { %1357 = vst.msk [vmem:[#allocation7 + $0x10] sm:$0xff] %vm1355_vm4, %v4599_v24 }
 0x1b5   :  { %v4788_v28 = vpop.permute.xlu1 %1721 }
 0x1b6   :  { %v1793_v19 = vpop.permute.xlu0 %1792 }
 0x1b9   :  { %v1217_v32 = vpop.permute.xlu1 %1216 }
 0x1ba   :  { %v1510_v4 = vpop.permute.xlu0 %1509  ;;  %1262 = vst.msk [vmem:[#allocation7 + $0x30] sm:$0xff] %vm1258_vm3, %v1217_v32 }
 0x1bb   :  { %1359 = vst.msk [vmem:[#allocation7 + $0x30] sm:$0xff] %vm1355_vm4, %v4580_v12 }
 0x1bd   :  { %v1799_v39 = vpop.permute.xlu1 %1798 }
 0x1be   :  { %v1219_v33 = vpop.permute.xlu0 %1218 }
 0x1bf   :  { %1263 = vst.msk [vmem:[#allocation7 + $0x40] sm:$0xff] %vm1258_vm3, %v1219_v33 }
 0x1c0   :  { %1360 = vst.msk [vmem:[#allocation7 + $0x40] sm:$0xff] %vm1355_vm4, %v4616_v34 }
 0x1c1   :  { %v1516_v1 = vpop.permute.xlu1 %1515 }
 0x1c2   :  { %v1215_v24 = vpop.permute.xlu0 %1214 }
 0x1c3   :  { %1261 = vst.msk [vmem:[#allocation7 + $0x20] sm:$0xff] %vm1258_vm3, %v1215_v24 }
 0x1c4   :  { %1358 = vst.msk [vmem:[#allocation7 + $0x20] sm:$0xff] %vm1355_vm4, %v4626_v58 }
 0x1c5   :  { %v1795_v12 = vpop.permute.xlu1 %1794 }
 0x1c6   :  { %v1409_v42 = vpop.permute.xlu0 %1408 }
 0x1c7   :  { %1455 = vst.msk [vmem:[#allocation7 + $0x20] sm:$0xff] %vm1452_vm6, %v1409_v42 }
 0x1c8   :  { %1552 = vst.msk [vmem:[#allocation7 + $0x20] sm:$0xff] %vm1549_vm7, %v4713_v63 }
 0x1c9   :  { %v4804_v43 = vpop.permute.xlu1 %1511 }
 0x1ca   :  { %v1603_v34 = vpop.permute.xlu0 %1602 }
 0x1cb   :  { %1649 = vst.msk [vmem:[#allocation7 + $0x20] sm:$0xff] %vm1646_vm8, %v1603_v34 }
 0x1cc   :  { %1746 = vst.msk [vmem:[#allocation7 + $0x20] sm:$0xff] %vm1743_vm9, %v4578_v35 }
 0x1cd   :  { %1843 = vst.msk [vmem:[#allocation7 + $0x20] sm:$0xff] %vm1840_vm10, %v4737_v50  ;;  %v1411_v44 = vpop.permute.xlu1 %1410  ;;  %v1900_v50 = vld [vmem:[#allocation7 + $0x58] sm:$0xff] }
 0x1ce   :  { %v4810_v58 = vpop.permute.xlu0 %1521  ;;  %1456 = vst.msk [vmem:[#allocation7 + $0x30] sm:$0xff] %vm1452_vm6, %v1411_v44 }
 0x1cf   :  { %1553 = vst.msk [vmem:[#allocation7 + $0x30] sm:$0xff] %vm1549_vm7, %v1508_v15 }
 0x1d1   :  { %v1605_v49 = vpop.permute.xlu1 %1604 }
 0x1d2   :  { %v1405_v45 = vpop.permute.xlu0 %1404  ;;  %1650 = vst.msk [vmem:[#allocation7 + $0x30] sm:$0xff] %vm1646_vm8, %v1605_v49 }
 0x1d3   :  { %1453 = vst.msk [vmem:[#allocation7] sm:$0xff] %vm1452_vm6, %v1405_v45 }
 0x1d4   :  { %1550 = vst.msk [vmem:[#allocation7] sm:$0xff] %vm1549_vm7, %v4719_v7 }
 0x1d5   :  { %1747 = vst.msk [vmem:[#allocation7 + $0x30] sm:$0xff] %vm1743_vm9, %v4619_v36  ;;  %v4822_v52 = vpop.permute.xlu1 %1523 }
 0x1d6   :  { %1844 = vst.msk [vmem:[#allocation7 + $0x30] sm:$0xff] %vm1840_vm10, %v1799_v39  ;;  %v1599_v35 = vpop.permute.xlu0 %1598  ;;  %v1908_v39 = vld [vmem:[#allocation7 + $0x98] sm:$0xff] }
 0x1d7   :  { %1647 = vst.msk [vmem:[#allocation7] sm:$0xff] %vm1646_vm8, %v1599_v35 }
 0x1d8   :  { %1744 = vst.msk [vmem:[#allocation7] sm:$0xff] %vm1743_vm9, %v4597_v23 }
 0x1d9   :  { %1841 = vst.msk [vmem:[#allocation7] sm:$0xff] %vm1840_vm10, %v1793_v19  ;;  %v1407_v56 = vpop.permute.xlu1 %1406 }
 0x1da   :  { %v4827_v53 = vpop.permute.xlu0 %1517  ;;  %1454 = vst.msk [vmem:[#allocation7 + $0x10] sm:$0xff] %vm1452_vm6, %v1407_v56  ;;  %v1914_v56 = vld [vmem:[#allocation7 + $0xc8] sm:$0xff] }
 0x1db   :  { %1551 = vst.msk [vmem:[#allocation7 + $0x10] sm:$0xff] %vm1549_vm7, %v1504_v17 }
 0x1dd   :  { %v1601_v47 = vpop.permute.xlu1 %1600  ;;  %v1895_v46 = vld [vmem:[#allocation7 + $0x30] sm:$0xff] }
 0x1de   :  { %v1417_v36 = vpop.permute.xlu0 %1416  ;;  %1648 = vst.msk [vmem:[#allocation7 + $0x10] sm:$0xff] %vm1646_vm8, %v1601_v47 }
 0x1df   :  { %1459 = vst.msk [vmem:[#allocation7 + $0x60] sm:$0xff] %vm1452_vm6, %v1417_v36  ;;  %v1916_v36 = vld [vmem:[#allocation7 + $0xd8] sm:$0xff] }
 0x1e0   :  { %1556 = vst.msk [vmem:[#allocation7 + $0x60] sm:$0xff] %vm1549_vm7, %v4741_v6  ;;  %v1889_v0 = vld [vmem:[#allocation7] sm:$0xff] }
 0x1e1   :  { %1745 = vst.msk [vmem:[#allocation7 + $0x10] sm:$0xff] %vm1743_vm9, %v4638_v48  ;;  %v4839_v20 = vpop.permute.xlu1 %1519  ;;  %v1896_v48 = vld [vmem:[#allocation7 + $0x38] sm:$0xff] }
 0x1e2   :  { %1842 = vst.msk [vmem:[#allocation7 + $0x10] sm:$0xff] %vm1840_vm10, %v1795_v12  ;;  %v1611_v23 = vpop.permute.xlu0 %1610 }
 0x1e3   :  { %1653 = vst.msk [vmem:[#allocation7 + $0x60] sm:$0xff] %vm1646_vm8, %v1611_v23 }
 0x1e4   :  { %1750 = vst.msk [vmem:[#allocation7 + $0x60] sm:$0xff] %vm1743_vm9, %v4645_v54 }
 0x1e5   :  { %1847 = vst.msk [vmem:[#allocation7 + $0x60] sm:$0xff] %vm1840_vm10, %v4588_v2  ;;  %v1419_v63 = vpop.permute.xlu1 %1418  ;;  %v1924_v2 = vpack.c.bf16 %v1896_v48, %v1894_v51 }
 0x1e6   :  { %v1413_v61 = vpop.permute.xlu0 %1412  ;;  %1460 = vst.msk [vmem:[#allocation7 + $0x70] sm:$0xff] %vm1452_vm6, %v1419_v63  ;;  %v1934_v63 = vpack.c.bf16 %v1916_v36, %v1914_v56  ;;  %v3760_v36 = vld [vmem:[%s5511_s5 + $0x50] sm:$0xff]  }
 0x1e7   :  { %1457 = vst.msk [vmem:[#allocation7 + $0x40] sm:$0xff] %vm1452_vm6, %v1413_v61 }
 0x1e8   :  { %1554 = vst.msk [vmem:[#allocation7 + $0x40] sm:$0xff] %vm1549_vm7, %v1510_v4  ;;  %1557 = vst.msk [vmem:[#allocation7 + $0x70] sm:$0xff] %vm1549_vm7, %v1516_v1 }
 0x1e9   :  { %v1891_v5 = vld [vmem:[#allocation7 + $0x10] sm:$0xff]  ;;  %v1613_v54 = vpop.permute.xlu1 %1612 }
 0x1ea   :  { %v1607_v7 = vpop.permute.xlu0 %1606  ;;  %v1921_v8 = vpack.c.bf16 %v1891_v5, %v1889_v0  ;;  %1654 = vst.msk [vmem:[#allocation7 + $0x70] sm:$0xff] %vm1646_vm8, %v1613_v54  ;;  %v1918_v0 = vld [vmem:[#allocation7 + $0xe8] sm:$0xff] }
 0x1eb   :  { %1651 = vst.msk [vmem:[#allocation7 + $0x40] sm:$0xff] %vm1646_vm8, %v1607_v7 }
 0x1ec   :  { %1748 = vst.msk [vmem:[#allocation7 + $0x40] sm:$0xff] %vm1743_vm9, %v4660_v57  ;;  %2073 = vmatmul.mubr.bf16.vlgmr.msra.gmra.mxu0 %v1921_v8  ;;  %1751 = vst.msk [vmem:[#allocation7 + $0x70] sm:$0xff] %vm1743_vm9, %v4675_v60  ;;  %v1898_v57 = vld [vmem:[#allocation7 + $0x48] sm:$0xff]  ;;  %v1901_v24 = vld [vmem:[#allocation7 + $0x60] sm:$0xff] }
 0x1ed   :  { %1845 = vst.msk [vmem:[#allocation7 + $0x40] sm:$0xff] %vm1840_vm10, %v4607_v27  ;;  %3439 = vmatprep.mubr.msk.bf16.mxu0 %vm28_vm1, %v1924_v2  ;;  %1848 = vst.msk [vmem:[#allocation7 + $0x70] sm:$0xff] %vm1840_vm10, %v4629_v41  ;;  %v1415_v38 = vpop.permute.xlu1 %1414  ;;  %v1893_v27 = vld [vmem:[#allocation7 + $0x20] sm:$0xff]  ;;  %v1926_v6 = vpack.c.bf16 %v1900_v50, %v1898_v57  ;;  %v2637_v50 = vld [vmem:[#allocation6 + $0x130] sm:$0xff] }
 0x1ee   :  { %v4860_v40 = vpop.permute.xlu0 %1525  ;;  %1458 = vst.msk [vmem:[#allocation7 + $0x50] sm:$0xff] %vm1452_vm6, %v1415_v38  ;;  %v1923_v10 = vpack.c.bf16 %v1895_v46, %v1893_v27  ;;  %v2299_v38 = vld [vmem:[#allocation6 + $0x2] sm:$0xff]  ;;  %v2725_v46 = vld [vmem:[#allocation6 + $0x91] sm:$0xff] }
 0x1ef   :  { %1555 = vst.msk [vmem:[#allocation7 + $0x50] sm:$0xff] %vm1549_vm7, %v4804_v43  ;;  %2331 = vrot.lane.b32.xlu0 %v2299_v38, %s3795_s15  ;;  %2764 = vrot.lane.b32.xlu1 %v2725_v46, %s3793_s2  ;;  %v2210_v57 = vld [vmem:[#allocation6 + $0xa1] sm:$0xff] }
 0x1f0   :  { %v2307_v27 = vld [vmem:[#allocation6 + $0xa2] sm:$0xff] }
 0x1f1   :  { %v1609_v60 = vpop.permute.xlu1 %1608  ;;  %v3765_v46 = vld [vmem:[%s5511_s5] sm:$0xff]  }
 0x1f2   :  { %v1425_v59 = vpop.permute.xlu0 %1424  ;;  %1652 = vst.msk [vmem:[#allocation7 + $0x50] sm:$0xff] %vm1646_vm8, %v1609_v60  ;;  %v2829_v60 = vld [vmem:[#allocation6 + $0x132] sm:$0xff] }
 0x1f3   :  { %1463 = vst.msk [vmem:[#allocation7 + $0xa0] sm:$0xff] %vm1452_vm6, %v1425_v59  ;;  %2250 = vrot.lane.b32.xlu0 %v2210_v57, %s3792_s12  ;;  %2684 = vrot.lane.b32.xlu1 %v2637_v50, %s3795_s15  ;;  %v2733_v59 = vld [vmem:[#allocation6 + $0x131] sm:$0xff] }
 0x1f4   :  { %1560 = vst.msk [vmem:[#allocation7 + $0xa0] sm:$0xff] %vm1549_vm7, %v4810_v58  ;;  %2081 = vmatmul.mubr.bf16.gmra.mxu0 %v1923_v10  ;;  %v1897_v13 = vld [vmem:[#allocation7 + $0x40] sm:$0xff]  ;;  %v1903_v33 = vld [vmem:[#allocation7 + $0x70] sm:$0xff]  ;;  %v1912_v58 = vld [vmem:[#allocation7 + $0xb8] sm:$0xff] }
 0x1f5   :  { %1749 = vst.msk [vmem:[#allocation7 + $0x50] sm:$0xff] %vm1743_vm9, %v4686_v18  ;;  %3440 = vmatprep.mubr.msk.bf16.mxu0 %vm28_vm1, %v1926_v6  ;;  %v4875_v15 = vpop.permute.xlu1 %1527  ;;  %v1927_v1 = vpack.c.bf16 %v1903_v33, %v1901_v24  ;;  %v2821_v10 = vld [vmem:[#allocation6 + $0x92] sm:$0xff]  ;;  %v2170_v6 = vld [vmem:[#allocation6] sm:$0xff] }
 0x1f6   :  { %1846 = vst.msk [vmem:[#allocation7 + $0x50] sm:$0xff] %vm1840_vm10, %v4648_v55  ;;  %v1619_v41 = vpop.permute.xlu0 %1618  ;;  %v1902_v55 = vld [vmem:[#allocation7 + $0x68] sm:$0xff] }
 0x1f7   :  { %1657 = vst.msk [vmem:[#allocation7 + $0xa0] sm:$0xff] %vm1646_vm8, %v1619_v41  ;;  %v1928_v25 = vpack.c.bf16 %v1904_v16, %v1902_v55  ;;  %2347 = vrot.lane.b32.xlu0 %v2307_v27, %s3795_s15  ;;  %2780 = vrot.lane.b32.xlu1 %v2733_v59, %s3793_s2  ;;  %v3750_v16 = vld [vmem:[%s5511_s5 + $0x78] sm:$0xff]  }
 0x1f8   :  { %1754 = vst.msk [vmem:[#allocation7 + $0xa0] sm:$0xff] %vm1743_vm9, %v4684_v14  ;;  %3513 = vmatprep.subr.bf16.mxu1 %v3750_v16 }
 0x1f9   :  { %1851 = vst.msk [vmem:[#allocation7 + $0xa0] sm:$0xff] %vm1840_vm10, %v4655_v62  ;;  %v1427_v18 = vpop.permute.xlu1 %1426 }
 0x1fa   :  { %v1421_v22 = vpop.permute.xlu0 %1420  ;;  %1464 = vst.msk [vmem:[#allocation7 + $0xb0] sm:$0xff] %vm1452_vm6, %v1427_v18 }
 0x1fb   :  { %1461 = vst.msk [vmem:[#allocation7 + $0x80] sm:$0xff] %vm1452_vm6, %v1421_v22  ;;  %v2178_v22 = vld [vmem:[#allocation6 + $0xa0] sm:$0xff] }
 0x1fc   :  { %1558 = vst.msk [vmem:[#allocation7 + $0x80] sm:$0xff] %vm1549_vm7, %v4827_v53  ;;  %1561 = vst.msk [vmem:[#allocation7 + $0xb0] sm:$0xff] %vm1549_vm7, %v4822_v52 }
 0x1fd   :  { %v1899_v17 = vld [vmem:[#allocation7 + $0x50] sm:$0xff]  ;;  %v1621_v62 = vpop.permute.xlu1 %1620  ;;  %2837 = vst.msk [vmem:[#allocation8 + $0xb8] sm:$0xff] %vm174_vm0, %v2821_v10  ;;  %2845 = vst.msk [vmem:[#allocation8 + $0x178] sm:$0xff] %vm174_vm0, %v2829_v60 }
 0x1fe   :  { %v1615_v14 = vpop.permute.xlu0 %1614  ;;  %v1925_v19 = vpack.c.bf16 %v1899_v17, %v1897_v13  ;;  %1658 = vst.msk [vmem:[#allocation7 + $0xb0] sm:$0xff] %vm1646_vm8, %v1621_v62  ;;  %v4956_v13 = vld [vmem:[%s5510_s4] ss:$0 sm:$0xff]  ;;  %v3751_v17 = vld [vmem:[%s5511_s5 + $0x38] sm:$0xff]   ;;  %v3752_v62 = vld [vmem:[%s5511_s5 + $0x70] sm:$0xff]  }
 0x1ff   :  { %1655 = vst.msk [vmem:[#allocation7 + $0x80] sm:$0xff] %vm1646_vm8, %v1615_v14  ;;  %3514 = vmatpush3.bf16.msra.mxu1 %v3751_v17 }
 0x200   :  { %1752 = vst.msk [vmem:[#allocation7 + $0x80] sm:$0xff] %vm1743_vm9, %v4690_v21  ;;  %2089 = vmatmul.mubr.bf16.gmra.mxu0 %v1925_v19  ;;  %1755 = vst.msk [vmem:[#allocation7 + $0xb0] sm:$0xff] %vm1743_vm9, %v4715_v3  ;;  %v1906_v21 = vld [vmem:[#allocation7 + $0x88] sm:$0xff]  ;;  %v1909_v47 = vld [vmem:[#allocation7 + $0xa0] sm:$0xff]  ;;  %3515 = vmatprep.subr.bf16.mxu1 %v3752_v62 }
 0x201   :  { %1849 = vst.msk [vmem:[#allocation7 + $0x80] sm:$0xff] %vm1840_vm10, %v4665_v9  ;;  %3441 = vmatprep.mubr.msk.bf16.mxu0 %vm28_vm1, %v1928_v25  ;;  %1852 = vst.msk [vmem:[#allocation7 + $0xb0] sm:$0xff] %vm1840_vm10, %v4680_v37  ;;  %v1423_v32 = vpop.permute.xlu1 %1422  ;;  %v1930_v42 = vpack.c.bf16 %v1908_v39, %v1906_v21  ;;  %v3754_v39 = vld [vmem:[%s5511_s5 + $0x68] sm:$0xff]  }
 0x202   :  { %v1530_v4 = vpop.permute.xlu0 %1529  ;;  %1462 = vst.msk [vmem:[#allocation7 + $0x90] sm:$0xff] %vm1452_vm6, %v1423_v32 }
 0x203   :  { %1559 = vst.msk [vmem:[#allocation7 + $0x90] sm:$0xff] %vm1549_vm7, %v4839_v20 }
 0x204   :  { %2186 = vst.msk [vmem:[#allocation8] sm:$0xff] %vm174_vm0, %v2170_v6  ;;  %2194 = vst.msk [vmem:[#allocation8 + $0xc0] sm:$0xff] %vm174_vm0, %v2178_v22 }
 0x205   :  { %v1617_v3 = vpop.permute.xlu1 %1616 }
 0x206   :  { %v1433_v9 = vpop.permute.xlu0 %1432  ;;  %1656 = vst.msk [vmem:[#allocation7 + $0x90] sm:$0xff] %vm1646_vm8, %v1617_v3 }
 0x207   :  { %1467 = vst.msk [vmem:[#allocation7 + $0xe0] sm:$0xff] %vm1452_vm6, %v1433_v9  ;;  %v3755_v9 = vld [vmem:[%s5511_s5 + $0x28] sm:$0xff]  }
 0x208   :  { %1564 = vst.msk [vmem:[#allocation7 + $0xe0] sm:$0xff] %vm1549_vm7, %v1530_v4  ;;  %2097 = vmatmul.mubr.bf16.gmra.mxu0 %v1927_v1  ;;  %v1911_v53 = vld [vmem:[#allocation7 + $0xb0] sm:$0xff] }
 0x209   :  { %1753 = vst.msk [vmem:[#allocation7 + $0x90] sm:$0xff] %vm1743_vm9, %v4721_v30  ;;  %3442 = vmatprep.mubr.msk.bf16.mxu0 %vm28_vm1, %v1930_v42  ;;  %v1532_v12 = vpop.permute.xlu1 %1531  ;;  %v1910_v30 = vld [vmem:[#allocation7 + $0xa8] sm:$0xff]  ;;  %v1931_v20 = vpack.c.bf16 %v1911_v53, %v1909_v47  ;;  %v3753_v4 = vld [vmem:[%s5511_s5 + $0x30] sm:$0xff]  }
 0x20a   :  { %1850 = vst.msk [vmem:[#allocation7 + $0x90] sm:$0xff] %vm1840_vm10, %v4692_v26  ;;  %v1429_v37 = vpop.permute.xlu0 %1428  ;;  %v1905_v26 = vld [vmem:[#allocation7 + $0x80] sm:$0xff]  ;;  %v1932_v52 = vpack.c.bf16 %v1912_v58, %v1910_v30  ;;  %3516 = vmatpush3.bf16.msra.mxu1 %v3753_v4  ;;  %v3761_v47 = vld [vmem:[%s5511_s5 + $0x10] sm:$0xff]  }
 0x20b   :  { %1465 = vst.msk [vmem:[#allocation7 + $0xc0] sm:$0xff] %vm1452_vm6, %v1429_v37  ;;  %3517 = vmatprep.subr.bf16.mxu1 %v3754_v39  ;;  %v3756_v37 = vld [vmem:[%s5511_s5 + $0x60] sm:$0xff]  }
 0x20c   :  { %1562 = vst.msk [vmem:[#allocation7 + $0xc0] sm:$0xff] %vm1549_vm7, %v4860_v40 }
 0x20d   :  { %v1435_v43 = vpop.permute.xlu1 %1434 }
 0x20e   :  { %v1623_v34 = vpop.permute.xlu0 %1622  ;;  %1468 = vst.msk [vmem:[#allocation7 + $0xf0] sm:$0xff] %vm1452_vm6, %v1435_v43  ;;  %3518 = vmatpush3.bf16.msra.mxu1 %v3755_v9 }
 0x20f   :  { %1659 = vst.msk [vmem:[#allocation7 + $0xc0] sm:$0xff] %vm1646_vm8, %v1623_v34  ;;  %v3757_v34 = vld [vmem:[%s5511_s5 + $0x20] sm:$0xff]   ;;  %3519 = vmatprep.subr.bf16.mxu1 %v3756_v37 }
 0x210   :  { %1756 = vst.msk [vmem:[#allocation7 + $0xc0] sm:$0xff] %vm1743_vm9, %v4725_v11 }
 0x211   :  { %1853 = vst.msk [vmem:[#allocation7 + $0xc0] sm:$0xff] %vm1840_vm10, %v4696_v31  ;;  %v1907_v44 = vld [vmem:[#allocation7 + $0x90] sm:$0xff]  ;;  %v1431_v35 = vpop.permute.xlu1 %1430 }
 0x212   :  { %1565 = vst.msk [vmem:[#allocation7 + $0xf0] sm:$0xff] %vm1549_vm7, %v1532_v12  ;;  %v1627_v45 = vpop.permute.xlu0 %1626  ;;  %v1929_v49 = vpack.c.bf16 %v1907_v44, %v1905_v26  ;;  %3520 = vmatpush3.bf16.msra.mxu1 %v3757_v34 }
 0x213   :  { %1661 = vst.msk [vmem:[#allocation7 + $0xe0] sm:$0xff] %vm1646_vm8, %v1627_v45 }
 0x214   :  { %1466 = vst.msk [vmem:[#allocation7 + $0xd0] sm:$0xff] %vm1452_vm6, %v1431_v35  ;;  %2105 = vmatmul.mubr.bf16.gmra.mxu0 %v1929_v49  ;;  %v3758_v49 = vld [vmem:[%s5511_s5 + $0x58] sm:$0xff]  }
 0x215   :  { %1563 = vst.msk [vmem:[#allocation7 + $0xd0] sm:$0xff] %vm1549_vm7, %v4875_v15  ;;  %3443 = vmatprep.mubr.msk.bf16.mxu0 %vm28_vm1, %v1932_v52  ;;  %v1625_v31 = vpop.permute.xlu1 %1624  ;;  %v3759_v52 = vld [vmem:[%s5511_s5 + $0x18] sm:$0xff]   ;;  %3521 = vmatprep.subr.bf16.mxu1 %v3758_v49 }
 0x216   :  { %v1724_v11 = vpop.permute.xlu0 %1723  ;;  %1660 = vst.msk [vmem:[#allocation7 + $0xd0] sm:$0xff] %vm1646_vm8, %v1625_v31  ;;  %3522 = vmatpush3.bf16.msra.mxu1 %v3759_v52 }
 0x217   :  { %1758 = vst.msk [vmem:[#allocation7 + $0xe0] sm:$0xff] %vm1743_vm9, %v1724_v11  ;;  %1757 = vst.msk [vmem:[#allocation7 + $0xd0] sm:$0xff] %vm1743_vm9, %v4788_v28  ;;  %v1920_v28 = vld [vmem:[#allocation7 + $0xf8] sm:$0xff]  ;;  %3523 = vmatprep.subr.bf16.mxu1 %v3760_v36 }
 0x218   :  { %1854 = vst.msk [vmem:[#allocation7 + $0xd0] sm:$0xff] %vm1840_vm10, %v4727_v29  ;;  %v1913_v5 = vld [vmem:[#allocation7 + $0xc0] sm:$0xff]  ;;  %v1936_v51 = vpack.c.bf16 %v1920_v28, %v1918_v0  ;;  %v3762_v0 = vld [vmem:[%s5511_s5 + $0x48] sm:$0xff]  }
 0x219   :  { %v1629_v61 = vpop.permute.xlu1 %1628 }
 0x21a   :  { %v1821_v23 = vpop.permute.xlu0 %1820  ;;  %1662 = vst.msk [vmem:[#allocation7 + $0xf0] sm:$0xff] %vm1646_vm8, %v1629_v61  ;;  %3524 = vmatpush3.bf16.msra.mxu1 %v3761_v47 }
 0x21b   :  { %1855 = vst.msk [vmem:[#allocation7 + $0xe0] sm:$0xff] %vm1840_vm10, %v1821_v23  ;;  %3525 = vmatprep.subr.bf16.mxu1 %v3762_v0 }
 0x21c   :  { %2113 = vmatmul.mubr.bf16.gmra.mxu0 %v1931_v20 }
 0x21d   :  { %3444 = vmatprep.mubr.msk.bf16.mxu0 %vm28_vm1, %v1934_v63  ;;  %v1726_v48 = vpop.permute.xlu1 %1725 }
 0x21e   :  { %1759 = vst.msk [vmem:[#allocation7 + $0xf0] sm:$0xff] %vm1743_vm9, %v1726_v48  ;;  %v2235_v41 = vpop.permute.xlu0 %2234 }
 0x21f   :  { %v1915_v7 = vld [vmem:[#allocation7 + $0xd0] sm:$0xff]  ;;  %2283 = vst.msk [vmem:[#allocation8] sm:$0xff] %vm2282_vm11, %v2235_v41 }
 0x220   :  { %v1933_v8 = vpack.c.bf16 %v1915_v7, %v1913_v5  ;;  %v3763_v5 = vld [vmem:[%s5511_s5 + $0x8] sm:$0xff]  }
 0x221   :  { %v1823_v29 = vpop.permute.xlu1 %1822  ;;  %3526 = vmatpush3.bf16.msra.mxu1 %v3763_v5 }
 0x222   :  { %1856 = vst.msk [vmem:[#allocation7 + $0xf0] sm:$0xff] %vm1840_vm10, %v1823_v29  ;;  %v1917_v54 = vld [vmem:[#allocation7 + $0xe0] sm:$0xff] }
 0x224   :  { %2121 = vmatmul.mubr.bf16.gmra.mxu0 %v1933_v8 }
 0x225   :  { %3445 = vmatprep.mubr.msk.bf16.mxu0 %vm28_vm1, %v1936_v51 }
 0x229   :  { %v1919_v2 = vld [vmem:[#allocation7 + $0xf0] sm:$0xff] }
 0x22a   :  { %v1935_v40 = vpack.c.bf16 %v1919_v2, %v1917_v54 }
 0x22c   :  { %2129 = vmatmul.mubr.bf16.gmra.mxu0 %v1935_v40  ;;  %v3764_v40 = vld [vmem:[%s5511_s5 + $0x40] sm:$0xff]  }
 0x22d   :  { %3527 = vmatprep.subr.bf16.mxu1 %v3764_v40 }
 0x22e   :  { %3528 = vmatpush3.bf16.msra.mxu1 %v3765_v46 }
 0x261   :  { %v2332_v15 = vpop.permute.xlu0 %2331 }
 0x262   :  { %2380 = vst.msk [vmem:[#allocation8] sm:$0xff] %vm2379_vm12, %v2332_v15 }
 0x265   :  { %v2251_v18 = vpop.permute.xlu0 %2250 }
 0x266   :  { %2291 = vst.msk [vmem:[#allocation8 + $0xc0] sm:$0xff] %vm2282_vm11, %v2251_v18 }
 0x269   :  { %v2348_v55 = vpop.permute.xlu0 %2347 }
 0x26a   :  { %2388 = vst.msk [vmem:[#allocation8 + $0xc0] sm:$0xff] %vm2379_vm12, %v2348_v55 }
 0x2ac   :  { %v2074_v14 = vpop.f32.mrf.mxu0 }
 0x2ad   :  { %v2075_v19 = vadd.f32 %v4956_v13, %v2074_v14 }
 0x2ae   :  { %v2076_v25 = vpop.f32.mrf.mxu0 }
 0x2af   :  { %v2137_v32 = vmax.f32 %v2075_v19, 0.0 }
 0x2b0   :  { %v2077_v33 = vpop.f32.mrf.mxu0 }
 0x2b1   :  { %2154 = vst.msk [vmem:[#allocation6 + $0x11] sm:$0xff] %vm174_vm0, %v2137_v32  ;;  %v2078_v21 = vadd.f32 %v4956_v13, %v2077_v33 }
 0x2b2   :  { %v2079_v24 = vpop.f32.mrf.mxu0 }
 0x2b3   :  { %v2138_v1 = vmax.f32 %v2078_v21, 0.0 }
 0x2b4   :  { %v2082_v3 = vpop.f32.mrf.mxu0 }
 0x2b5   :  { %2155 = vst.msk [vmem:[#allocation6 + $0x21] sm:$0xff] %vm174_vm0, %v2138_v1  ;;  %v2083_v42 = vadd.f32 %v4956_v13, %v2082_v3 }
 0x2b6   :  { %v2084_v12 = vpop.f32.mrf.mxu0 }
 0x2b7   :  { %v2139_v43 = vmax.f32 %v2083_v42, 0.0 }
 0x2b8   :  { %v2085_v30 = vpop.f32.mrf.mxu0  ;;  %v2525_v58 = vld [vmem:[#allocation6 + $0x12] sm:$0xff] }
 0x2b9   :  { %v2203_v26 = vld [vmem:[#allocation6 + $0x11] sm:$0xff]  ;;  %2156 = vst.msk [vmem:[#allocation6 + $0x31] sm:$0xff] %vm174_vm0, %v2139_v43  ;;  %v2086_v45 = vadd.f32 %v4956_v13, %v2085_v30  ;;  %2557 = vrot.lane.b32.xlu0 %v2525_v58, %s3792_s12 }
 0x2ba   :  { %v2396_v44 = vld [vmem:[#allocation6 + $0x10] sm:$0xff]  ;;  %2236 = vrot.lane.b32.xlu1 %v2203_v26, %s3792_s12  ;;  %2509 = vst.msk [vmem:[#allocation8 + $0x8] sm:$0xff] %vm174_vm0, %v2203_v26  ;;  %v2087_v35 = vpop.f32.mrf.mxu0 }
 0x2bb   :  { %2187 = vst.msk [vmem:[#allocation8 + $0x18] sm:$0xff] %vm174_vm0, %v2396_v44  ;;  %v2140_v11 = vmax.f32 %v2086_v45, 0.0 }
 0x2bc   :  { %v2814_v31 = vld [vmem:[#allocation6 + $0x22] sm:$0xff] }
 0x2bd   :  { %v2622_v53 = vld [vmem:[#allocation6 + $0x20] sm:$0xff]  ;;  %2830 = vst.msk [vmem:[#allocation8 + $0x10] sm:$0xff] %vm174_vm0, %v2814_v31  ;;  %2157 = vst.msk [vmem:[#allocation6 + $0x41] sm:$0xff] %vm174_vm0, %v2140_v11  ;;  %2428 = vrot.lane.b32.xlu0 %v2396_v44, %s3793_s2 }
 0x2be   :  { %v2718_v56 = vld [vmem:[#allocation6 + $0x21] sm:$0xff]  ;;  %2333 = vrot.lane.b32.xlu1 %v2525_v58, %s3795_s15  ;;  %2188 = vst.msk [vmem:[#allocation8 + $0x30] sm:$0xff] %vm174_vm0, %v2622_v53 }
 0x2bf   :  { %2510 = vst.msk [vmem:[#allocation8 + $0x20] sm:$0xff] %vm174_vm0, %v2718_v56 }
 0x2c0   :  { %v5008_v23 = vld [vmem:[#allocation6 + $0x32] sm:$0xff]  ;;  %v2090_v20 = vpop.f32.mrf.mxu0 }
 0x2c1   :  { %v5010_v61 = vld [vmem:[#allocation6 + $0x30] sm:$0xff]  ;;  %2831 = vst.msk [vmem:[#allocation8 + $0x28] sm:$0xff] %vm174_vm0, %v5008_v23  ;;  %v2091_v48 = vadd.f32 %v4956_v13, %v2090_v20  ;;  %2654 = vrot.lane.b32.xlu0 %v2622_v53, %s3795_s15 }
 0x2c2   :  { %v2719_v63 = vld [vmem:[#allocation6 + $0x31] sm:$0xff]  ;;  %2559 = vrot.lane.b32.xlu1 %v2814_v31, %s3792_s12  ;;  %2189 = vst.msk [vmem:[#allocation8 + $0x48] sm:$0xff] %vm174_vm0, %v5010_v61  ;;  %v2092_v28 = vpop.f32.mrf.mxu0 }
 0x2c3   :  { %2511 = vst.msk [vmem:[#allocation8 + $0x38] sm:$0xff] %vm174_vm0, %v2719_v63  ;;  %v2141_v7 = vmax.f32 %v2091_v48, 0.0 }
 0x2c4   :  { %v5026_v8 = vld [vmem:[#allocation6 + $0x42] sm:$0xff]  ;;  %v2093_v29 = vpop.f32.mrf.mxu0 }
 0x2c5   :  { %v5028_v51 = vld [vmem:[#allocation6 + $0x40] sm:$0xff]  ;;  %2832 = vst.msk [vmem:[#allocation8 + $0x40] sm:$0xff] %vm174_vm0, %v5026_v8  ;;  %2158 = vst.msk [vmem:[#allocation6 + $0x51] sm:$0xff] %vm174_vm0, %v2141_v7  ;;  %v2094_v2 = vadd.f32 %v4956_v13, %v2093_v29  ;;  %2750 = vrot.lane.b32.xlu0 %v2718_v56, %s3793_s2 }
 0x2c6   :  { %v5030_v54 = vld [vmem:[#allocation6 + $0x41] sm:$0xff]  ;;  %2430 = vrot.lane.b32.xlu1 %v2622_v53, %s3793_s2  ;;  %2190 = vst.msk [vmem:[#allocation8 + $0x60] sm:$0xff] %vm174_vm0, %v5028_v51  ;;  %v2095_v38 = vpop.f32.mrf.mxu0 }
 0x2c7   :  { %2512 = vst.msk [vmem:[#allocation8 + $0x50] sm:$0xff] %vm174_vm0, %v5030_v54  ;;  %v2142_v57 = vmax.f32 %v2094_v2, 0.0 }
 0x2c8   :  { %v2098_v50 = vpop.f32.mrf.mxu0 }
 0x2c9   :  { %2159 = vst.msk [vmem:[#allocation6 + $0x61] sm:$0xff] %vm174_vm0, %v2142_v57  ;;  %v2099_v27 = vadd.f32 %v4956_v13, %v2098_v50  ;;  %2238 = vrot.lane.b32.xlu0 %v2718_v56, %s3792_s12 }
 0x2ca   :  { %2656 = vrot.lane.b32.xlu1 %v5010_v61, %s3795_s15  ;;  %v2100_v59 = vpop.f32.mrf.mxu0 }
 0x2cb   :  { %v2143_v10 = vmax.f32 %v2099_v27, 0.0 }
 0x2cc   :  { %v5053_v60 = vld [vmem:[#allocation6 + $0x52] sm:$0xff]  ;;  %v2101_v6 = vpop.f32.mrf.mxu0 }
 0x2cd   :  { %v5055_v41 = vld [vmem:[#allocation6 + $0x50] sm:$0xff]  ;;  %2833 = vst.msk [vmem:[#allocation8 + $0x58] sm:$0xff] %vm174_vm0, %v5053_v60  ;;  %2160 = vst.msk [vmem:[#allocation6 + $0x71] sm:$0xff] %vm174_vm0, %v2143_v10  ;;  %v2102_v22 = vadd.f32 %v4956_v13, %v2101_v6  ;;  %2335 = vrot.lane.b32.xlu0 %v2814_v31, %s3795_s15 }
 0x2ce   :  { %v5057_v15 = vld [vmem:[#allocation6 + $0x51] sm:$0xff]  ;;  %2752 = vrot.lane.b32.xlu1 %v2719_v63, %s3793_s2  ;;  %2191 = vst.msk [vmem:[#allocation8 + $0x78] sm:$0xff] %vm174_vm0, %v5055_v41  ;;  %v2103_v18 = vpop.f32.mrf.mxu0 }
 0x2cf   :  { %2513 = vst.msk [vmem:[#allocation8 + $0x68] sm:$0xff] %vm174_vm0, %v5057_v15  ;;  %v2144_v55 = vmax.f32 %v2102_v22, 0.0 }
 0x2d0   :  { %v5069_v16 = vld [vmem:[#allocation6 + $0x62] sm:$0xff] }
 0x2d1   :  { %v5071_v17 = vld [vmem:[#allocation6 + $0x60] sm:$0xff]  ;;  %2834 = vst.msk [vmem:[#allocation8 + $0x70] sm:$0xff] %vm174_vm0, %v5069_v16  ;;  %2161 = vst.msk [vmem:[#allocation6 + $0x81] sm:$0xff] %vm174_vm0, %v2144_v55  ;;  %2561 = vrot.lane.b32.xlu0 %v5008_v23, %s3792_s12 }
 0x2d2   :  { %v5073_v14 = vld [vmem:[#allocation6 + $0x61] sm:$0xff]  ;;  %2240 = vrot.lane.b32.xlu1 %v2719_v63, %s3792_s12  ;;  %2192 = vst.msk [vmem:[#allocation8 + $0x90] sm:$0xff] %vm174_vm0, %v5071_v17 }
 0x2d3   :  { %2514 = vst.msk [vmem:[#allocation8 + $0x80] sm:$0xff] %vm174_vm0, %v5073_v14 }
 0x2d4   :  { %v5085_v19 = vld [vmem:[#allocation6 + $0x72] sm:$0xff]  ;;  %v2106_v62 = vpop.f32.mrf.mxu0 }
 0x2d5   :  { %v5087_v25 = vld [vmem:[#allocation6 + $0x70] sm:$0xff]  ;;  %2835 = vst.msk [vmem:[#allocation8 + $0x88] sm:$0xff] %vm174_vm0, %v5085_v19  ;;  %v2107_v32 = vadd.f32 %v4956_v13, %v2106_v62  ;;  %2432 = vrot.lane.b32.xlu0 %v5010_v61, %s3793_s2  ;;  %v5300_v62 = vld [vmem:[%s5511_s5 + $0x88] sm:$0xff]  }
 0x2d6   :  { %v5089_v4 = vld [vmem:[#allocation6 + $0x71] sm:$0xff]  ;;  %2337 = vrot.lane.b32.xlu1 %v5008_v23, %s3795_s15  ;;  %2193 = vst.msk [vmem:[#allocation8 + $0xa8] sm:$0xff] %vm174_vm0, %v5087_v25  ;;  %v2108_v33 = vpop.f32.mrf.mxu0  ;;  %3667 = vmatprep.subr.bf16.mxu1 %v5300_v62 }
 0x2d7   :  { %2515 = vst.msk [vmem:[#allocation8 + $0x98] sm:$0xff] %vm174_vm0, %v5089_v4  ;;  %v2145_v21 = vmax.f32 %v2107_v32, 0.0 }
 0x2d8   :  { %v5102_v39 = vld [vmem:[#allocation6 + $0x82] sm:$0xff]  ;;  %v2109_v24 = vpop.f32.mrf.mxu0 }
 0x2d9   :  { %v5104_v9 = vld [vmem:[#allocation6 + $0x81] sm:$0xff]  ;;  %2836 = vst.msk [vmem:[#allocation8 + $0xa0] sm:$0xff] %vm174_vm0, %v5102_v39  ;;  %2162 = vst.msk [vmem:[#allocation6 + $0xb1] sm:$0xff] %vm174_vm0, %v2145_v21  ;;  %v2110_v1 = vadd.f32 %v4956_v13, %v2109_v24  ;;  %2658 = vrot.lane.b32.xlu0 %v5028_v51, %s3795_s15 }
 0x2da   :  { %2563 = vrot.lane.b32.xlu1 %v5026_v8, %s3792_s12  ;;  %2516 = vst.msk [vmem:[#allocation8 + $0xb0] sm:$0xff] %vm174_vm0, %v5104_v9  ;;  %v2111_v3 = vpop.f32.mrf.mxu0  ;;  %v2628_v18 = vld [vmem:[#allocation6 + $0x80] sm:$0xff] }
 0x2db   :  { %v2146_v42 = vmax.f32 %v2110_v1, 0.0 }
 0x2dc   :  { %v2114_v37 = vpop.f32.mrf.mxu0 }
 0x2dd   :  { %2163 = vst.msk [vmem:[#allocation6 + $0xc1] sm:$0xff] %vm174_vm0, %v2146_v42  ;;  %v2115_v12 = vadd.f32 %v4956_v13, %v2114_v37  ;;  %2754 = vrot.lane.b32.xlu0 %v5030_v54, %s3793_s2 }
 0x2de   :  { %2434 = vrot.lane.b32.xlu1 %v5028_v51, %s3793_s2  ;;  %v2116_v34 = vpop.f32.mrf.mxu0 }
 0x2df   :  { %v2147_v43 = vmax.f32 %v2115_v12, 0.0 }
 0x2e0   :  { %v2117_v30 = vpop.f32.mrf.mxu0  ;;  %v5122_v58 = vld [vmem:[#allocation6 + $0xb1] sm:$0xff] }
 0x2e1   :  { %v5124_v26 = vld [vmem:[#allocation6 + $0xb0] sm:$0xff]  ;;  %2164 = vst.msk [vmem:[#allocation6 + $0xd1] sm:$0xff] %vm174_vm0, %v2147_v43  ;;  %v2118_v44 = vadd.f32 %v4956_v13, %v2117_v30  ;;  %2242 = vrot.lane.b32.xlu0 %v5030_v54, %s3792_s12  ;;  %2517 = vst.msk [vmem:[#allocation8 + $0xc8] sm:$0xff] %vm174_vm0, %v5122_v58 }
 0x2e2   :  { %2660 = vrot.lane.b32.xlu1 %v5055_v41, %s3795_s15  ;;  %2195 = vst.msk [vmem:[#allocation8 + $0xd8] sm:$0xff] %vm174_vm0, %v5124_v26  ;;  %v2119_v45 = vpop.f32.mrf.mxu0  ;;  %v2533_v55 = vld [vmem:[#allocation6 + $0xb2] sm:$0xff] }
 0x2e3   :  { %v2148_v49 = vmax.f32 %v2118_v44, 0.0 }
 0x2e4   :  { %v5136_v35 = vld [vmem:[#allocation6 + $0xc2] sm:$0xff]  ;;  %v2122_v52 = vpop.f32.mrf.mxu0 }
 0x2e5   :  { %v5138_v11 = vld [vmem:[#allocation6 + $0xc0] sm:$0xff]  ;;  %2838 = vst.msk [vmem:[#allocation8 + $0xd0] sm:$0xff] %vm174_vm0, %v5136_v35  ;;  %2165 = vst.msk [vmem:[#allocation6 + $0xe1] sm:$0xff] %vm174_vm0, %v2148_v49  ;;  %v2123_v53 = vadd.f32 %v4956_v13, %v2122_v52  ;;  %2339 = vrot.lane.b32.xlu0 %v5026_v8, %s3795_s15 }
 0x2e6   :  { %v5140_v31 = vld [vmem:[#allocation6 + $0xc1] sm:$0xff]  ;;  %2756 = vrot.lane.b32.xlu1 %v5057_v15, %s3793_s2  ;;  %2196 = vst.msk [vmem:[#allocation8 + $0xf0] sm:$0xff] %vm174_vm0, %v5138_v11  ;;  %v2124_v56 = vpop.f32.mrf.mxu0 }
 0x2e7   :  { %2518 = vst.msk [vmem:[#allocation8 + $0xe0] sm:$0xff] %vm174_vm0, %v5140_v31  ;;  %v2149_v36 = vmax.f32 %v2123_v53, 0.0  ;;  %v3767_v52 = vld [vmem:[%s5511_s5 + $0x80] sm:$0xff]  }
 0x2e8   :  { %v5154_v47 = vld [vmem:[#allocation6 + $0xd2] sm:$0xff]  ;;  %v2125_v23 = vpop.f32.mrf.mxu0 }
 0x2e9   :  { %v5156_v20 = vld [vmem:[#allocation6 + $0xd0] sm:$0xff]  ;;  %2839 = vst.msk [vmem:[#allocation8 + $0xe8] sm:$0xff] %vm174_vm0, %v5154_v47  ;;  %2166 = vst.msk [vmem:[#allocation6 + $0xf1] sm:$0xff] %vm174_vm0, %v2149_v36  ;;  %v2126_v63 = vadd.f32 %v4956_v13, %v2125_v23  ;;  %2565 = vrot.lane.b32.xlu0 %v5053_v60, %s3792_s12 }
 0x2ea   :  { %v5158_v61 = vld [vmem:[#allocation6 + $0xd1] sm:$0xff]  ;;  %2244 = vrot.lane.b32.xlu1 %v5057_v15, %s3792_s12  ;;  %2197 = vst.msk [vmem:[#allocation8 + $0x108] sm:$0xff] %vm174_vm0, %v5156_v20  ;;  %v2127_v48 = vpop.f32.mrf.mxu0 }
 0x2eb   :  { %2519 = vst.msk [vmem:[#allocation8 + $0xf8] sm:$0xff] %vm174_vm0, %v5158_v61  ;;  %v2150_v0 = vmax.f32 %v2126_v63, 0.0 }
 0x2ec   :  { %v5172_v28 = vld [vmem:[#allocation6 + $0xe2] sm:$0xff]  ;;  %v2130_v8 = vpop.f32.mrf.mxu0 }
 0x2ed   :  { %v5174_v5 = vld [vmem:[#allocation6 + $0xe0] sm:$0xff]  ;;  %2840 = vst.msk [vmem:[#allocation8 + $0x100] sm:$0xff] %vm174_vm0, %v5172_v28  ;;  %2167 = vst.msk [vmem:[#allocation6 + $0x101] sm:$0xff] %vm174_vm0, %v2150_v0  ;;  %2436 = vrot.lane.b32.xlu0 %v5055_v41, %s3793_s2  ;;  %v2131_v29 = vadd.f32 %v4956_v13, %v2130_v8 }
 0x2ee   :  { %v5176_v7 = vld [vmem:[#allocation6 + $0xe1] sm:$0xff]  ;;  %2341 = vrot.lane.b32.xlu1 %v5053_v60, %s3795_s15  ;;  %2198 = vst.msk [vmem:[#allocation8 + $0x120] sm:$0xff] %vm174_vm0, %v5174_v5  ;;  %v2132_v54 = vpop.f32.mrf.mxu0 }
 0x2ef   :  { %2520 = vst.msk [vmem:[#allocation8 + $0x110] sm:$0xff] %vm174_vm0, %v5176_v7  ;;  %v2151_v38 = vmax.f32 %v2131_v29, 0.0 }
 0x2f0   :  { %v5190_v51 = vld [vmem:[#allocation6 + $0xf2] sm:$0xff]  ;;  %v2133_v46 = vpop.f32.mrf.mxu0 }
 0x2f1   :  { %v5192_v2 = vld [vmem:[#allocation6 + $0xf0] sm:$0xff]  ;;  %2841 = vst.msk [vmem:[#allocation8 + $0x118] sm:$0xff] %vm174_vm0, %v5190_v51  ;;  %2662 = vrot.lane.b32.xlu0 %v5071_v17, %s3795_s15  ;;  %2168 = vst.msk [vmem:[#allocation6 + $0x111] sm:$0xff] %vm174_vm0, %v2151_v38  ;;  %v2134_v57 = vadd.f32 %v4956_v13, %v2133_v46 }
 0x2f2   :  { %v5194_v40 = vld [vmem:[#allocation6 + $0xf1] sm:$0xff]  ;;  %2567 = vrot.lane.b32.xlu1 %v5069_v16, %s3792_s12  ;;  %2199 = vst.msk [vmem:[#allocation8 + $0x138] sm:$0xff] %vm174_vm0, %v5192_v2  ;;  %v2135_v27 = vpop.f32.mrf.mxu0 }
 0x2f3   :  { %2521 = vst.msk [vmem:[#allocation8 + $0x128] sm:$0xff] %vm174_vm0, %v5194_v40  ;;  %v2152_v60 = vmax.f32 %v2134_v57, 0.0 }
 0x2f4   :  { %v5208_v50 = vld [vmem:[#allocation6 + $0x102] sm:$0xff] }
 0x2f5   :  { %v5210_v59 = vld [vmem:[#allocation6 + $0x100] sm:$0xff]  ;;  %2842 = vst.msk [vmem:[#allocation8 + $0x130] sm:$0xff] %vm174_vm0, %v5208_v50  ;;  %2758 = vrot.lane.b32.xlu0 %v5073_v14, %s3793_s2  ;;  %2169 = vst.msk [vmem:[#allocation6 + $0x121] sm:$0xff] %vm174_vm0, %v2152_v60 }
 0x2f6   :  { %v5212_v10 = vld [vmem:[#allocation6 + $0x101] sm:$0xff]  ;;  %2438 = vrot.lane.b32.xlu1 %v5071_v17, %s3793_s2  ;;  %2200 = vst.msk [vmem:[#allocation8 + $0x150] sm:$0xff] %vm174_vm0, %v5210_v59 }
 0x2f7   :  { %2522 = vst.msk [vmem:[#allocation8 + $0x140] sm:$0xff] %vm174_vm0, %v5212_v10 }
 0x2f8   :  { %v5229_v13 = vld [vmem:[#allocation6 + $0x112] sm:$0xff] }
 0x2f9   :  { %2246 = vrot.lane.b32.xlu0 %v5073_v14, %s3792_s12  ;;  %v5231_v6 = vld [vmem:[#allocation6 + $0x110] sm:$0xff]  ;;  %2843 = vst.msk [vmem:[#allocation8 + $0x148] sm:$0xff] %vm174_vm0, %v5229_v13 }
 0x2fa   :  { %2664 = vrot.lane.b32.xlu1 %v5087_v25, %s3795_s15  ;;  %v5233_v41 = vld [vmem:[#allocation6 + $0x111] sm:$0xff]  ;;  %2201 = vst.msk [vmem:[#allocation8 + $0x168] sm:$0xff] %vm174_vm0, %v5231_v6 }
 0x2fb   :  { %2523 = vst.msk [vmem:[#allocation8 + $0x158] sm:$0xff] %vm174_vm0, %v5233_v41 }
 0x2fc   :  { %v5245_v15 = vld [vmem:[#allocation6 + $0x122] sm:$0xff] }
 0x2fd   :  { %2343 = vrot.lane.b32.xlu0 %v5069_v16, %s3795_s15  ;;  %v5247_v22 = vld [vmem:[#allocation6 + $0x121] sm:$0xff]  ;;  %2844 = vst.msk [vmem:[#allocation8 + $0x160] sm:$0xff] %vm174_vm0, %v5245_v15  ;;  %v5270_v16 = vpop.permute.xlu1 %2668 }
 0x2fe   :  { %2760 = vrot.lane.b32.xlu1 %v5089_v4, %s3793_s2  ;;  %2524 = vst.msk [vmem:[#allocation8 + $0x170] sm:$0xff] %vm174_vm0, %v5247_v22  ;;  %v2636_v48 = vld [vmem:[#allocation6 + $0x120] sm:$0xff] }
 0x301   :  { %2569 = vrot.lane.b32.xlu0 %v5085_v19, %s3792_s12  ;;  %v5279_v17 = vpop.permute.xlu1 %2764 }
 0x302   :  { %2248 = vrot.lane.b32.xlu1 %v5089_v4, %s3792_s12 }
 0x305   :  { %2440 = vrot.lane.b32.xlu0 %v5087_v25, %s3793_s2  ;;  %v5285_v14 = vpop.permute.xlu1 %2684 }
 0x306   :  { %2345 = vrot.lane.b32.xlu1 %v5085_v19, %s3795_s15 }
 0x309   :  { %2666 = vrot.lane.b32.xlu0 %v2628_v18, %s3795_s15  ;;  %v5295_v19 = vpop.permute.xlu1 %2780 }
 0x30a   :  { %2571 = vrot.lane.b32.xlu1 %v5102_v39, %s3792_s12 }
 0x30d   :  { %2762 = vrot.lane.b32.xlu0 %v5104_v9, %s3793_s2 }
 0x30e   :  { %2442 = vrot.lane.b32.xlu1 %v2628_v18, %s3793_s2 }
 0x311   :  { %2573 = vrot.lane.b32.xlu0 %v2533_v55, %s3792_s12 }
 0x312   :  { %2252 = vrot.lane.b32.xlu1 %v5122_v58, %s3792_s12 }
 0x315   :  { %2444 = vrot.lane.b32.xlu0 %v5124_v26, %s3793_s2 }
 0x316   :  { %2349 = vrot.lane.b32.xlu1 %v2533_v55, %s3795_s15 }
 0x319   :  { %2670 = vrot.lane.b32.xlu0 %v5138_v11, %s3795_s15 }
 0x31a   :  { %2575 = vrot.lane.b32.xlu1 %v5136_v35, %s3792_s12 }
 0x31d   :  { %2766 = vrot.lane.b32.xlu0 %v5140_v31, %s3793_s2 }
 0x31e   :  { %2446 = vrot.lane.b32.xlu1 %v5138_v11, %s3793_s2 }
 0x321   :  { %2254 = vrot.lane.b32.xlu0 %v5140_v31, %s3792_s12 }
 0x322   :  { %2672 = vrot.lane.b32.xlu1 %v5156_v20, %s3795_s15 }
 0x325   :  { %2351 = vrot.lane.b32.xlu0 %v5136_v35, %s3795_s15 }
 0x326   :  { %2768 = vrot.lane.b32.xlu1 %v5158_v61, %s3793_s2 }
 0x329   :  { %2577 = vrot.lane.b32.xlu0 %v5154_v47, %s3792_s12 }
 0x32a   :  { %2256 = vrot.lane.b32.xlu1 %v5158_v61, %s3792_s12 }
 0x32b   :  { %v2558_v25 = vpop.permute.xlu0 %2557 }
 0x32c   :  { %v2237_v4 = vpop.permute.xlu1 %2236  ;;  %2605 = vst.msk [vmem:[#allocation8 + $0x8] sm:$0xff] %vm2282_vm11, %v2558_v25 }
 0x32d   :  { %2284 = vst.msk [vmem:[#allocation8 + $0x18] sm:$0xff] %vm2282_vm11, %v2237_v4  ;;  %2448 = vrot.lane.b32.xlu0 %v5156_v20, %s3793_s2 }
 0x32e   :  { %2353 = vrot.lane.b32.xlu1 %v5154_v47, %s3795_s15 }
 0x32f   :  { %v2429_v32 = vpop.permute.xlu0 %2428 }
 0x330   :  { %v2334_v33 = vpop.permute.xlu1 %2333  ;;  %2477 = vst.msk [vmem:[#allocation8] sm:$0xff] %vm2476_vm13, %v2429_v32 }
 0x331   :  { %2381 = vst.msk [vmem:[#allocation8 + $0x18] sm:$0xff] %vm2379_vm12, %v2334_v33  ;;  %2674 = vrot.lane.b32.xlu0 %v5174_v5, %s3795_s15 }
 0x332   :  { %2579 = vrot.lane.b32.xlu1 %v5172_v28, %s3792_s12 }
 0x333   :  { %v2655_v21 = vpop.permute.xlu0 %2654 }
 0x334   :  { %v2560_v39 = vpop.permute.xlu1 %2559  ;;  %2702 = vst.msk [vmem:[#allocation8 + $0x8] sm:$0xff] %vm2379_vm12, %v2655_v21 }
 0x335   :  { %2606 = vst.msk [vmem:[#allocation8 + $0x20] sm:$0xff] %vm2282_vm11, %v2560_v39  ;;  %2770 = vrot.lane.b32.xlu0 %v5176_v7, %s3793_s2 }
 0x336   :  { %2450 = vrot.lane.b32.xlu1 %v5174_v5, %s3793_s2 }
 0x337   :  { %v2751_v24 = vpop.permute.xlu0 %2750  ;;  %v2846_v49 = vld [vmem:[#allocation8] sm:$0xff] }
 0x338   :  { %v2431_v9 = vpop.permute.xlu1 %2430  ;;  %2798 = vst.msk [vmem:[#allocation8 + $0x8] sm:$0xff] %vm2476_vm13, %v2751_v24 }
 0x339   :  { %2478 = vst.msk [vmem:[#allocation8 + $0x18] sm:$0xff] %vm2476_vm13, %v2431_v9  ;;  %2258 = vrot.lane.b32.xlu0 %v5176_v7, %s3792_s12 }
 0x33a   :  { %2676 = vrot.lane.b32.xlu1 %v5192_v2, %s3795_s15 }
 0x33b   :  { %v2239_v1 = vpop.permute.xlu0 %2238 }
 0x33c   :  { %v2657_v3 = vpop.permute.xlu1 %2656  ;;  %2285 = vst.msk [vmem:[#allocation8 + $0x30] sm:$0xff] %vm2282_vm11, %v2239_v1 }
 0x33d   :  { %2703 = vst.msk [vmem:[#allocation8 + $0x20] sm:$0xff] %vm2379_vm12, %v2657_v3  ;;  %2355 = vrot.lane.b32.xlu0 %v5172_v28, %s3795_s15 }
 0x33e   :  { %2772 = vrot.lane.b32.xlu1 %v5194_v40, %s3793_s2 }
 0x33f   :  { %v2336_v42 = vpop.permute.xlu0 %2335  ;;  %v2847_v26 = vld [vmem:[#allocation8 + $0x8] sm:$0xff] }
 0x340   :  { %v2753_v37 = vpop.permute.xlu1 %2752  ;;  %2382 = vst.msk [vmem:[#allocation8 + $0x30] sm:$0xff] %vm2379_vm12, %v2336_v42  ;;  %v2849_v43 = vld [vmem:[#allocation8 + $0x18] sm:$0xff] }
 0x341   :  { %2799 = vst.msk [vmem:[#allocation8 + $0x20] sm:$0xff] %vm2476_vm13, %v2753_v37  ;;  %2581 = vrot.lane.b32.xlu0 %v5190_v51, %s3792_s12  ;;  %v2894_v35 = vpack.c.bf16 %v2849_v43, %v2846_v49 }
 0x342   :  { %2260 = vrot.lane.b32.xlu1 %v5194_v40, %s3792_s12 }
 0x343   :  { %v2562_v12 = vpop.permute.xlu0 %2561 }
 0x344   :  { %v2241_v34 = vpop.permute.xlu1 %2240  ;;  %2607 = vst.msk [vmem:[#allocation8 + $0x38] sm:$0xff] %vm2282_vm11, %v2562_v12 }
 0x345   :  { %2286 = vst.msk [vmem:[#allocation8 + $0x48] sm:$0xff] %vm2282_vm11, %v2241_v34  ;;  %2452 = vrot.lane.b32.xlu0 %v5192_v2, %s3793_s2 }
 0x346   :  { %2357 = vrot.lane.b32.xlu1 %v5190_v51, %s3795_s15 }
 0x347   :  { %v2433_v30 = vpop.permute.xlu0 %2432 }
 0x348   :  { %v2338_v58 = vpop.permute.xlu1 %2337  ;;  %v2850_v44 = vld [vmem:[#allocation8 + $0x20] sm:$0xff]  ;;  %2479 = vst.msk [vmem:[#allocation8 + $0x30] sm:$0xff] %vm2476_vm13, %v2433_v30 }
 0x349   :  { %2383 = vst.msk [vmem:[#allocation8 + $0x48] sm:$0xff] %vm2379_vm12, %v2338_v58  ;;  %v2895_v45 = vpack.c.bf16 %v2850_v44, %v2847_v26  ;;  %2678 = vrot.lane.b32.xlu0 %v5210_v59, %s3795_s15 }
 0x34a   :  { %2583 = vrot.lane.b32.xlu1 %v5208_v50, %s3792_s12 }
 0x34b   :  { %3125 = vmatprep.mubr.bf16.mxu1 %v2895_v45  ;;  %v2659_v11 = vpop.permute.xlu0 %2658 }
 0x34c   :  { %v2564_v31 = vpop.permute.xlu1 %2563  ;;  %3126 = vmatmul.mubr.bf16.vlgmr.msra.gmra.mxu1 %v2894_v35  ;;  %2704 = vst.msk [vmem:[#allocation8 + $0x38] sm:$0xff] %vm2379_vm12, %v2659_v11 }
 0x34d   :  { %2608 = vst.msk [vmem:[#allocation8 + $0x50] sm:$0xff] %vm2282_vm11, %v2564_v31  ;;  %3668 = vmatpush3.bf16.msra.mxu1 %v5300_v62  ;;  %2774 = vrot.lane.b32.xlu0 %v5212_v10, %s3793_s2 }
 0x34e   :  { %2454 = vrot.lane.b32.xlu1 %v5210_v59, %s3793_s2  ;;  %3669 = vmatprep.subr.bf16.mxu1 %v3767_v52 }
 0x34f   :  { %v2755_v53 = vpop.permute.xlu0 %2754  ;;  %v2852_v51 = vld [vmem:[#allocation8 + $0x30] sm:$0xff] }
 0x350   :  { %v2435_v56 = vpop.permute.xlu1 %2434  ;;  %2800 = vst.msk [vmem:[#allocation8 + $0x38] sm:$0xff] %vm2476_vm13, %v2755_v53 }
 0x351   :  { %2480 = vst.msk [vmem:[#allocation8 + $0x48] sm:$0xff] %vm2476_vm13, %v2435_v56  ;;  %3670 = vmatpush3.bf16.msra.mxu1 %v3767_v52  ;;  %2262 = vrot.lane.b32.xlu0 %v5212_v10, %s3792_s12 }
 0x352   :  { %2680 = vrot.lane.b32.xlu1 %v5231_v6, %s3795_s15 }
 0x353   :  { %v2243_v36 = vpop.permute.xlu0 %2242 }
 0x354   :  { %v2661_v47 = vpop.permute.xlu1 %2660  ;;  %2287 = vst.msk [vmem:[#allocation8 + $0x60] sm:$0xff] %vm2282_vm11, %v2243_v36 }
 0x355   :  { %2705 = vst.msk [vmem:[#allocation8 + $0x50] sm:$0xff] %vm2379_vm12, %v2661_v47  ;;  %2359 = vrot.lane.b32.xlu0 %v5208_v50, %s3795_s15 }
 0x356   :  { %2776 = vrot.lane.b32.xlu1 %v5233_v41, %s3793_s2 }
 0x357   :  { %v2340_v23 = vpop.permute.xlu0 %2339  ;;  %v2853_v7 = vld [vmem:[#allocation8 + $0x38] sm:$0xff] }
 0x358   :  { %v2757_v20 = vpop.permute.xlu1 %2756  ;;  %2384 = vst.msk [vmem:[#allocation8 + $0x60] sm:$0xff] %vm2379_vm12, %v2340_v23  ;;  %v2855_v0 = vld [vmem:[#allocation8 + $0x48] sm:$0xff] }
 0x359   :  { %2801 = vst.msk [vmem:[#allocation8 + $0x50] sm:$0xff] %vm2476_vm13, %v2757_v20  ;;  %2585 = vrot.lane.b32.xlu0 %v5229_v13, %s3792_s12  ;;  %v2897_v54 = vpack.c.bf16 %v2855_v0, %v2852_v51 }
 0x35a   :  { %2264 = vrot.lane.b32.xlu1 %v5233_v41, %s3792_s12 }
 0x35b   :  { %v2566_v61 = vpop.permute.xlu0 %2565 }
 0x35c   :  { %v2245_v63 = vpop.permute.xlu1 %2244  ;;  %2609 = vst.msk [vmem:[#allocation8 + $0x68] sm:$0xff] %vm2282_vm11, %v2566_v61 }
 0x35d   :  { %2288 = vst.msk [vmem:[#allocation8 + $0x78] sm:$0xff] %vm2282_vm11, %v2245_v63  ;;  %2682 = vrot.lane.b32.xlu0 %v2636_v48, %s3795_s15 }
 0x35e   :  { %2361 = vrot.lane.b32.xlu1 %v5229_v13, %s3795_s15 }
 0x35f   :  { %v2437_v28 = vpop.permute.xlu0 %2436 }
 0x360   :  { %v2342_v5 = vpop.permute.xlu1 %2341  ;;  %v2856_v8 = vld [vmem:[#allocation8 + $0x50] sm:$0xff]  ;;  %2481 = vst.msk [vmem:[#allocation8 + $0x60] sm:$0xff] %vm2476_vm13, %v2437_v28 }
 0x361   :  { %2385 = vst.msk [vmem:[#allocation8 + $0x78] sm:$0xff] %vm2379_vm12, %v2342_v5  ;;  %v2898_v29 = vpack.c.bf16 %v2856_v8, %v2853_v7  ;;  %2778 = vrot.lane.b32.xlu0 %v5247_v22, %s3793_s2 }
 0x362   :  { %2587 = vrot.lane.b32.xlu1 %v5245_v15, %s3792_s12 }
 0x363   :  { %3133 = vmatprep.mubr.bf16.mxu1 %v2898_v29  ;;  %v2663_v2 = vpop.permute.xlu0 %2662 }
 0x364   :  { %v2568_v40 = vpop.permute.xlu1 %2567  ;;  %3134 = vmatmul.mubr.bf16.gmra.mxu1 %v2897_v54  ;;  %2706 = vst.msk [vmem:[#allocation8 + $0x68] sm:$0xff] %vm2379_vm12, %v2663_v2 }
 0x365   :  { %2610 = vst.msk [vmem:[#allocation8 + $0x80] sm:$0xff] %vm2282_vm11, %v2568_v40  ;;  %2456 = vrot.lane.b32.xlu0 %v5231_v6, %s3793_s2 }
 0x366   :  { %2458 = vrot.lane.b32.xlu1 %v2636_v48, %s3793_s2 }
 0x367   :  { %v2759_v38 = vpop.permute.xlu0 %2758  ;;  %v2858_v55 = vld [vmem:[#allocation8 + $0x60] sm:$0xff] }
 0x368   :  { %v2439_v46 = vpop.permute.xlu1 %2438  ;;  %2802 = vst.msk [vmem:[#allocation8 + $0x68] sm:$0xff] %vm2476_vm13, %v2759_v38 }
 0x369   :  { %2482 = vst.msk [vmem:[#allocation8 + $0x78] sm:$0xff] %vm2476_vm13, %v2439_v46 }
 0x36b   :  { %v2247_v57 = vpop.permute.xlu0 %2246 }
 0x36c   :  { %v2665_v50 = vpop.permute.xlu1 %2664  ;;  %2289 = vst.msk [vmem:[#allocation8 + $0x90] sm:$0xff] %vm2282_vm11, %v2247_v57 }
 0x36d   :  { %2707 = vst.msk [vmem:[#allocation8 + $0x80] sm:$0xff] %vm2379_vm12, %v2665_v50 }
 0x36f   :  { %v2344_v27 = vpop.permute.xlu0 %2343  ;;  %v2859_v15 = vld [vmem:[#allocation8 + $0x68] sm:$0xff] }
 0x370   :  { %v2761_v59 = vpop.permute.xlu1 %2760  ;;  %2386 = vst.msk [vmem:[#allocation8 + $0x90] sm:$0xff] %vm2379_vm12, %v2344_v27  ;;  %v2861_v13 = vld [vmem:[#allocation8 + $0x78] sm:$0xff] }
 0x371   :  { %2803 = vst.msk [vmem:[#allocation8 + $0x80] sm:$0xff] %vm2476_vm13, %v2761_v59  ;;  %v2900_v62 = vpack.c.bf16 %v2861_v13, %v2858_v55 }
 0x373   :  { %v2570_v10 = vpop.permute.xlu0 %2569 }
 0x374   :  { %v2249_v60 = vpop.permute.xlu1 %2248  ;;  %2611 = vst.msk [vmem:[#allocation8 + $0x98] sm:$0xff] %vm2282_vm11, %v2570_v10 }
 0x375   :  { %2290 = vst.msk [vmem:[#allocation8 + $0xa8] sm:$0xff] %vm2282_vm11, %v2249_v60 }
 0x377   :  { %v2441_v6 = vpop.permute.xlu0 %2440 }
 0x378   :  { %v2346_v41 = vpop.permute.xlu1 %2345  ;;  %v2862_v22 = vld [vmem:[#allocation8 + $0x80] sm:$0xff]  ;;  %2483 = vst.msk [vmem:[#allocation8 + $0x90] sm:$0xff] %vm2476_vm13, %v2441_v6 }
 0x379   :  { %2387 = vst.msk [vmem:[#allocation8 + $0xa8] sm:$0xff] %vm2379_vm12, %v2346_v41  ;;  %v2901_v18 = vpack.c.bf16 %v2862_v22, %v2859_v15 }
 0x37b   :  { %3141 = vmatprep.mubr.bf16.mxu1 %v2901_v18  ;;  %v2667_v25 = vpop.permute.xlu0 %2666 }
 0x37c   :  { %v2572_v4 = vpop.permute.xlu1 %2571  ;;  %3142 = vmatmul.mubr.bf16.gmra.mxu1 %v2900_v62  ;;  %2708 = vst.msk [vmem:[#allocation8 + $0x98] sm:$0xff] %vm2379_vm12, %v2667_v25 }
 0x37d   :  { %2612 = vst.msk [vmem:[#allocation8 + $0xb0] sm:$0xff] %vm2282_vm11, %v2572_v4 }
 0x37e   :  { %2709 = vst.msk [vmem:[#allocation8 + $0xb0] sm:$0xff] %vm2379_vm12, %v5270_v16 }
 0x37f   :  { %2805 = vst.msk [vmem:[#allocation8 + $0xb0] sm:$0xff] %vm2476_vm13, %v5279_v17  ;;  %v2763_v32 = vpop.permute.xlu0 %2762  ;;  %v2864_v24 = vld [vmem:[#allocation8 + $0x90] sm:$0xff] }
 0x380   :  { %v2443_v33 = vpop.permute.xlu1 %2442  ;;  %2804 = vst.msk [vmem:[#allocation8 + $0x98] sm:$0xff] %vm2476_vm13, %v2763_v32 }
 0x381   :  { %2484 = vst.msk [vmem:[#allocation8 + $0xa8] sm:$0xff] %vm2476_vm13, %v2443_v33 }
 0x383   :  { %v2574_v21 = vpop.permute.xlu0 %2573 }
 0x384   :  { %v2253_v39 = vpop.permute.xlu1 %2252  ;;  %2613 = vst.msk [vmem:[#allocation8 + $0xc8] sm:$0xff] %vm2282_vm11, %v2574_v21 }
 0x385   :  { %2292 = vst.msk [vmem:[#allocation8 + $0xd8] sm:$0xff] %vm2282_vm11, %v2253_v39 }
 0x386   :  { %v2868_v16 = vld [vmem:[#allocation8 + $0xb0] sm:$0xff] }
 0x387   :  { %v2445_v9 = vpop.permute.xlu0 %2444  ;;  %v2865_v3 = vld [vmem:[#allocation8 + $0x98] sm:$0xff] }
 0x388   :  { %v2350_v1 = vpop.permute.xlu1 %2349  ;;  %v2867_v42 = vld [vmem:[#allocation8 + $0xa8] sm:$0xff]  ;;  %2485 = vst.msk [vmem:[#allocation8 + $0xc0] sm:$0xff] %vm2476_vm13, %v2445_v9  ;;  %v2904_v17 = vpack.c.bf16 %v2868_v16, %v2865_v3 }
 0x389   :  { %2389 = vst.msk [vmem:[#allocation8 + $0xd8] sm:$0xff] %vm2379_vm12, %v2350_v1  ;;  %v2903_v37 = vpack.c.bf16 %v2867_v42, %v2864_v24 }
 0x38a   :  { %3149 = vmatprep.mubr.bf16.mxu1 %v2904_v17 }
 0x38b   :  { %v2671_v12 = vpop.permute.xlu0 %2670  ;;  %3150 = vmatmul.mubr.bf16.gmra.mxu1 %v2903_v37  ;;  %v2851_v37 = vld [vmem:[#allocation8 + $0x28] sm:$0xff] }
 0x38c   :  { %v2576_v34 = vpop.permute.xlu1 %2575  ;;  %2710 = vst.msk [vmem:[#allocation8 + $0xc8] sm:$0xff] %vm2379_vm12, %v2671_v12 }
 0x38d   :  { %2614 = vst.msk [vmem:[#allocation8 + $0xe0] sm:$0xff] %vm2282_vm11, %v2576_v34 }
 0x38f   :  { %v2767_v43 = vpop.permute.xlu0 %2766  ;;  %v2870_v47 = vld [vmem:[#allocation8 + $0xc0] sm:$0xff] }
 0x390   :  { %v2447_v30 = vpop.permute.xlu1 %2446  ;;  %2806 = vst.msk [vmem:[#allocation8 + $0xc8] sm:$0xff] %vm2476_vm13, %v2767_v43 }
 0x391   :  { %2486 = vst.msk [vmem:[#allocation8 + $0xd8] sm:$0xff] %vm2476_vm13, %v2447_v30  ;;  %v2848_v30 = vld [vmem:[#allocation8 + $0x10] sm:$0xff] }
 0x393   :  { %v2255_v58 = vpop.permute.xlu0 %2254 }
 0x394   :  { %v2673_v26 = vpop.permute.xlu1 %2672  ;;  %2293 = vst.msk [vmem:[#allocation8 + $0xf0] sm:$0xff] %vm2282_vm11, %v2255_v58  ;;  %v2896_v58 = vpack.c.bf16 %v2851_v37, %v2848_v30 }
 0x395   :  { %2711 = vst.msk [vmem:[#allocation8 + $0xe0] sm:$0xff] %vm2379_vm12, %v2673_v26  ;;  %v2854_v26 = vld [vmem:[#allocation8 + $0x40] sm:$0xff] }
 0x397   :  { %v2352_v44 = vpop.permute.xlu0 %2351  ;;  %v2871_v53 = vld [vmem:[#allocation8 + $0xc8] sm:$0xff] }
 0x398   :  { %v2769_v45 = vpop.permute.xlu1 %2768  ;;  %2390 = vst.msk [vmem:[#allocation8 + $0xf0] sm:$0xff] %vm2379_vm12, %v2352_v44  ;;  %v2873_v52 = vld [vmem:[#allocation8 + $0xd8] sm:$0xff] }
 0x399   :  { %2807 = vst.msk [vmem:[#allocation8 + $0xe0] sm:$0xff] %vm2476_vm13, %v2769_v45  ;;  %v2906_v23 = vpack.c.bf16 %v2873_v52, %v2870_v47  ;;  %v2860_v45 = vld [vmem:[#allocation8 + $0x70] sm:$0xff]  ;;  %v2869_v52 = vld [vmem:[#allocation8 + $0xb8] sm:$0xff]  ;;  %v2887_v47 = vld [vmem:[#allocation8 + $0x148] sm:$0xff] }
 0x39b   :  { %v2578_v49 = vpop.permute.xlu0 %2577 }
 0x39c   :  { %v2257_v35 = vpop.permute.xlu1 %2256  ;;  %2615 = vst.msk [vmem:[#allocation8 + $0xf8] sm:$0xff] %vm2282_vm11, %v2578_v49 }
 0x39d   :  { %2294 = vst.msk [vmem:[#allocation8 + $0x108] sm:$0xff] %vm2282_vm11, %v2257_v35  ;;  %v2866_v35 = vld [vmem:[#allocation8 + $0xa0] sm:$0xff] }
 0x39f   :  { %v2449_v11 = vpop.permute.xlu0 %2448 }
 0x3a0   :  { %v2354_v31 = vpop.permute.xlu1 %2353  ;;  %v2874_v56 = vld [vmem:[#allocation8 + $0xe0] sm:$0xff]  ;;  %2487 = vst.msk [vmem:[#allocation8 + $0xf0] sm:$0xff] %vm2476_vm13, %v2449_v11  ;;  %v2875_v11 = vld [vmem:[#allocation8 + $0xe8] sm:$0xff] }
 0x3a1   :  { %2391 = vst.msk [vmem:[#allocation8 + $0x108] sm:$0xff] %vm2379_vm12, %v2354_v31  ;;  %v2907_v36 = vpack.c.bf16 %v2874_v56, %v2871_v53  ;;  %v2905_v31 = vpack.c.bf16 %v2869_v52, %v2866_v35  ;;  %v2872_v53 = vld [vmem:[#allocation8 + $0xd0] sm:$0xff] }
 0x3a2   :  { %v2908_v56 = vpack.c.bf16 %v2875_v11, %v2872_v53 }
 0x3a3   :  { %3157 = vmatprep.mubr.bf16.mxu1 %v2907_v36  ;;  %v2675_v20 = vpop.permute.xlu0 %2674  ;;  %v2881_v36 = vld [vmem:[#allocation8 + $0x118] sm:$0xff] }
 0x3a4   :  { %v2580_v61 = vpop.permute.xlu1 %2579  ;;  %3158 = vmatmul.mubr.bf16.gmra.mxu1 %v2906_v23  ;;  %2712 = vst.msk [vmem:[#allocation8 + $0xf8] sm:$0xff] %vm2379_vm12, %v2675_v20  ;;  %v2878_v23 = vld [vmem:[#allocation8 + $0x100] sm:$0xff] }
 0x3a5   :  { %2616 = vst.msk [vmem:[#allocation8 + $0x110] sm:$0xff] %vm2282_vm11, %v2580_v61  ;;  %v2911_v20 = vpack.c.bf16 %v2881_v36, %v2878_v23  ;;  %v2884_v61 = vld [vmem:[#allocation8 + $0x130] sm:$0xff] }
 0x3a7   :  { %v2771_v63 = vpop.permute.xlu0 %2770  ;;  %v2876_v57 = vld [vmem:[#allocation8 + $0xf0] sm:$0xff] }
 0x3a8   :  { %v2451_v48 = vpop.permute.xlu1 %2450  ;;  %2808 = vst.msk [vmem:[#allocation8 + $0xf8] sm:$0xff] %vm2476_vm13, %v2771_v63  ;;  %v2914_v63 = vpack.c.bf16 %v2887_v47, %v2884_v61 }
 0x3a9   :  { %2488 = vst.msk [vmem:[#allocation8 + $0x108] sm:$0xff] %vm2476_vm13, %v2451_v48  ;;  %v2890_v48 = vld [vmem:[#allocation8 + $0x160] sm:$0xff] }
 0x3ab   :  { %v2259_v0 = vpop.permute.xlu0 %2258 }
 0x3ac   :  { %v2677_v28 = vpop.permute.xlu1 %2676  ;;  %2295 = vst.msk [vmem:[#allocation8 + $0x120] sm:$0xff] %vm2282_vm11, %v2259_v0  ;;  %v2893_v0 = vld [vmem:[#allocation8 + $0x178] sm:$0xff] }
 0x3ad   :  { %2713 = vst.msk [vmem:[#allocation8 + $0x110] sm:$0xff] %vm2379_vm12, %v2677_v28  ;;  %v2917_v28 = vpack.c.bf16 %v2893_v0, %v2890_v48 }
 0x3af   :  { %v2356_v5 = vpop.permute.xlu0 %2355  ;;  %v2877_v40 = vld [vmem:[#allocation8 + $0xf8] sm:$0xff] }
 0x3b0   :  { %v2773_v7 = vpop.permute.xlu1 %2772  ;;  %2392 = vst.msk [vmem:[#allocation8 + $0x120] sm:$0xff] %vm2379_vm12, %v2356_v5  ;;  %v2879_v51 = vld [vmem:[#allocation8 + $0x108] sm:$0xff] }
 0x3b1   :  { %2809 = vst.msk [vmem:[#allocation8 + $0x110] sm:$0xff] %vm2476_vm13, %v2773_v7  ;;  %v2909_v50 = vpack.c.bf16 %v2879_v51, %v2876_v57 }
 0x3b3   :  { %v2582_v8 = vpop.permute.xlu0 %2581 }
 0x3b4   :  { %v2261_v29 = vpop.permute.xlu1 %2260  ;;  %2617 = vst.msk [vmem:[#allocation8 + $0x128] sm:$0xff] %vm2282_vm11, %v2582_v8 }
 0x3b5   :  { %2296 = vst.msk [vmem:[#allocation8 + $0x138] sm:$0xff] %vm2282_vm11, %v2261_v29 }
 0x3b7   :  { %v2453_v54 = vpop.permute.xlu0 %2452 }
 0x3b8   :  { %v2358_v2 = vpop.permute.xlu1 %2357  ;;  %v2880_v38 = vld [vmem:[#allocation8 + $0x110] sm:$0xff]  ;;  %2489 = vst.msk [vmem:[#allocation8 + $0x120] sm:$0xff] %vm2476_vm13, %v2453_v54 }
 0x3b9   :  { %2393 = vst.msk [vmem:[#allocation8 + $0x138] sm:$0xff] %vm2379_vm12, %v2358_v2  ;;  %v2910_v46 = vpack.c.bf16 %v2880_v38, %v2877_v40 }
 0x3bb   :  { %3165 = vmatprep.mubr.bf16.mxu1 %v2910_v46  ;;  %v2679_v27 = vpop.permute.xlu0 %2678 }
 0x3bc   :  { %v2584_v59 = vpop.permute.xlu1 %2583  ;;  %3166 = vmatmul.mubr.bf16.gmra.mxu1 %v2909_v50  ;;  %2714 = vst.msk [vmem:[#allocation8 + $0x128] sm:$0xff] %vm2379_vm12, %v2679_v27 }
 0x3bd   :  { %2618 = vst.msk [vmem:[#allocation8 + $0x140] sm:$0xff] %vm2282_vm11, %v2584_v59 }
 0x3bf   :  { %v2775_v10 = vpop.permute.xlu0 %2774  ;;  %v2882_v21 = vld [vmem:[#allocation8 + $0x120] sm:$0xff] }
 0x3c0   :  { %v2455_v60 = vpop.permute.xlu1 %2454  ;;  %2810 = vst.msk [vmem:[#allocation8 + $0x128] sm:$0xff] %vm2476_vm13, %v2775_v10 }
 0x3c1   :  { %2490 = vst.msk [vmem:[#allocation8 + $0x138] sm:$0xff] %vm2476_vm13, %v2455_v60 }
 0x3c3   :  { %v2263_v13 = vpop.permute.xlu0 %2262 }
 0x3c4   :  { %v2681_v6 = vpop.permute.xlu1 %2680  ;;  %2297 = vst.msk [vmem:[#allocation8 + $0x150] sm:$0xff] %vm2282_vm11, %v2263_v13 }
 0x3c5   :  { %2715 = vst.msk [vmem:[#allocation8 + $0x140] sm:$0xff] %vm2379_vm12, %v2681_v6 }
 0x3c7   :  { %v2360_v41 = vpop.permute.xlu0 %2359  ;;  %v2883_v4 = vld [vmem:[#allocation8 + $0x128] sm:$0xff] }
 0x3c8   :  { %v2777_v15 = vpop.permute.xlu1 %2776  ;;  %2394 = vst.msk [vmem:[#allocation8 + $0x150] sm:$0xff] %vm2379_vm12, %v2360_v41  ;;  %v2885_v55 = vld [vmem:[#allocation8 + $0x138] sm:$0xff] }
 0x3c9   :  { %2811 = vst.msk [vmem:[#allocation8 + $0x140] sm:$0xff] %vm2476_vm13, %v2777_v15  ;;  %v2912_v39 = vpack.c.bf16 %v2885_v55, %v2882_v21 }
 0x3cb   :  { %v2586_v22 = vpop.permute.xlu0 %2585 }
 0x3cc   :  { %v2265_v18 = vpop.permute.xlu1 %2264  ;;  %2619 = vst.msk [vmem:[#allocation8 + $0x158] sm:$0xff] %vm2282_vm11, %v2586_v22 }
 0x3cd   :  { %2298 = vst.msk [vmem:[#allocation8 + $0x168] sm:$0xff] %vm2282_vm11, %v2265_v18 }
 0x3cf   :  { %v2683_v62 = vpop.permute.xlu0 %2682 }
 0x3d0   :  { %v2362_v25 = vpop.permute.xlu1 %2361  ;;  %v2886_v32 = vld [vmem:[#allocation8 + $0x140] sm:$0xff]  ;;  %2716 = vst.msk [vmem:[#allocation8 + $0x158] sm:$0xff] %vm2379_vm12, %v2683_v62 }
 0x3d1   :  { %2395 = vst.msk [vmem:[#allocation8 + $0x168] sm:$0xff] %vm2379_vm12, %v2362_v25  ;;  %v2913_v33 = vpack.c.bf16 %v2886_v32, %v2883_v4 }
 0x3d3   :  { %3173 = vmatprep.mubr.bf16.mxu1 %v2913_v33  ;;  %v2779_v24 = vpop.permute.xlu0 %2778 }
 0x3d4   :  { %v2588_v9 = vpop.permute.xlu1 %2587  ;;  %3174 = vmatmul.mubr.bf16.gmra.mxu1 %v2912_v39  ;;  %2812 = vst.msk [vmem:[#allocation8 + $0x158] sm:$0xff] %vm2476_vm13, %v2779_v24 }
 0x3d5   :  { %2620 = vst.msk [vmem:[#allocation8 + $0x170] sm:$0xff] %vm2282_vm11, %v2588_v9 }
 0x3d6   :  { %2717 = vst.msk [vmem:[#allocation8 + $0x170] sm:$0xff] %vm2379_vm12, %v5285_v14  ;;  %v2857_v14 = vld [vmem:[#allocation8 + $0x58] sm:$0xff] }
 0x3d7   :  { %2813 = vst.msk [vmem:[#allocation8 + $0x170] sm:$0xff] %vm2476_vm13, %v5295_v19  ;;  %v2457_v1 = vpop.permute.xlu0 %2456  ;;  %v2863_v19 = vld [vmem:[#allocation8 + $0x88] sm:$0xff]  ;;  %v2899_v44 = vpack.c.bf16 %v2857_v14, %v2854_v26 }
 0x3d8   :  { %v2459_v3 = vpop.permute.xlu1 %2458  ;;  %2491 = vst.msk [vmem:[#allocation8 + $0x150] sm:$0xff] %vm2476_vm13, %v2457_v1  ;;  %v2902_v49 = vpack.c.bf16 %v2863_v19, %v2860_v45 }
 0x3d9   :  { %2492 = vst.msk [vmem:[#allocation8 + $0x168] sm:$0xff] %vm2476_vm13, %v2459_v3 }
 0x3db   :  { %v2889_v16 = vld [vmem:[#allocation8 + $0x158] sm:$0xff] }
 0x3de   :  { %v2892_v42 = vld [vmem:[#allocation8 + $0x170] sm:$0xff] }
 0x3df   :  { %v2916_v17 = vpack.c.bf16 %v2892_v42, %v2889_v16  ;;  %v2888_v12 = vld [vmem:[#allocation8 + $0x150] sm:$0xff] }
 0x3e0   :  { %v2891_v34 = vld [vmem:[#allocation8 + $0x168] sm:$0xff] }
 0x3e1   :  { %3181 = vmatprep.mubr.bf16.mxu1 %v2916_v17  ;;  %v2915_v43 = vpack.c.bf16 %v2891_v34, %v2888_v12 }
 0x3e3   :  { %3182 = vmatmul.mubr.bf16.gmra.mxu1 %v2915_v43  ;;  %v5482_v43 = vld [vmem:[%s5512_s6] ss:$0 sm:$0xff]  ;;  %s3799_s6 = smov [#allocation9]  }
 0x3e4   :  { %3671 = vmatprep.mubr.msk.bf16.mxu1 %vm174_vm0, %v2896_v58  ;;  %s3344_s2 = sshll.u32 %s3799_s6, 4  ;;  %s3345_s2 = int_to_ptr.vmem [resolvable:$true] %s3344_s2 }
 0x3e5   :  { %s3768_s15 = scalar_lea.vmem %s3345_s2, 32  ;;  %p3773_p1 = scmp.lt.s32.totalorder %s3345_s2, %s3345_s2 }
 0x3e6   :  { %p3769_p0 = scmp.ne.s32.totalorder %s3345_s2, %s3768_s15  ;;  %p3774_p2 = scmp.lt.s32.totalorder %s3768_s15, %s3768_s15 }
 0x3e8   :  { %p3775_p3 = por %p3774_p2, %p3773_p1 }
 0x3ea   :  { %p3776_p4 = pnand %p3775_p3, %p3769_p0 }
 0x3eb   :  { %3672 = vmatmul.mubr.msk.bf16.vlgmr.msra.gmra.mxu1 %vm174_vm0, %v2899_v44 }
 0x3ec   :  { %3675 = vmatprep.mubr.msk.bf16.mxu1 %vm174_vm0, %v2902_v49 }
 0x3f3   :  { %3676 = vmatmul.mubr.msk.bf16.gmra.mxu1 %vm174_vm0, %v2905_v31 }
 0x3f4   :  { %3679 = vmatprep.mubr.msk.bf16.mxu1 %vm174_vm0, %v2908_v56 }
 0x3fb   :  { %3680 = vmatmul.mubr.msk.bf16.gmra.mxu1 %vm174_vm0, %v2911_v20 }
 0x3fc   :  { %3683 = vmatprep.mubr.msk.bf16.mxu1 %vm174_vm0, %v2914_v63 }
 0x403   :  { %3684 = vmatmul.mubr.msk.bf16.gmra.mxu1 %vm174_vm0, %v2917_v28 }
 0x40c   :  { %v3529_v5 = vpop.f32.mrf.mxu1 }
 0x40e   :  { %v3530_v7 = vpop.f32.mrf.mxu1 }
 0x40f   :  { %v3531_v8 = vadd.f32 %v3530_v7, %v3529_v5 }
 0x410   :  { %v3532_v29 = vpop.f32.mrf.mxu1 }
 0x411   :  { %v3128_v14 = vadd.f32 %v3531_v8, %v5482_v43 }
 0x412   :  { %v3533_v51 = vpop.f32.mrf.mxu1 }
 0x413   :  { %v3534_v54 = vadd.f32 %v3533_v51, %v3532_v29 }
 0x415   :  { %v3131_v45 = vadd.f32 %v3534_v54, %v5482_v43 }
 0x424   :  { %v3535_v2 = vpop.f32.mrf.mxu1 }
 0x426   :  { %v3536_v40 = vpop.f32.mrf.mxu1 }
 0x427   :  { %v3537_v38 = vadd.f32 %v3536_v40, %v3535_v2 }
 0x428   :  { %v3538_v46 = vpop.f32.mrf.mxu1 }
 0x429   :  { %v3136_v26 = vadd.f32 %v3537_v38, %v5482_v43 }
 0x42a   :  { %v3539_v57 = vpop.f32.mrf.mxu1 }
 0x42b   :  { %v3540_v50 = vadd.f32 %v3539_v57, %v3538_v46 }
 0x42d   :  { %v3139_v52 = vadd.f32 %v3540_v50, %v5482_v43 }
 0x43c   :  { %v3541_v27 = vpop.f32.mrf.mxu1 }
 0x43e   :  { %v3542_v59 = vpop.f32.mrf.mxu1 }
 0x43f   :  { %v3543_v10 = vadd.f32 %v3542_v59, %v3541_v27 }
 0x440   :  { %v3544_v60 = vpop.f32.mrf.mxu1 }
 0x441   :  { %v3144_v47 = vadd.f32 %v3543_v10, %v5482_v43 }
 0x442   :  { %v3545_v13 = vpop.f32.mrf.mxu1 }
 0x443   :  { %v3546_v6 = vadd.f32 %v3545_v13, %v3544_v60 }
 0x445   :  { %v3147_v7 = vadd.f32 %v3546_v6, %v5482_v43 }
 0x44b   :  { %v3547_v41 = vpop.f32.mrf.mxu1 }
 0x44d   :  { %v3548_v15 = vpop.f32.mrf.mxu1 }
 0x44e   :  { %v3549_v22 = vadd.f32 %v3548_v15, %v3547_v41 }
 0x44f   :  { %v3550_v18 = vpop.f32.mrf.mxu1 }
 0x450   :  { %v3152_v5 = vadd.f32 %v3549_v22, %v5482_v43 }
 0x451   :  { %v3551_v55 = vpop.f32.mrf.mxu1 }
 0x452   :  { %v3552_v62 = vadd.f32 %v3551_v55, %v3550_v18 }
 0x454   :  { %v3155_v29 = vadd.f32 %v3552_v62, %v5482_v43 }
 0x464   :  { %v3553_v25 = vpop.f32.mrf.mxu1 }
 0x466   :  { %v3554_v4 = vpop.f32.mrf.mxu1 }
 0x467   :  { %v3555_v8 = vadd.f32 %v3554_v4, %v3553_v25 }
 0x468   :  { %v3556_v32 = vpop.f32.mrf.mxu1 }
 0x469   :  { %v3160_v6 = vadd.f32 %v3555_v8, %v5482_v43 }
 0x46a   :  { %v3557_v33 = vpop.f32.mrf.mxu1 }
 0x46b   :  { %v3558_v46 = vadd.f32 %v3557_v33, %v3556_v32 }
 0x46d   :  { %v3163_v55 = vadd.f32 %v3558_v46, %v5482_v43 }
 0x47c   :  { %v3559_v21 = vpop.f32.mrf.mxu1 }
 0x47e   :  { %v3560_v39 = vpop.f32.mrf.mxu1 }
 0x47f   :  { %v3561_v50 = vadd.f32 %v3560_v39, %v3559_v21 }
 0x480   :  { %v3562_v24 = vpop.f32.mrf.mxu1 }
 0x481   :  { %v3168_v4 = vadd.f32 %v3561_v50, %v5482_v43 }
 0x482   :  { %v3563_v9 = vpop.f32.mrf.mxu1 }
 0x483   :  { %v3564_v13 = vadd.f32 %v3563_v9, %v3562_v24 }
 0x494   :  { %v3565_v1 = vpop.f32.mrf.mxu1 }
 0x496   :  { %v3566_v3 = vpop.f32.mrf.mxu1 }
 0x497   :  { %v3567_v22 = vadd.f32 %v3566_v3, %v3565_v1 }
 0x498   :  { %v3568_v16 = vpop.f32.mrf.mxu1 }
 0x49a   :  { %v3569_v42 = vpop.f32.mrf.mxu1 }
 0x49b   :  { %v3570_v24 = vadd.f32 %v3569_v42, %v3568_v16 }
 0x4a3   :  { %v5473_v17 = vpop.f32.mrf.mxu1 }
 0x4a5   :  { %v3572_v37 = vpop.f32.mrf.mxu1 }
 0x4a6   :  { %v3573_v1 = vadd.f32 %v3572_v37, %v5473_v17 }
 0x4a7   :  { %v5475_v12 = vpop.f32.mrf.mxu1 }
 0x4a9   :  { %v5477_v34 = vpop.f32.mrf.mxu1 }
 0x4ab   :  { %v3673_v30 = vpop.f32.mrf.mxu1 }
 0x4ac   :  { %v3233_v35 = vadd.f32 %v3673_v30, %v3136_v26  ;;  %v3171_v30 = vadd.f32 %v3564_v13, %v5482_v43 }
 0x4ad   :  { %v3224_v58 = vpop.f32.mrf.mxu1 }
 0x4ae   :  { %v3225_v44 = vadd.f32 %v3224_v58, %v3128_v14  ;;  %v3289_v20 = vmax.f32 %v3233_v35, 0.0  ;;  %v3176_v14 = vadd.f32 %v3567_v22, %v5482_v43 }
 0x4af   :  { %v3674_v19 = vpop.f32.mrf.mxu1 }
 0x4b0   :  { %v3287_v53 = vmax.f32 %v3225_v44, 0.0  ;;  %v3236_v56 = vadd.f32 %v3674_v19, %v3139_v52  ;;  %v3576_v44 = vadd.f32 %v5477_v34, %v5475_v12 }
 0x4b1   :  { %v3227_v49 = vpop.f32.mrf.mxu1 }
 0x4b2   :  { %v3228_v11 = vadd.f32 %v3227_v49, %v3131_v45  ;;  %v3290_v0 = vmax.f32 %v3236_v56, 0.0  ;;  %v3184_v56 = vadd.f32 %v3573_v1, %v5482_v43  ;;  %v3187_v17 = vadd.f32 %v3576_v44, %v5482_v43 }
 0x4b3   :  { %v3677_v31 = vpop.f32.mrf.mxu1 }
 0x4b4   :  { %v3288_v36 = vmax.f32 %v3228_v11, 0.0  ;;  %v3249_v54 = vadd.f32 %v3677_v31, %v3152_v5  ;;  %v3179_v31 = vadd.f32 %v3570_v24, %v5482_v43 }
 0x4b5   :  { %v3240_v23 = vpop.f32.mrf.mxu1 }
 0x4b6   :  { %v3303_v61 = vadd.f32 %v3288_v36, %v3287_v53  ;;  %v3241_v63 = vadd.f32 %v3240_v23, %v3144_v47  ;;  %v3293_v41 = vmax.f32 %v3249_v54, 0.0 }
 0x4b7   :  { %v3678_v48 = vpop.f32.mrf.mxu1 }
 0x4b8   :  { %v3304_v28 = vadd.f32 %v3303_v61, %v3289_v20  ;;  %v3291_v2 = vmax.f32 %v3241_v63, 0.0  ;;  %v3252_v59 = vadd.f32 %v3678_v48, %v3155_v29 }
 0x4b9   :  { %v3243_v51 = vpop.f32.mrf.mxu1 }
 0x4ba   :  { %v3305_v40 = vadd.f32 %v3304_v28, %v3290_v0  ;;  %v3244_v38 = vadd.f32 %v3243_v51, %v3147_v7  ;;  %v3294_v62 = vmax.f32 %v3252_v59, 0.0 }
 0x4bb   :  { %v3681_v57 = vpop.f32.mrf.mxu1 }
 0x4bc   :  { %v3306_v27 = vadd.f32 %v3305_v40, %v3291_v2  ;;  %v3292_v10 = vmax.f32 %v3244_v38, 0.0  ;;  %v3265_v39 = vadd.f32 %v3681_v57, %v3168_v4 }
 0x4bd   :  { %v3256_v60 = vpop.f32.mrf.mxu1 }
 0x4be   :  { %v3307_v15 = vadd.f32 %v3306_v27, %v3292_v10  ;;  %v3257_v32 = vadd.f32 %v3256_v60, %v3160_v6  ;;  %v3297_v49 = vmax.f32 %v3265_v39, 0.0 }
 0x4bf   :  { %v3682_v18 = vpop.f32.mrf.mxu1 }
 0x4c0   :  { %v3308_v25 = vadd.f32 %v3307_v15, %v3293_v41  ;;  %v3295_v3 = vmax.f32 %v3257_v32, 0.0  ;;  %v3268_v19 = vadd.f32 %v3682_v18, %v3171_v30 }
 0x4c1   :  { %v3259_v33 = vpop.f32.mrf.mxu1 }
 0x4c2   :  { %v3309_v21 = vadd.f32 %v3308_v25, %v3294_v62  ;;  %v3260_v58 = vadd.f32 %v3259_v33, %v3163_v55  ;;  %v3298_v16 = vmax.f32 %v3268_v19, 0.0 }
 0x4c3   :  { %v3685_v9 = vpop.f32.mrf.mxu1 }
 0x4c4   :  { %v3296_v26 = vmax.f32 %v3260_v58, 0.0  ;;  %v3310_v53 = vrot.slane %v3309_v21, 4  ;;  %v3281_v36 = vadd.f32 %v3685_v9, %v3184_v56 }
 0x4c5   :  { %v3272_v45 = vpop.f32.mrf.mxu1 }
 0x4c6   :  { %v3316_v35 = vadd.f32 %v3296_v26, %v3295_v3  ;;  %v3273_v52 = vadd.f32 %v3272_v45, %v3176_v14  ;;  %v3311_v12 = vadd.f32 %v3310_v53, %v3309_v21  ;;  %v3301_v48 = vmax.f32 %v3281_v36, 0.0 }
 0x4c7   :  { %v3686_v11 = vpop.f32.mrf.mxu1 }
 0x4c8   :  { %v3317_v42 = vadd.f32 %v3316_v35, %v3297_v49  ;;  %v3299_v47 = vmax.f32 %v3273_v52, 0.0  ;;  %v3284_v61 = vadd.f32 %v3686_v11, %v3187_v17  ;;  %v3312_v7 = vrot.slane %v3311_v12, 2 }
 0x4c9   :  { %v3275_v37 = vpop.f32.mrf.mxu1 }
 0x4ca   :  { %v3318_v23 = vadd.f32 %v3317_v42, %v3298_v16  ;;  %v3276_v20 = vadd.f32 %v3275_v37, %v3179_v31  ;;  %v3302_v28 = vmax.f32 %v3284_v61, 0.0  ;;  %v3313_v51 = vadd.f32 %v3312_v7, %v3311_v12 }
 0x4cc   :  { %v3319_v34 = vadd.f32 %v3318_v23, %v3299_v47  ;;  %v3300_v63 = vmax.f32 %v3276_v20, 0.0  ;;  %v3314_v2 = vrot.slane %v3313_v51, 1 }
 0x4ce   :  { %v3320_v0 = vadd.f32 %v3319_v34, %v3300_v63  ;;  %v3315_v38 = vadd.f32 %v3314_v2, %v3313_v51 }
 0x4d0   :  { %v3321_v5 = vadd.f32 %v3320_v0, %v3301_v48  ;;  %v3330_v50 = vmul.f32 0.015625, %v3315_v38 }
 0x4d2   :  { %v3322_v8 = vadd.f32 %v3321_v5, %v3302_v28 }
 0x4d4   :  { %v3323_v29 = vrot.slane %v3322_v8, 4 }
 0x4d6   :  { %v3324_v54 = vadd.f32 %v3323_v29, %v3322_v8 }
 0x4d8   :  { %v3325_v43 = vrot.slane %v3324_v54, 2 }
 0x4da   :  { %v3326_v40 = vadd.f32 %v3325_v43, %v3324_v54 }
 0x4dc   :  { %v3327_v46 = vrot.slane %v3326_v40, 1 }
 0x4de   :  { %v3328_v57 = vadd.f32 %v3327_v46, %v3326_v40 }
 0x4e0   :  { %v3331_v27 = vmul.f32 0.015625, %v3328_v57 }
 0x4e2   :  { %v3335_v59 = vsel %vm3334_vm14, %v3331_v27, %v3330_v50 }
 0x4e3   :  { %3337 = vst [vmem:[#allocation9] sm:$0x3] %v3335_v59 }
 0x4e4   :  { %3779 = shalt.err (!%p3776_p4)
}
 0x4e5   :  { %3347 = dma.vmem_to_hbm [thread:$0]  %s3345_s2, 32, %s5513_s7, [#allocation10]  }
 0x4e6   :  { %3788 = dma.done.wait [#allocation10], 32  }
 0x4e7   :  { %3789 = vsyncadd [#allocation10], 4294967264 }
 0x4e8   :  { %3351 = vsyncpa [#allocation10], 1 }

</bundles_post_ra>
